<compile_context>
chip_gen: v7x
topology: tpu7x:2x2x1
jax: 0.10.0
libtpu: 0.0.40
codegen_flags: <defaults>
</compile_context>

<pallas_src>
import math
import functools

import jax
import jax.numpy as jnp
from jax import lax
from jax.experimental import pallas as pl
from jax.experimental.pallas import tpu as pltpu


# ----------------------------------------------------------------------------
# helpers
# ----------------------------------------------------------------------------
def _dim_tile(n, target, align=16):
    """Block size along one axis: full extent if it already fits `target`, else the
    largest align-multiple divisor of n that is <= target (align=16 keeps the
    second-minor block dim legal for both f32 (8) and bf16 (16) Mosaic tilings)."""
    if n <= target:
        return n
    best = 0
    for t in range(align, min(n, target) + 1, align):
        if n % t == 0:
            best = t
    if best:
        return best
    for t in range((target // align + 1) * align, n, align):
        if n % t == 0:
            return t
    # TODO(synk): pad awkward extents instead of falling back to the full extent.
    return n


def _attn_node_tile(n_nodes, s, d, budget_bytes=6 * 1024 * 1024):
    """VMEM-aware node-tile for attention (fits v5e 16 MiB scoped default and up)."""
    per_node = 48 * s * d + 12 * s * s + 1     # x/out blocks + qkv + scores/probs/ctx
    cap = max(1, budget_bytes // per_node)
    return _dim_tile(n_nodes, min(128, cap))


def positional_embedding(seq_len, d_model):
    position = jnp.arange(seq_len, dtype=jnp.float32)[:, None]
    div_term = jnp.exp(jnp.arange(0, d_model, 2, dtype=jnp.float32)
                       * -(math.log(10000.0) / d_model))
    pe = jnp.zeros((seq_len, d_model), dtype=jnp.float32)
    pe = pe.at[:, 0::2].set(jnp.sin(position * div_term))
    pe = pe.at[:, 1::2].set(jnp.cos(position * div_term))
    return pe  # (S, D)


# ----------------------------------------------------------------------------
# Kernel 1: GRU input projection  gi = x @ Wih3 + bih3   (hoisted off the serial path)
# ----------------------------------------------------------------------------
def gru_inproj_kernel(x_ref, w_ref, b_ref, o_ref):
    x = x_ref[...].astype(jnp.bfloat16)
    y = jnp.dot(x, w_ref[...], preferred_element_type=jnp.float32) + b_ref[...]
    o_ref[...] = y.astype(o_ref.dtype)


def gru_input_projection(x_flat, kp):
    """x_flat: (B*S*N, D) f32 rows -> (B*S*N, 3D) bf16 gate pre-activations."""
    R, D = x_flat.shape
    G3 = kp["wih3_t"].shape[1]
    TR = _dim_tile(R, max(16, min(512, R // 2)))
    return pl.pallas_call(
        gru_inproj_kernel,
        out_shape=jax.ShapeDtypeStruct((R, G3), jnp.bfloat16),
        grid_spec=pltpu.PrefetchScalarGridSpec(
            num_scalar_prefetch=0,
            grid=(R // TR,),
            in_specs=[
                pl.BlockSpec((TR, D), lambda i: (i, 0)),
                pl.BlockSpec((D, G3), lambda i: (0, 0)),
                pl.BlockSpec((1, G3), lambda i: (0, 0)),
            ],
            out_specs=pl.BlockSpec((TR, G3), lambda i: (i, 0)),
        ),
        compiler_params=pltpu.CompilerParams(dimension_semantics=("parallel",)),
    )(x_flat, kp["wih3_t"], kp["bih3"])


# ----------------------------------------------------------------------------
# Kernel 2: GRU recurrence.  Whole sequence handled inside one grid step per
# (batch, node-tile) pair -> grid is fully parallel, no per-time-step grid overhead.
# ----------------------------------------------------------------------------
def gru_rec_kernel(gi_ref, w_ref, b_ref, out_ref, *, d):
    seq_len = gi_ref.shape[1]
    tn = gi_ref.shape[2]
    whh = w_ref[...]                       # (D, 3D) bf16
    bhh = b_ref[...]                       # (1, 3D) f32
    fused = (d % 128 == 0)                 # fused dot only with 128-aligned gate slices
    if not fused:
        w_r, w_z, w_n = whh[:, :d], whh[:, d:2 * d], whh[:, 2 * d:]

    def step(s, h):
        g = gi_ref[0, s].astype(jnp.float32)                       # (TN, 3D)
        hb = h.astype(jnp.bfloat16)
        if fused:
            hh = jnp.dot(hb, whh, preferred_element_type=jnp.float32) + bhh
            hr, hz, hn = hh[:, :d], hh[:, d:2 * d], hh[:, 2 * d:]
        else:
            hr = jnp.dot(hb, w_r, preferred_element_type=jnp.float32) + bhh[:, :d]
            hz = jnp.dot(hb, w_z, preferred_element_type=jnp.float32) + bhh[:, d:2 * d]
            hn = jnp.dot(hb, w_n, preferred_element_type=jnp.float32) + bhh[:, 2 * d:]
        r = jax.nn.sigmoid(g[:, :d] + hr)
        z = jax.nn.sigmoid(g[:, d:2 * d] + hz)
        n = jnp.tanh(g[:, 2 * d:] + r * hn)
        hy = (1.0 - z) * n + z * h
        out_ref[s, 0] = hy.astype(out_ref.dtype)
        return hy

    lax.fori_loop(0, seq_len, step, jnp.zeros((tn, d), jnp.float32),
                  unroll=(seq_len <= 16))


def gru_recurrence(gi, kp):
    """gi: (B, S, N, 3D) bf16 -> (S, B, N, D) bf16 stacked hidden states
    (flat-order identical to torch.stack(output, 0) of shape (S, B*N, D))."""
    B, S, N, G3 = gi.shape
    D = G3 // 3
    TN = _dim_tile(N, 256)
    return pl.pallas_call(
        functools.partial(gru_rec_kernel, d=D),
        out_shape=jax.ShapeDtypeStruct((S, B, N, D), jnp.bfloat16),
        grid_spec=pltpu.PrefetchScalarGridSpec(
            num_scalar_prefetch=0,
            grid=(B, N // TN),
            in_specs=[
                pl.BlockSpec((1, S, TN, G3), lambda b, nt: (b, 0, nt, 0)),
                pl.BlockSpec((D, G3), lambda b, nt: (0, 0)),
                pl.BlockSpec((1, G3), lambda b, nt: (0, 0)),
            ],
            out_specs=pl.BlockSpec((S, 1, TN, D), lambda b, nt: (0, b, nt, 0)),
        ),
        compiler_params=pltpu.CompilerParams(
            dimension_semantics=("parallel", "parallel")),
    )(gi, kp["whh3_t"], kp["bhh3"])


# ----------------------------------------------------------------------------
# Kernel 3: temporal multi-head self-attention over the time axis, per node.
# Reads/writes (B, S, N, D) directly; positional embedding fused in-kernel;
# fused QKV projection; per-head outputs folded into rows of Wo (no concat).
# ----------------------------------------------------------------------------
def attn_kernel(x_ref, pe_ref, wqkv_ref, wo_ref, bqkv_ref, bo_ref, out_ref,
                *, num_heads, d):
    _, S, TN, _ = x_ref.shape
    hd = d // num_heads

    x = x_ref[0] + pe_ref[...][:, None, :]              # (S, TN, D) f32
    xg = pltpu.einshape("snd->nsd", x)                  # (TN, S, D)  VMEM relayout
    x2 = xg.reshape(TN * S, d).astype(jnp.bfloat16)
    qkv = (jnp.dot(x2, wqkv_ref[...], preferred_element_type=jnp.float32)
           + bqkv_ref[...]).reshape(TN, S, 3 * d)       # f32; 1/sqrt(hd) folded into Wq

    acc = jnp.zeros((TN * S, d), jnp.float32)
    for h in range(num_heads):                           # small unrolled head loop
        lo = h * hd
        q = qkv[:, :, lo:lo + hd].astype(jnp.bfloat16)
        k = qkv[:, :, d + lo:d + lo + hd].astype(jnp.bfloat16)
        v = qkv[:, :, 2 * d + lo:2 * d + lo + hd].astype(jnp.bfloat16)
        s_mat = jnp.einsum("gse,gte->gst", q, k,
                           preferred_element_type=jnp.float32)          # (TN, S, S)
        m = jnp.max(s_mat, axis=-1, keepdims=True)
        e = jnp.exp(s_mat - m)
        l = jnp.sum(e, axis=-1, keepdims=True)
        p = (e * pl.reciprocal(l, approx=True)).astype(jnp.bfloat16)    # EUP divide
        ctx = jnp.einsum("gst,gte->gse", p, v,
                         preferred_element_type=jnp.float32)            # (TN, S, hd)
        # concat(ctx_heads) @ Wo == sum_h ctx_h @ Wo[h]
        acc = acc + jnp.dot(ctx.reshape(TN * S, hd).astype(jnp.bfloat16), wo_ref[h],
                            preferred_element_type=jnp.float32)
    y = acc + bo_ref[...]
    y = pltpu.einshape("nsd->snd", y.reshape(TN, S, d))                 # back to (S, TN, D)
    out_ref[0] = y.astype(out_ref.dtype)


def temporal_attention(inputs, pe, kp, num_heads):
    """inputs: (B, S, N, D) f32 -> (B, S, N, D) bf16; attention over time per node."""
    B, S, N, D = inputs.shape
    hd = D // num_heads
    TN = _attn_node_tile(N, S, D)
    return pl.pallas_call(
        functools.partial(attn_kernel, num_heads=num_heads, d=D),
        out_shape=jax.ShapeDtypeStruct((B, S, N, D), jnp.bfloat16),
        grid_spec=pltpu.PrefetchScalarGridSpec(
            num_scalar_prefetch=0,
            grid=(B, N // TN),
            in_specs=[
                pl.BlockSpec((1, S, TN, D), lambda b, nt: (b, 0, nt, 0)),
                pl.BlockSpec((S, D), lambda b, nt: (0, 0)),
                pl.BlockSpec((D, 3 * D), lambda b, nt: (0, 0)),
                pl.BlockSpec((num_heads, hd, D), lambda b, nt: (0, 0, 0)),
                pl.BlockSpec((1, 3 * D), lambda b, nt: (0, 0)),
                pl.BlockSpec((1, D), lambda b, nt: (0, 0)),
            ],
            out_specs=pl.BlockSpec((1, S, TN, D), lambda b, nt: (b, 0, nt, 0)),
        ),
        compiler_params=pltpu.CompilerParams(
            dimension_semantics=("parallel", "parallel"),
            vmem_limit_bytes=32 * 1024 * 1024),
    )(inputs, pe, kp["wqkv_t"], kp["wo_h"], kp["bqkv"], kp["bo"])


# ----------------------------------------------------------------------------
# Kernel 4: fused prediction linear  y = out1 @ W1 + out2 @ W2 + b.
# Index maps absorb the torch reshape+transpose of the GRU output (no HBM transpose,
# no concat materialization); a tiny in-VMEM relayout aligns the two operands.
# ----------------------------------------------------------------------------
def pred_kernel(x1_ref, x2_ref, w1_ref, w2_ref, b_ref, out_ref):
    _, tn, ts, d = x1_ref.shape
    x1 = pltpu.einshape("ntd->tnd", x1_ref[0]).reshape(ts * tn, d)   # bf16
    x2 = x2_ref[0].reshape(ts * tn, d)                               # bf16
    y = (jnp.dot(x1, w1_ref[...], preferred_element_type=jnp.float32)
         + jnp.dot(x2, w2_ref[...], preferred_element_type=jnp.float32)
         + b_ref[...])
    out_ref[0] = y.reshape(ts, tn, d).astype(out_ref.dtype)


def pred_linear(gru_view, out2, kp):
    """gru_view: (B, N, S, D) bf16 (torch-reshaped GRU output), out2: (B, S, N, D) bf16
    -> (B, S, N, D) f32."""
    B, N, S, D = gru_view.shape
    TN = _dim_tile(N, 128)
    TS = _dim_tile(S, 128)
    return pl.pallas_call(
        pred_kernel,
        out_shape=jax.ShapeDtypeStruct((B, S, N, D), jnp.float32),
        grid_spec=pltpu.PrefetchScalarGridSpec(
            num_scalar_prefetch=0,
            grid=(B, N // TN, S // TS),
            in_specs=[
                pl.BlockSpec((1, TN, TS, D), lambda b, nt, st: (b, nt, st, 0)),
                pl.BlockSpec((1, TS, TN, D), lambda b, nt, st: (b, st, nt, 0)),
                pl.BlockSpec((D, D), lambda b, nt, st: (0, 0)),
                pl.BlockSpec((D, D), lambda b, nt, st: (0, 0)),
                pl.BlockSpec((1, D), lambda b, nt, st: (0, 0)),
            ],
            out_specs=pl.BlockSpec((1, TS, TN, D), lambda b, nt, st: (b, st, nt, 0)),
        ),
        compiler_params=pltpu.CompilerParams(
            dimension_semantics=("parallel", "parallel", "parallel")),
    )(gru_view, out2, kp["pred_w1_t"], kp["pred_w2_t"], kp["pred_b"])


# ----------------------------------------------------------------------------
# Full TemporalBlock forward (no wrapper-level transposes; reshapes are flat-preserving).
# ----------------------------------------------------------------------------
def temporal_block_forward(inputs, kp, num_heads):
    B, S, N, D = inputs.shape
    assert D % num_heads == 0, "d_model must be divisible by num_heads"

    # --- GRU branch ---
    gi = gru_input_projection(inputs.reshape(B * S * N, D), kp)      # (B*S*N, 3D) bf16
    gi = gi.reshape(B, S, N, 3 * D)                                   # free reshape
    gru_out = gru_recurrence(gi, kp)                                  # (S, B, N, D) bf16
    # torch: stack(..., 0).reshape(B, N, S, D)  ==  flat reinterpretation (free)
    gru_view = gru_out.reshape(B, N, S, D)

    # --- attention branch (positional embedding fused in-kernel) ---
    pe = positional_embedding(S, D)
    out2 = temporal_attention(inputs, pe, kp, num_heads)              # (B, S, N, D) bf16

    # --- fused prediction linear (torch transpose absorbed in index maps) ---
    return pred_linear(gru_view, out2, kp)


# ----------------------------------------------------------------------------
# Parameters: f32 master weights (torch layouts) + kernel-side fused/bf16 forms.
# ----------------------------------------------------------------------------
def init_params(key, d_model):
    D = d_model
    s = 0.1
    ks = jax.random.split(key, 12)
    return {
        "wih": jax.random.normal(ks[0], (3 * D, D), jnp.float32) * s,   # GRUCell (r,z,n)
        "whh": jax.random.normal(ks[1], (3 * D, D), jnp.float32) * s,
        "bih": jax.random.normal(ks[2], (3 * D,), jnp.float32) * s,
        "bhh": jax.random.normal(ks[3], (3 * D,), jnp.float32) * s,
        "wq": jax.random.normal(ks[4], (D, D), jnp.float32) * s,
        "wk": jax.random.normal(ks[5], (D, D), jnp.float32) * s,
        "wv": jax.random.normal(ks[6], (D, D), jnp.float32) * s,
        "wo": jax.random.normal(ks[7], (D, D), jnp.float32) * s,
        "bq": jax.random.normal(ks[8], (D,), jnp.float32) * s,
        "bk": jax.random.normal(ks[9], (D,), jnp.float32) * s,
        "bv": jax.random.normal(ks[10], (D,), jnp.float32) * s,
        "bo": jnp.zeros((D,), jnp.float32),
        "pred_w": jax.random.normal(ks[11], (D, 2 * D), jnp.float32) * s,
        "pred_b": jnp.zeros((D,), jnp.float32),
    }


def prep_kernel_params(p, num_heads):
    """Fuse / transpose / cast the master weights for the bf16-MXU kernel path."""
    D = p["wih"].shape[1]
    hd = D // num_heads
    scale = 1.0 / math.sqrt(hd)
    bf = jnp.bfloat16
    f32 = jnp.float32
    return {
        "wih3_t": p["wih"].T.astype(bf),                     # (D, 3D) columns [r|z|n]
        "bih3": p["bih"][None, :].astype(f32),
        "whh3_t": p["whh"].T.astype(bf),
        "bhh3": p["bhh"][None, :].astype(f32),
        # 1/sqrt(hd) folded into Wq and bq
        "wqkv_t": jnp.concatenate([p["wq"].T * scale, p["wk"].T, p["wv"].T],
                                  axis=1).astype(bf),        # (D, 3D)
        "bqkv": jnp.concatenate([p["bq"] * scale, p["bk"], p["bv"]])[None, :].astype(f32),
        "wo_h": p["wo"].T.reshape(num_heads, hd, D).astype(bf),
        "bo": p["bo"][None, :].astype(f32),
        "pred_w1_t": p["pred_w"][:, :D].T.astype(bf),
        "pred_w2_t": p["pred_w"][:, D:].T.astype(bf),
        "pred_b": p["pred_b"][None, :].astype(f32),
    }


# ----------------------------------------------------------------------------
# Pure-JAX f32 reference (same math, high-precision matmuls).
# ----------------------------------------------------------------------------
def reference_forward(inputs, p, num_heads):
    B, S, N, D = inputs.shape
    BN = B * N
    hp = dict(precision="highest", preferred_element_type=jnp.float32)

    wih_r, wih_z, wih_n = p["wih"][:D], p["wih"][D:2 * D], p["wih"][2 * D:]
    whh_r, whh_z, whh_n = p["whh"][:D], p["whh"][D:2 * D], p["whh"][2 * D:]
    bih_r, bih_z, bih_n = p["bih"][:D], p["bih"][D:2 * D], p["bih"][2 * D:]
    bhh_r, bhh_z, bhh_n = p["bhh"][:D], p["bhh"][D:2 * D], p["bhh"][2 * D:]

    xs = jnp.transpose(inputs, (0, 2, 1, 3)).reshape(BN, S, D)
    h = jnp.zeros((BN, D), jnp.float32)
    outs = []
    for t in range(S):
        x = xs[:, t, :]
        r = jax.nn.sigmoid(jnp.dot(x, wih_r.T, **hp) + bih_r
                           + jnp.dot(h, whh_r.T, **hp) + bhh_r)
        z = jax.nn.sigmoid(jnp.dot(x, wih_z.T, **hp) + bih_z
                           + jnp.dot(h, whh_z.T, **hp) + bhh_z)
        n = jnp.tanh(jnp.dot(x, wih_n.T, **hp) + bih_n
                     + r * (jnp.dot(h, whh_n.T, **hp) + bhh_n))
        h = (1.0 - z) * n + z * h
        outs.append(h)
    gru_raw = jnp.stack(outs, axis=0)                                   # (S, BN, D)
    out1 = jnp.transpose(gru_raw.reshape(B, N, S, D), (0, 2, 1, 3))     # torch reshape+T

    pe = positional_embedding(S, D)
    xp = inputs + pe[None, :, None, :]
    xpt = jnp.transpose(xp, (0, 2, 1, 3)).reshape(BN * S, D)
    q = (jnp.dot(xpt, p["wq"].T, **hp) + p["bq"]).reshape(BN, S, D)
    k = (jnp.dot(xpt, p["wk"].T, **hp) + p["bk"]).reshape(BN, S, D)
    v = (jnp.dot(xpt, p["wv"].T, **hp) + p["bv"]).reshape(BN, S, D)
    hd = D // num_heads
    heads = []
    for hh in range(num_heads):
        sl = slice(hh * hd, (hh + 1) * hd)
        sc = jnp.einsum("gse,gte->gst", q[:, :, sl], k[:, :, sl],
                        precision="highest") / math.sqrt(hd)
        pr = jax.nn.softmax(sc, axis=-1)
        heads.append(jnp.einsum("gst,gte->gse", pr, v[:, :, sl], precision="highest"))
    ctx = jnp.concatenate(heads, axis=-1)
    y = jnp.dot(ctx.reshape(BN * S, D), p["wo"].T, **hp) + p["bo"]
    out2 = jnp.transpose(y.reshape(B, N, S, D), (0, 2, 1, 3))

    cat = jnp.concatenate([out1, out2], axis=-1)
    out = jnp.dot(cat.reshape(-1, 2 * D), p["pred_w"].T, **hp) + p["pred_b"]
    return out.reshape(B, S, N, D)


if __name__ == "__main__":
    key = jax.random.PRNGKey(0)
    B, S, N, D = 2, 8, 4, 32
    num_heads = 4

    k_in, k_par = jax.random.split(key)
    inputs = jax.random.normal(k_in, (B, S, N, D), dtype=jnp.float32)
    params = init_params(k_par, D)
    kparams = prep_kernel_params(params, num_heads)

    fwd = jax.jit(functools.partial(temporal_block_forward, num_heads=num_heads))
    out = fwd(inputs, kparams)
    jax.block_until_ready(out)
    assert out.shape == (B, S, N, D)

    ref = reference_forward(inputs, params, num_heads)
    err = float(jnp.max(jnp.abs(out - ref)))
    # Per-path tolerance: the kernel runs bf16 MXU matmuls with f32 accumulation
    # (elementwise gates / softmax stay f32), so O(1e-2) deviation from the f32
    # reference is expected; a structural / permutation bug would show up as O(1).
    assert err < 8e-2, f"mismatch vs f32 reference: max abs err = {err}"

    print("KERNEL_OK")
</pallas_src>

<mosaic_0001>
module attributes {stable_mosaic.version = 11 : i64} {
  func.func @attn_kernel(%arg0: i32, %arg1: i32, %arg2: memref<1x8x4x32xf32, #tpu.memory_space<vmem>>, %arg3: memref<8x32xf32, #tpu.memory_space<vmem>>, %arg4: memref<32x96xbf16, #tpu.memory_space<vmem>>, %arg5: memref<4x8x32xbf16, #tpu.memory_space<vmem>>, %arg6: memref<1x96xf32, #tpu.memory_space<vmem>>, %arg7: memref<1x32xf32, #tpu.memory_space<vmem>>, %arg8: memref<1x8x4x32xbf16, #tpu.memory_space<vmem>>) attributes {dimension_semantics = [#tpu.dimension_semantics<parallel>, #tpu.dimension_semantics<parallel>], iteration_bounds = array<i64: 2, 1>, scalar_prefetch = 0 : i64, scratch_operands = 0 : i64, tpu.core_type = #tpu.core_type<tc>, window_params = [{transform_indices = @transform_0, window_bounds = array<i64: 1, 8, 4, 32>}, {pipeline_mode = #tpu.pipeline_mode<synchronous>, transform_indices = @transform_1, window_bounds = array<i64: 8, 32>}, {pipeline_mode = #tpu.pipeline_mode<synchronous>, transform_indices = @transform_2, window_bounds = array<i64: 32, 96>}, {pipeline_mode = #tpu.pipeline_mode<synchronous>, transform_indices = @transform_3, window_bounds = array<i64: 4, 8, 32>}, {pipeline_mode = #tpu.pipeline_mode<synchronous>, transform_indices = @transform_4, window_bounds = array<i64: 1, 96>}, {pipeline_mode = #tpu.pipeline_mode<synchronous>, transform_indices = @transform_5, window_bounds = array<i64: 1, 32>}, {transform_indices = @transform_6, window_bounds = array<i64: 1, 8, 4, 32>}]} {
    %c0 = arith.constant 0 : index
    %c0_0 = arith.constant 0 : index
    %c0_1 = arith.constant 0 : index
    %c0_2 = arith.constant 0 : index
    %0 = vector.load %arg2[%c0, %c0_0, %c0_1, %c0_2] : memref<1x8x4x32xf32, #tpu.memory_space<vmem>>, vector<1x8x4x32xf32>
    %1 = vector.shape_cast %0 : vector<1x8x4x32xf32> to vector<8x4x32xf32>
    %c0_3 = arith.constant 0 : index
    %c0_4 = arith.constant 0 : index
    %2 = vector.load %arg3[%c0_3, %c0_4] : memref<8x32xf32, #tpu.memory_space<vmem>>, vector<8x32xf32>
    %3 = vector.shape_cast %2 : vector<8x32xf32> to vector<8x1x32xf32>
    %4 = vector.broadcast %3 : vector<8x1x32xf32> to vector<8x4x32xf32>
    %5 = arith.addf %1, %4 : vector<8x4x32xf32>
    %6 = tpu.transpose %5, [1, 0, 2] : vector<8x4x32xf32> -> vector<4x8x32xf32>
    %7 = vector.shape_cast %6 : vector<4x8x32xf32> to vector<32x32xf32>
    %8 = arith.truncf %7 : vector<32x32xf32> to vector<32x32xbf16>
    %c0_5 = arith.constant 0 : index
    %c0_6 = arith.constant 0 : index
    %9 = vector.load %arg4[%c0_5, %c0_6] : memref<32x96xbf16, #tpu.memory_space<vmem>>, vector<32x96xbf16>
    %cst = arith.constant dense<0.000000e+00> : vector<32x96xf32>
    %10 = tpu.matmul %8, %9, %cst {dimension_numbers = #tpu.dot_dimension_numbers<[1], [0], [0], [1], [0, 0, 1, 1], [], []>} : vector<32x32xbf16>, vector<32x96xbf16>, vector<32x96xf32> -> vector<32x96xf32>
    %c0_7 = arith.constant 0 : index
    %c0_8 = arith.constant 0 : index
    %11 = vector.load %arg6[%c0_7, %c0_8] : memref<1x96xf32, #tpu.memory_space<vmem>>, vector<1x96xf32>
    %12 = vector.broadcast %11 : vector<1x96xf32> to vector<32x96xf32>
    %13 = arith.addf %10, %12 : vector<32x96xf32>
    %14 = vector.shape_cast %13 : vector<32x96xf32> to vector<4x8x96xf32>
    %cst_9 = arith.constant 0.000000e+00 : f32
    %15 = vector.broadcast %cst_9 : f32 to vector<32x32xf32>
    %16 = vector.extract_strided_slice %14 {offsets = [0, 0, 0], sizes = [4, 8, 8], strides = [1, 1, 1]} : vector<4x8x96xf32> to vector<4x8x8xf32>
    %17 = arith.truncf %16 : vector<4x8x8xf32> to vector<4x8x8xbf16>
    %18 = vector.extract_strided_slice %14 {offsets = [0, 0, 32], sizes = [4, 8, 8], strides = [1, 1, 1]} : vector<4x8x96xf32> to vector<4x8x8xf32>
    %19 = arith.truncf %18 : vector<4x8x8xf32> to vector<4x8x8xbf16>
    %20 = vector.extract_strided_slice %14 {offsets = [0, 0, 64], sizes = [4, 8, 8], strides = [1, 1, 1]} : vector<4x8x96xf32> to vector<4x8x8xf32>
    %21 = arith.truncf %20 : vector<4x8x8xf32> to vector<4x8x8xbf16>
    "tpu.trace_start"() <{level = 10 : i32, message = "gse,gte->gst"}> : () -> ()
    %cst_10 = arith.constant dense<0.000000e+00> : vector<4x8x8xf32>
    %22 = tpu.matmul %17, %19, %cst_10 {dimension_numbers = #tpu.dot_dimension_numbers<[2], [2], [1], [1], [0, 0, 0, 1, 1, 1], [0], [0]>} : vector<4x8x8xbf16>, vector<4x8x8xbf16>, vector<4x8x8xf32> -> vector<4x8x8xf32>
    "tpu.trace_stop"() : () -> ()
    %cst_11 = arith.constant dense<0xFF800000> : vector<4x8xf32>
    %23 = vector.multi_reduction <maximumf>, %22, %cst_11 [2] : vector<4x8x8xf32> to vector<4x8xf32>
    %24 = vector.shape_cast %23 : vector<4x8xf32> to vector<4x8x1xf32>
    %25 = vector.broadcast %24 : vector<4x8x1xf32> to vector<4x8x8xf32>
    %26 = arith.subf %22, %25 : vector<4x8x8xf32>
    %27 = math.exp %26 : vector<4x8x8xf32>
    %cst_12 = arith.constant dense<0.000000e+00> : vector<4x8xf32>
    %28 = vector.multi_reduction <add>, %27, %cst_12 [2] : vector<4x8x8xf32> to vector<4x8xf32>
    %29 = vector.shape_cast %28 : vector<4x8xf32> to vector<4x8x1xf32>
    %30 = tpu.reciprocal %29 {approx = true} : vector<4x8x1xf32> -> vector<4x8x1xf32>
    %31 = vector.broadcast %30 : vector<4x8x1xf32> to vector<4x8x8xf32>
    %32 = arith.mulf %27, %31 : vector<4x8x8xf32>
    %33 = arith.truncf %32 : vector<4x8x8xf32> to vector<4x8x8xbf16>
    "tpu.trace_start"() <{level = 10 : i32, message = "gst,gte->gse"}> : () -> ()
    %cst_13 = arith.constant dense<0.000000e+00> : vector<4x8x8xf32>
    %34 = tpu.matmul %33, %21, %cst_13 {dimension_numbers = #tpu.dot_dimension_numbers<[2], [1], [1], [2], [0, 0, 0, 1, 1, 2], [0], [0]>} : vector<4x8x8xbf16>, vector<4x8x8xbf16>, vector<4x8x8xf32> -> vector<4x8x8xf32>
    "tpu.trace_stop"() : () -> ()
    %35 = vector.shape_cast %34 : vector<4x8x8xf32> to vector<32x8xf32>
    %36 = arith.truncf %35 : vector<32x8xf32> to vector<32x8xbf16>
    %c0_14 = arith.constant 0 : index
    %c0_15 = arith.constant 0 : index
    %c0_16 = arith.constant 0 : index
    %37 = vector.load %arg5[%c0_14, %c0_15, %c0_16] : memref<4x8x32xbf16, #tpu.memory_space<vmem>>, vector<1x8x32xbf16>
    %38 = vector.shape_cast %37 : vector<1x8x32xbf16> to vector<8x32xbf16>
    %cst_17 = arith.constant dense<0.000000e+00> : vector<32x32xf32>
    %39 = tpu.matmul %36, %38, %cst_17 {dimension_numbers = #tpu.dot_dimension_numbers<[1], [0], [0], [1], [0, 0, 1, 1], [], []>} : vector<32x8xbf16>, vector<8x32xbf16>, vector<32x32xf32> -> vector<32x32xf32>
    %40 = arith.addf %15, %39 : vector<32x32xf32>
    %41 = vector.extract_strided_slice %14 {offsets = [0, 0, 8], sizes = [4, 8, 8], strides = [1, 1, 1]} : vector<4x8x96xf32> to vector<4x8x8xf32>
    %42 = arith.truncf %41 : vector<4x8x8xf32> to vector<4x8x8xbf16>
    %43 = vector.extract_strided_slice %14 {offsets = [0, 0, 40], sizes = [4, 8, 8], strides = [1, 1, 1]} : vector<4x8x96xf32> to vector<4x8x8xf32>
    %44 = arith.truncf %43 : vector<4x8x8xf32> to vector<4x8x8xbf16>
    %45 = vector.extract_strided_slice %14 {offsets = [0, 0, 72], sizes = [4, 8, 8], strides = [1, 1, 1]} : vector<4x8x96xf32> to vector<4x8x8xf32>
    %46 = arith.truncf %45 : vector<4x8x8xf32> to vector<4x8x8xbf16>
    "tpu.trace_start"() <{level = 10 : i32, message = "gse,gte->gst"}> : () -> ()
    %cst_18 = arith.constant dense<0.000000e+00> : vector<4x8x8xf32>
    %47 = tpu.matmul %42, %44, %cst_18 {dimension_numbers = #tpu.dot_dimension_numbers<[2], [2], [1], [1], [0, 0, 0, 1, 1, 1], [0], [0]>} : vector<4x8x8xbf16>, vector<4x8x8xbf16>, vector<4x8x8xf32> -> vector<4x8x8xf32>
    "tpu.trace_stop"() : () -> ()
    %cst_19 = arith.constant dense<0xFF800000> : vector<4x8xf32>
    %48 = vector.multi_reduction <maximumf>, %47, %cst_19 [2] : vector<4x8x8xf32> to vector<4x8xf32>
    %49 = vector.shape_cast %48 : vector<4x8xf32> to vector<4x8x1xf32>
    %50 = vector.broadcast %49 : vector<4x8x1xf32> to vector<4x8x8xf32>
    %51 = arith.subf %47, %50 : vector<4x8x8xf32>
    %52 = math.exp %51 : vector<4x8x8xf32>
    %cst_20 = arith.constant dense<0.000000e+00> : vector<4x8xf32>
    %53 = vector.multi_reduction <add>, %52, %cst_20 [2] : vector<4x8x8xf32> to vector<4x8xf32>
    %54 = vector.shape_cast %53 : vector<4x8xf32> to vector<4x8x1xf32>
    %55 = tpu.reciprocal %54 {approx = true} : vector<4x8x1xf32> -> vector<4x8x1xf32>
    %56 = vector.broadcast %55 : vector<4x8x1xf32> to vector<4x8x8xf32>
    %57 = arith.mulf %52, %56 : vector<4x8x8xf32>
    %58 = arith.truncf %57 : vector<4x8x8xf32> to vector<4x8x8xbf16>
    "tpu.trace_start"() <{level = 10 : i32, message = "gst,gte->gse"}> : () -> ()
    %cst_21 = arith.constant dense<0.000000e+00> : vector<4x8x8xf32>
    %59 = tpu.matmul %58, %46, %cst_21 {dimension_numbers = #tpu.dot_dimension_numbers<[2], [1], [1], [2], [0, 0, 0, 1, 1, 2], [0], [0]>} : vector<4x8x8xbf16>, vector<4x8x8xbf16>, vector<4x8x8xf32> -> vector<4x8x8xf32>
    "tpu.trace_stop"() : () -> ()
    %60 = vector.shape_cast %59 : vector<4x8x8xf32> to vector<32x8xf32>
    %61 = arith.truncf %60 : vector<32x8xf32> to vector<32x8xbf16>
    %c1 = arith.constant 1 : index
    %c0_22 = arith.constant 0 : index
    %c0_23 = arith.constant 0 : index
    %62 = vector.load %arg5[%c1, %c0_22, %c0_23] : memref<4x8x32xbf16, #tpu.memory_space<vmem>>, vector<1x8x32xbf16>
    %63 = vector.shape_cast %62 : vector<1x8x32xbf16> to vector<8x32xbf16>
    %cst_24 = arith.constant dense<0.000000e+00> : vector<32x32xf32>
    %64 = tpu.matmul %61, %63, %cst_24 {dimension_numbers = #tpu.dot_dimension_numbers<[1], [0], [0], [1], [0, 0, 1, 1], [], []>} : vector<32x8xbf16>, vector<8x32xbf16>, vector<32x32xf32> -> vector<32x32xf32>
    %65 = arith.addf %40, %64 : vector<32x32xf32>
    %66 = vector.extract_strided_slice %14 {offsets = [0, 0, 16], sizes = [4, 8, 8], strides = [1, 1, 1]} : vector<4x8x96xf32> to vector<4x8x8xf32>
    %67 = arith.truncf %66 : vector<4x8x8xf32> to vector<4x8x8xbf16>
    %68 = vector.extract_strided_slice %14 {offsets = [0, 0, 48], sizes = [4, 8, 8], strides = [1, 1, 1]} : vector<4x8x96xf32> to vector<4x8x8xf32>
    %69 = arith.truncf %68 : vector<4x8x8xf32> to vector<4x8x8xbf16>
    %70 = vector.extract_strided_slice %14 {offsets = [0, 0, 80], sizes = [4, 8, 8], strides = [1, 1, 1]} : vector<4x8x96xf32> to vector<4x8x8xf32>
    %71 = arith.truncf %70 : vector<4x8x8xf32> to vector<4x8x8xbf16>
    "tpu.trace_start"() <{level = 10 : i32, message = "gse,gte->gst"}> : () -> ()
    %cst_25 = arith.constant dense<0.000000e+00> : vector<4x8x8xf32>
    %72 = tpu.matmul %67, %69, %cst_25 {dimension_numbers = #tpu.dot_dimension_numbers<[2], [2], [1], [1], [0, 0, 0, 1, 1, 1], [0], [0]>} : vector<4x8x8xbf16>, vector<4x8x8xbf16>, vector<4x8x8xf32> -> vector<4x8x8xf32>
    "tpu.trace_stop"() : () -> ()
    %cst_26 = arith.constant dense<0xFF800000> : vector<4x8xf32>
    %73 = vector.multi_reduction <maximumf>, %72, %cst_26 [2] : vector<4x8x8xf32> to vector<4x8xf32>
    %74 = vector.shape_cast %73 : vector<4x8xf32> to vector<4x8x1xf32>
    %75 = vector.broadcast %74 : vector<4x8x1xf32> to vector<4x8x8xf32>
    %76 = arith.subf %72, %75 : vector<4x8x8xf32>
    %77 = math.exp %76 : vector<4x8x8xf32>
    %cst_27 = arith.constant dense<0.000000e+00> : vector<4x8xf32>
    %78 = vector.multi_reduction <add>, %77, %cst_27 [2] : vector<4x8x8xf32> to vector<4x8xf32>
    %79 = vector.shape_cast %78 : vector<4x8xf32> to vector<4x8x1xf32>
    %80 = tpu.reciprocal %79 {approx = true} : vector<4x8x1xf32> -> vector<4x8x1xf32>
    %81 = vector.broadcast %80 : vector<4x8x1xf32> to vector<4x8x8xf32>
    %82 = arith.mulf %77, %81 : vector<4x8x8xf32>
    %83 = arith.truncf %82 : vector<4x8x8xf32> to vector<4x8x8xbf16>
    "tpu.trace_start"() <{level = 10 : i32, message = "gst,gte->gse"}> : () -> ()
    %cst_28 = arith.constant dense<0.000000e+00> : vector<4x8x8xf32>
    %84 = tpu.matmul %83, %71, %cst_28 {dimension_numbers = #tpu.dot_dimension_numbers<[2], [1], [1], [2], [0, 0, 0, 1, 1, 2], [0], [0]>} : vector<4x8x8xbf16>, vector<4x8x8xbf16>, vector<4x8x8xf32> -> vector<4x8x8xf32>
    "tpu.trace_stop"() : () -> ()
    %85 = vector.shape_cast %84 : vector<4x8x8xf32> to vector<32x8xf32>
    %86 = arith.truncf %85 : vector<32x8xf32> to vector<32x8xbf16>
    %c2 = arith.constant 2 : index
    %c0_29 = arith.constant 0 : index
    %c0_30 = arith.constant 0 : index
    %87 = vector.load %arg5[%c2, %c0_29, %c0_30] : memref<4x8x32xbf16, #tpu.memory_space<vmem>>, vector<1x8x32xbf16>
    %88 = vector.shape_cast %87 : vector<1x8x32xbf16> to vector<8x32xbf16>
    %cst_31 = arith.constant dense<0.000000e+00> : vector<32x32xf32>
    %89 = tpu.matmul %86, %88, %cst_31 {dimension_numbers = #tpu.dot_dimension_numbers<[1], [0], [0], [1], [0, 0, 1, 1], [], []>} : vector<32x8xbf16>, vector<8x32xbf16>, vector<32x32xf32> -> vector<32x32xf32>
    %90 = arith.addf %65, %89 : vector<32x32xf32>
    %91 = vector.extract_strided_slice %14 {offsets = [0, 0, 24], sizes = [4, 8, 8], strides = [1, 1, 1]} : vector<4x8x96xf32> to vector<4x8x8xf32>
    %92 = arith.truncf %91 : vector<4x8x8xf32> to vector<4x8x8xbf16>
    %93 = vector.extract_strided_slice %14 {offsets = [0, 0, 56], sizes = [4, 8, 8], strides = [1, 1, 1]} : vector<4x8x96xf32> to vector<4x8x8xf32>
    %94 = arith.truncf %93 : vector<4x8x8xf32> to vector<4x8x8xbf16>
    %95 = vector.extract_strided_slice %14 {offsets = [0, 0, 88], sizes = [4, 8, 8], strides = [1, 1, 1]} : vector<4x8x96xf32> to vector<4x8x8xf32>
    %96 = arith.truncf %95 : vector<4x8x8xf32> to vector<4x8x8xbf16>
    "tpu.trace_start"() <{level = 10 : i32, message = "gse,gte->gst"}> : () -> ()
    %cst_32 = arith.constant dense<0.000000e+00> : vector<4x8x8xf32>
    %97 = tpu.matmul %92, %94, %cst_32 {dimension_numbers = #tpu.dot_dimension_numbers<[2], [2], [1], [1], [0, 0, 0, 1, 1, 1], [0], [0]>} : vector<4x8x8xbf16>, vector<4x8x8xbf16>, vector<4x8x8xf32> -> vector<4x8x8xf32>
    "tpu.trace_stop"() : () -> ()
    %cst_33 = arith.constant dense<0xFF800000> : vector<4x8xf32>
    %98 = vector.multi_reduction <maximumf>, %97, %cst_33 [2] : vector<4x8x8xf32> to vector<4x8xf32>
    %99 = vector.shape_cast %98 : vector<4x8xf32> to vector<4x8x1xf32>
    %100 = vector.broadcast %99 : vector<4x8x1xf32> to vector<4x8x8xf32>
    %101 = arith.subf %97, %100 : vector<4x8x8xf32>
    %102 = math.exp %101 : vector<4x8x8xf32>
    %cst_34 = arith.constant dense<0.000000e+00> : vector<4x8xf32>
    %103 = vector.multi_reduction <add>, %102, %cst_34 [2] : vector<4x8x8xf32> to vector<4x8xf32>
    %104 = vector.shape_cast %103 : vector<4x8xf32> to vector<4x8x1xf32>
    %105 = tpu.reciprocal %104 {approx = true} : vector<4x8x1xf32> -> vector<4x8x1xf32>
    %106 = vector.broadcast %105 : vector<4x8x1xf32> to vector<4x8x8xf32>
    %107 = arith.mulf %102, %106 : vector<4x8x8xf32>
    %108 = arith.truncf %107 : vector<4x8x8xf32> to vector<4x8x8xbf16>
    "tpu.trace_start"() <{level = 10 : i32, message = "gst,gte->gse"}> : () -> ()
    %cst_35 = arith.constant dense<0.000000e+00> : vector<4x8x8xf32>
    %109 = tpu.matmul %108, %96, %cst_35 {dimension_numbers = #tpu.dot_dimension_numbers<[2], [1], [1], [2], [0, 0, 0, 1, 1, 2], [0], [0]>} : vector<4x8x8xbf16>, vector<4x8x8xbf16>, vector<4x8x8xf32> -> vector<4x8x8xf32>
    "tpu.trace_stop"() : () -> ()
    %110 = vector.shape_cast %109 : vector<4x8x8xf32> to vector<32x8xf32>
    %111 = arith.truncf %110 : vector<32x8xf32> to vector<32x8xbf16>
    %c3 = arith.constant 3 : index
    %c0_36 = arith.constant 0 : index
    %c0_37 = arith.constant 0 : index
    %112 = vector.load %arg5[%c3, %c0_36, %c0_37] : memref<4x8x32xbf16, #tpu.memory_space<vmem>>, vector<1x8x32xbf16>
    %113 = vector.shape_cast %112 : vector<1x8x32xbf16> to vector<8x32xbf16>
    %cst_38 = arith.constant dense<0.000000e+00> : vector<32x32xf32>
    %114 = tpu.matmul %111, %113, %cst_38 {dimension_numbers = #tpu.dot_dimension_numbers<[1], [0], [0], [1], [0, 0, 1, 1], [], []>} : vector<32x8xbf16>, vector<8x32xbf16>, vector<32x32xf32> -> vector<32x32xf32>
    %115 = arith.addf %90, %114 : vector<32x32xf32>
    %c0_39 = arith.constant 0 : index
    %c0_40 = arith.constant 0 : index
    %116 = vector.load %arg7[%c0_39, %c0_40] : memref<1x32xf32, #tpu.memory_space<vmem>>, vector<1x32xf32>
    %117 = vector.broadcast %116 : vector<1x32xf32> to vector<32x32xf32>
    %118 = arith.addf %115, %117 : vector<32x32xf32>
    %119 = vector.shape_cast %118 : vector<32x32xf32> to vector<4x8x32xf32>
    %120 = tpu.transpose %119, [1, 0, 2] : vector<4x8x32xf32> -> vector<8x4x32xf32>
    %121 = arith.truncf %120 : vector<8x4x32xf32> to vector<8x4x32xbf16>
    %c0_41 = arith.constant 0 : index
    %c0_42 = arith.constant 0 : index
    %c0_43 = arith.constant 0 : index
    %c0_44 = arith.constant 0 : index
    %122 = vector.load %arg8[%c0_41, %c0_42, %c0_43, %c0_44] : memref<1x8x4x32xbf16, #tpu.memory_space<vmem>>, vector<1x8x4x32xbf16>
    %123 = vector.shape_cast %122 : vector<1x8x4x32xbf16> to vector<8x4x32xbf16>
    %124 = vector.shape_cast %121 : vector<8x4x32xbf16> to vector<1x8x4x32xbf16>
    tpu.vector_store %arg8[%c0_41, %c0_42, %c0_43, %c0_44], %124 {strides = array<i32>} : memref<1x8x4x32xbf16, #tpu.memory_space<vmem>>, vector<1x8x4x32xbf16>,
    return
  }
  func.func @transform_0(%arg0: i32, %arg1: i32) -> (i32, i32, i32, i32) {
    %c0_i32 = arith.constant 0 : i32
    %c0_i32_0 = arith.constant 0 : i32
    %c0_i32_1 = arith.constant 0 : i32
    return %arg0, %c0_i32, %arg1, %c0_i32_0 : i32, i32, i32, i32
  }
  func.func @transform_1(%arg0: i32, %arg1: i32) -> (i32, i32) {
    %c0_i32 = arith.constant 0 : i32
    %c0_i32_0 = arith.constant 0 : i32
    %c0_i32_1 = arith.constant 0 : i32
    return %c0_i32, %c0_i32_0 : i32, i32
  }
  func.func @transform_2(%arg0: i32, %arg1: i32) -> (i32, i32) {
    %c0_i32 = arith.constant 0 : i32
    %c0_i32_0 = arith.constant 0 : i32
    %c0_i32_1 = arith.constant 0 : i32
    return %c0_i32, %c0_i32_0 : i32, i32
  }
  func.func @transform_3(%arg0: i32, %arg1: i32) -> (i32, i32, i32) {
    %c0_i32 = arith.constant 0 : i32
    %c0_i32_0 = arith.constant 0 : i32
    %c0_i32_1 = arith.constant 0 : i32
    %c0_i32_2 = arith.constant 0 : i32
    return %c0_i32, %c0_i32_0, %c0_i32_1 : i32, i32, i32
  }
  func.func @transform_4(%arg0: i32, %arg1: i32) -> (i32, i32) {
    %c0_i32 = arith.constant 0 : i32
    %c0_i32_0 = arith.constant 0 : i32
    %c0_i32_1 = arith.constant 0 : i32
    return %c0_i32, %c0_i32_0 : i32, i32
  }
  func.func @transform_5(%arg0: i32, %arg1: i32) -> (i32, i32) {
    %c0_i32 = arith.constant 0 : i32
    %c0_i32_0 = arith.constant 0 : i32
    %c0_i32_1 = arith.constant 0 : i32
    return %c0_i32, %c0_i32_0 : i32, i32
  }
  func.func @transform_6(%arg0: i32, %arg1: i32) -> (i32, i32, i32, i32) {
    %c0_i32 = arith.constant 0 : i32
    %c0_i32_0 = arith.constant 0 : i32
    %c0_i32_1 = arith.constant 0 : i32
    return %arg0, %c0_i32, %arg1, %c0_i32_0 : i32, i32, i32, i32
  }
}

module attributes {stable_mosaic.version = 11 : i64} {
  func.func @gru_inproj_kernel(%arg0: i32, %arg1: memref<32x32xf32, #tpu.memory_space<vmem>>, %arg2: memref<32x96xbf16, #tpu.memory_space<vmem>>, %arg3: memref<1x96xf32, #tpu.memory_space<vmem>>, %arg4: memref<32x96xbf16, #tpu.memory_space<vmem>>) attributes {dimension_semantics = [#tpu.dimension_semantics<parallel>], iteration_bounds = array<i64: 2>, scalar_prefetch = 0 : i64, scratch_operands = 0 : i64, tpu.core_type = #tpu.core_type<tc>, window_params = [{transform_indices = @transform_0, window_bounds = array<i64: 32, 32>}, {pipeline_mode = #tpu.pipeline_mode<synchronous>, transform_indices = @transform_1, window_bounds = array<i64: 32, 96>}, {pipeline_mode = #tpu.pipeline_mode<synchronous>, transform_indices = @transform_2, window_bounds = array<i64: 1, 96>}, {transform_indices = @transform_3, window_bounds = array<i64: 32, 96>}]} {
    %c0 = arith.constant 0 : index
    %c0_0 = arith.constant 0 : index
    %0 = vector.load %arg1[%c0, %c0_0] : memref<32x32xf32, #tpu.memory_space<vmem>>, vector<32x32xf32>
    %1 = arith.truncf %0 : vector<32x32xf32> to vector<32x32xbf16>
    %c0_1 = arith.constant 0 : index
    %c0_2 = arith.constant 0 : index
    %2 = vector.load %arg2[%c0_1, %c0_2] : memref<32x96xbf16, #tpu.memory_space<vmem>>, vector<32x96xbf16>
    %cst = arith.constant dense<0.000000e+00> : vector<32x96xf32>
    %3 = tpu.matmul %1, %2, %cst {dimension_numbers = #tpu.dot_dimension_numbers<[1], [0], [0], [1], [0, 0, 1, 1], [], []>} : vector<32x32xbf16>, vector<32x96xbf16>, vector<32x96xf32> -> vector<32x96xf32>
    %c0_3 = arith.constant 0 : index
    %c0_4 = arith.constant 0 : index
    %4 = vector.load %arg3[%c0_3, %c0_4] : memref<1x96xf32, #tpu.memory_space<vmem>>, vector<1x96xf32>
    %5 = vector.broadcast %4 : vector<1x96xf32> to vector<32x96xf32>
    %6 = arith.addf %3, %5 : vector<32x96xf32>
    %7 = arith.truncf %6 : vector<32x96xf32> to vector<32x96xbf16>
    %c0_5 = arith.constant 0 : index
    %c0_6 = arith.constant 0 : index
    %8 = vector.load %arg4[%c0_5, %c0_6] : memref<32x96xbf16, #tpu.memory_space<vmem>>, vector<32x96xbf16>
    tpu.vector_store %arg4[%c0_5, %c0_6], %7 {strides = array<i32>} : memref<32x96xbf16, #tpu.memory_space<vmem>>, vector<32x96xbf16>,
    return
  }
  func.func @transform_0(%arg0: i32) -> (i32, i32) {
    %c0_i32 = arith.constant 0 : i32
    %c0_i32_0 = arith.constant 0 : i32
    return %arg0, %c0_i32 : i32, i32
  }
  func.func @transform_1(%arg0: i32) -> (i32, i32) {
    %c0_i32 = arith.constant 0 : i32
    %c0_i32_0 = arith.constant 0 : i32
    %c0_i32_1 = arith.constant 0 : i32
    return %c0_i32, %c0_i32_0 : i32, i32
  }
  func.func @transform_2(%arg0: i32) -> (i32, i32) {
    %c0_i32 = arith.constant 0 : i32
    %c0_i32_0 = arith.constant 0 : i32
    %c0_i32_1 = arith.constant 0 : i32
    return %c0_i32, %c0_i32_0 : i32, i32
  }
  func.func @transform_3(%arg0: i32) -> (i32, i32) {
    %c0_i32 = arith.constant 0 : i32
    %c0_i32_0 = arith.constant 0 : i32
    return %arg0, %c0_i32 : i32, i32
  }
}

module attributes {stable_mosaic.version = 11 : i64} {
  func.func @gru_rec_kernel(%arg0: i32, %arg1: i32, %arg2: memref<1x8x4x96xbf16, #tpu.memory_space<vmem>>, %arg3: memref<32x96xbf16, #tpu.memory_space<vmem>>, %arg4: memref<1x96xf32, #tpu.memory_space<vmem>>, %arg5: memref<8x1x4x32xbf16, #tpu.memory_space<vmem>>) attributes {dimension_semantics = [#tpu.dimension_semantics<parallel>, #tpu.dimension_semantics<parallel>], iteration_bounds = array<i64: 2, 1>, scalar_prefetch = 0 : i64, scratch_operands = 0 : i64, tpu.core_type = #tpu.core_type<tc>, window_params = [{transform_indices = @transform_0, window_bounds = array<i64: 1, 8, 4, 96>}, {pipeline_mode = #tpu.pipeline_mode<synchronous>, transform_indices = @transform_1, window_bounds = array<i64: 32, 96>}, {pipeline_mode = #tpu.pipeline_mode<synchronous>, transform_indices = @transform_2, window_bounds = array<i64: 1, 96>}, {transform_indices = @transform_3, window_bounds = array<i64: 8, 1, 4, 32>}]} {
    %c0 = arith.constant 0 : index
    %c0_0 = arith.constant 0 : index
    %0 = vector.load %arg3[%c0, %c0_0] : memref<32x96xbf16, #tpu.memory_space<vmem>>, vector<32x96xbf16>
    %c0_1 = arith.constant 0 : index
    %c0_2 = arith.constant 0 : index
    %1 = vector.load %arg4[%c0_1, %c0_2] : memref<1x96xf32, #tpu.memory_space<vmem>>, vector<1x96xf32>
    %2 = vector.extract_strided_slice %0 {offsets = [0, 0], sizes = [32, 32], strides = [1, 1]} : vector<32x96xbf16> to vector<32x32xbf16>
    %3 = vector.extract_strided_slice %0 {offsets = [0, 32], sizes = [32, 32], strides = [1, 1]} : vector<32x96xbf16> to vector<32x32xbf16>
    %4 = vector.extract_strided_slice %0 {offsets = [0, 64], sizes = [32, 32], strides = [1, 1]} : vector<32x96xbf16> to vector<32x32xbf16>
    %cst = arith.constant 0.000000e+00 : f32
    %5 = vector.broadcast %cst : f32 to vector<4x32xf32>
    %c0_i32 = arith.constant 0 : i32
    %c0_3 = arith.constant 0 : index
    %6 = arith.index_cast %c0_i32 : i32 to index
    %c0_4 = arith.constant 0 : index
    %c0_5 = arith.constant 0 : index
    %7 = vector.load %arg2[%c0_3, %6, %c0_4, %c0_5] : memref<1x8x4x96xbf16, #tpu.memory_space<vmem>>, vector<1x1x4x96xbf16>
    %8 = vector.shape_cast %7 : vector<1x1x4x96xbf16> to vector<4x96xbf16>
    %9 = arith.extf %8 : vector<4x96xbf16> to vector<4x96xf32>
    %10 = arith.truncf %5 : vector<4x32xf32> to vector<4x32xbf16>
    %cst_6 = arith.constant dense<0.000000e+00> : vector<4x32xf32>
    %11 = tpu.matmul %10, %2, %cst_6 {dimension_numbers = #tpu.dot_dimension_numbers<[1], [0], [0], [1], [0, 0, 1, 1], [], []>} : vector<4x32xbf16>, vector<32x32xbf16>, vector<4x32xf32> -> vector<4x32xf32>
    %12 = vector.extract_strided_slice %1 {offsets = [0, 0], sizes = [1, 32], strides = [1, 1]} : vector<1x96xf32> to vector<1x32xf32>
    %13 = vector.broadcast %12 : vector<1x32xf32> to vector<4x32xf32>
    %14 = arith.addf %11, %13 : vector<4x32xf32>
    %cst_7 = arith.constant dense<0.000000e+00> : vector<4x32xf32>
    %15 = tpu.matmul %10, %3, %cst_7 {dimension_numbers = #tpu.dot_dimension_numbers<[1], [0], [0], [1], [0, 0, 1, 1], [], []>} : vector<4x32xbf16>, vector<32x32xbf16>, vector<4x32xf32> -> vector<4x32xf32>
    %16 = vector.extract_strided_slice %1 {offsets = [0, 32], sizes = [1, 32], strides = [1, 1]} : vector<1x96xf32> to vector<1x32xf32>
    %17 = vector.broadcast %16 : vector<1x32xf32> to vector<4x32xf32>
    %18 = arith.addf %15, %17 : vector<4x32xf32>
    %cst_8 = arith.constant dense<0.000000e+00> : vector<4x32xf32>
    %19 = tpu.matmul %10, %4, %cst_8 {dimension_numbers = #tpu.dot_dimension_numbers<[1], [0], [0], [1], [0, 0, 1, 1], [], []>} : vector<4x32xbf16>, vector<32x32xbf16>, vector<4x32xf32> -> vector<4x32xf32>
    %20 = vector.extract_strided_slice %1 {offsets = [0, 64], sizes = [1, 32], strides = [1, 1]} : vector<1x96xf32> to vector<1x32xf32>
    %21 = vector.broadcast %20 : vector<1x32xf32> to vector<4x32xf32>
    %22 = arith.addf %19, %21 : vector<4x32xf32>
    %23 = vector.extract_strided_slice %9 {offsets = [0, 0], sizes = [4, 32], strides = [1, 1]} : vector<4x96xf32> to vector<4x32xf32>
    %24 = arith.addf %23, %14 : vector<4x32xf32>
    %25 = arith.negf %24 : vector<4x32xf32>
    %26 = math.exp %25 : vector<4x32xf32>
    %cst_9 = arith.constant 1.000000e+00 : f32
    %27 = vector.broadcast %cst_9 : f32 to vector<4x32xf32>
    %28 = arith.addf %27, %26 : vector<4x32xf32>
    %29 = arith.divf %27, %28 : vector<4x32xf32>
    %30 = vector.extract_strided_slice %9 {offsets = [0, 32], sizes = [4, 32], strides = [1, 1]} : vector<4x96xf32> to vector<4x32xf32>
    %31 = arith.addf %30, %18 : vector<4x32xf32>
    %32 = arith.negf %31 : vector<4x32xf32>
    %33 = math.exp %32 : vector<4x32xf32>
    %cst_10 = arith.constant 1.000000e+00 : f32
    %34 = vector.broadcast %cst_10 : f32 to vector<4x32xf32>
    %35 = arith.addf %34, %33 : vector<4x32xf32>
    %36 = arith.divf %34, %35 : vector<4x32xf32>
    %37 = vector.extract_strided_slice %9 {offsets = [0, 64], sizes = [4, 32], strides = [1, 1]} : vector<4x96xf32> to vector<4x32xf32>
    %38 = arith.mulf %29, %22 : vector<4x32xf32>
    %39 = arith.addf %37, %38 : vector<4x32xf32>
    %40 = math.tanh %39 : vector<4x32xf32>
    %cst_11 = arith.constant 1.000000e+00 : f32
    %41 = vector.broadcast %cst_11 : f32 to vector<4x32xf32>
    %42 = arith.subf %41, %36 : vector<4x32xf32>
    %43 = arith.mulf %42, %40 : vector<4x32xf32>
    %44 = arith.mulf %36, %5 : vector<4x32xf32>
    %45 = arith.addf %43, %44 : vector<4x32xf32>
    %46 = arith.truncf %45 : vector<4x32xf32> to vector<4x32xbf16>
    %47 = arith.index_cast %c0_i32 : i32 to index
    %c0_12 = arith.constant 0 : index
    %c0_13 = arith.constant 0 : index
    %c0_14 = arith.constant 0 : index
    %48 = vector.load %arg5[%47, %c0_12, %c0_13, %c0_14] : memref<8x1x4x32xbf16, #tpu.memory_space<vmem>>, vector<1x1x4x32xbf16>
    %49 = vector.shape_cast %48 : vector<1x1x4x32xbf16> to vector<4x32xbf16>
    %50 = vector.shape_cast %46 : vector<4x32xbf16> to vector<1x1x4x32xbf16>
    tpu.vector_store %arg5[%47, %c0_12, %c0_13, %c0_14], %50 {strides = array<i32>} : memref<8x1x4x32xbf16, #tpu.memory_space<vmem>>, vector<1x1x4x32xbf16>,
    %c1_i32 = arith.constant 1 : i32
    %c0_15 = arith.constant 0 : index
    %51 = arith.index_cast %c1_i32 : i32 to index
    %c0_16 = arith.constant 0 : index
    %c0_17 = arith.constant 0 : index
    %52 = vector.load %arg2[%c0_15, %51, %c0_16, %c0_17] : memref<1x8x4x96xbf16, #tpu.memory_space<vmem>>, vector<1x1x4x96xbf16>
    %53 = vector.shape_cast %52 : vector<1x1x4x96xbf16> to vector<4x96xbf16>
    %54 = arith.extf %53 : vector<4x96xbf16> to vector<4x96xf32>
    %55 = arith.truncf %45 : vector<4x32xf32> to vector<4x32xbf16>
    %cst_18 = arith.constant dense<0.000000e+00> : vector<4x32xf32>
    %56 = tpu.matmul %55, %2, %cst_18 {dimension_numbers = #tpu.dot_dimension_numbers<[1], [0], [0], [1], [0, 0, 1, 1], [], []>} : vector<4x32xbf16>, vector<32x32xbf16>, vector<4x32xf32> -> vector<4x32xf32>
    %57 = vector.extract_strided_slice %1 {offsets = [0, 0], sizes = [1, 32], strides = [1, 1]} : vector<1x96xf32> to vector<1x32xf32>
    %58 = vector.broadcast %57 : vector<1x32xf32> to vector<4x32xf32>
    %59 = arith.addf %56, %58 : vector<4x32xf32>
    %cst_19 = arith.constant dense<0.000000e+00> : vector<4x32xf32>
    %60 = tpu.matmul %55, %3, %cst_19 {dimension_numbers = #tpu.dot_dimension_numbers<[1], [0], [0], [1], [0, 0, 1, 1], [], []>} : vector<4x32xbf16>, vector<32x32xbf16>, vector<4x32xf32> -> vector<4x32xf32>
    %61 = vector.extract_strided_slice %1 {offsets = [0, 32], sizes = [1, 32], strides = [1, 1]} : vector<1x96xf32> to vector<1x32xf32>
    %62 = vector.broadcast %61 : vector<1x32xf32> to vector<4x32xf32>
    %63 = arith.addf %60, %62 : vector<4x32xf32>
    %cst_20 = arith.constant dense<0.000000e+00> : vector<4x32xf32>
    %64 = tpu.matmul %55, %4, %cst_20 {dimension_numbers = #tpu.dot_dimension_numbers<[1], [0], [0], [1], [0, 0, 1, 1], [], []>} : vector<4x32xbf16>, vector<32x32xbf16>, vector<4x32xf32> -> vector<4x32xf32>
    %65 = vector.extract_strided_slice %1 {offsets = [0, 64], sizes = [1, 32], strides = [1, 1]} : vector<1x96xf32> to vector<1x32xf32>
    %66 = vector.broadcast %65 : vector<1x32xf32> to vector<4x32xf32>
    %67 = arith.addf %64, %66 : vector<4x32xf32>
    %68 = vector.extract_strided_slice %54 {offsets = [0, 0], sizes = [4, 32], strides = [1, 1]} : vector<4x96xf32> to vector<4x32xf32>
    %69 = arith.addf %68, %59 : vector<4x32xf32>
    %70 = arith.negf %69 : vector<4x32xf32>
    %71 = math.exp %70 : vector<4x32xf32>
    %cst_21 = arith.constant 1.000000e+00 : f32
    %72 = vector.broadcast %cst_21 : f32 to vector<4x32xf32>
    %73 = arith.addf %72, %71 : vector<4x32xf32>
    %74 = arith.divf %72, %73 : vector<4x32xf32>
    %75 = vector.extract_strided_slice %54 {offsets = [0, 32], sizes = [4, 32], strides = [1, 1]} : vector<4x96xf32> to vector<4x32xf32>
    %76 = arith.addf %75, %63 : vector<4x32xf32>
    %77 = arith.negf %76 : vector<4x32xf32>
    %78 = math.exp %77 : vector<4x32xf32>
    %cst_22 = arith.constant 1.000000e+00 : f32
    %79 = vector.broadcast %cst_22 : f32 to vector<4x32xf32>
    %80 = arith.addf %79, %78 : vector<4x32xf32>
    %81 = arith.divf %79, %80 : vector<4x32xf32>
    %82 = vector.extract_strided_slice %54 {offsets = [0, 64], sizes = [4, 32], strides = [1, 1]} : vector<4x96xf32> to vector<4x32xf32>
    %83 = arith.mulf %74, %67 : vector<4x32xf32>
    %84 = arith.addf %82, %83 : vector<4x32xf32>
    %85 = math.tanh %84 : vector<4x32xf32>
    %cst_23 = arith.constant 1.000000e+00 : f32
    %86 = vector.broadcast %cst_23 : f32 to vector<4x32xf32>
    %87 = arith.subf %86, %81 : vector<4x32xf32>
    %88 = arith.mulf %87, %85 : vector<4x32xf32>
    %89 = arith.mulf %81, %45 : vector<4x32xf32>
    %90 = arith.addf %88, %89 : vector<4x32xf32>
    %91 = arith.truncf %90 : vector<4x32xf32> to vector<4x32xbf16>
    %92 = arith.index_cast %c1_i32 : i32 to index
    %c0_24 = arith.constant 0 : index
    %c0_25 = arith.constant 0 : index
    %c0_26 = arith.constant 0 : index
    %93 = vector.load %arg5[%92, %c0_24, %c0_25, %c0_26] : memref<8x1x4x32xbf16, #tpu.memory_space<vmem>>, vector<1x1x4x32xbf16>
    %94 = vector.shape_cast %93 : vector<1x1x4x32xbf16> to vector<4x32xbf16>
    %95 = vector.shape_cast %91 : vector<4x32xbf16> to vector<1x1x4x32xbf16>
    tpu.vector_store %arg5[%92, %c0_24, %c0_25, %c0_26], %95 {strides = array<i32>} : memref<8x1x4x32xbf16, #tpu.memory_space<vmem>>, vector<1x1x4x32xbf16>,
    %c2_i32 = arith.constant 2 : i32
    %c0_27 = arith.constant 0 : index
    %96 = arith.index_cast %c2_i32 : i32 to index
    %c0_28 = arith.constant 0 : index
    %c0_29 = arith.constant 0 : index
    %97 = vector.load %arg2[%c0_27, %96, %c0_28, %c0_29] : memref<1x8x4x96xbf16, #tpu.memory_space<vmem>>, vector<1x1x4x96xbf16>
    %98 = vector.shape_cast %97 : vector<1x1x4x96xbf16> to vector<4x96xbf16>
    %99 = arith.extf %98 : vector<4x96xbf16> to vector<4x96xf32>
    %100 = arith.truncf %90 : vector<4x32xf32> to vector<4x32xbf16>
    %cst_30 = arith.constant dense<0.000000e+00> : vector<4x32xf32>
    %101 = tpu.matmul %100, %2, %cst_30 {dimension_numbers = #tpu.dot_dimension_numbers<[1], [0], [0], [1], [0, 0, 1, 1], [], []>} : vector<4x32xbf16>, vector<32x32xbf16>, vector<4x32xf32> -> vector<4x32xf32>
    %102 = vector.extract_strided_slice %1 {offsets = [0, 0], sizes = [1, 32], strides = [1, 1]} : vector<1x96xf32> to vector<1x32xf32>
    %103 = vector.broadcast %102 : vector<1x32xf32> to vector<4x32xf32>
    %104 = arith.addf %101, %103 : vector<4x32xf32>
    %cst_31 = arith.constant dense<0.000000e+00> : vector<4x32xf32>
    %105 = tpu.matmul %100, %3, %cst_31 {dimension_numbers = #tpu.dot_dimension_numbers<[1], [0], [0], [1], [0, 0, 1, 1], [], []>} : vector<4x32xbf16>, vector<32x32xbf16>, vector<4x32xf32> -> vector<4x32xf32>
    %106 = vector.extract_strided_slice %1 {offsets = [0, 32], sizes = [1, 32], strides = [1, 1]} : vector<1x96xf32> to vector<1x32xf32>
    %107 = vector.broadcast %106 : vector<1x32xf32> to vector<4x32xf32>
    %108 = arith.addf %105, %107 : vector<4x32xf32>
    %cst_32 = arith.constant dense<0.000000e+00> : vector<4x32xf32>
    %109 = tpu.matmul %100, %4, %cst_32 {dimension_numbers = #tpu.dot_dimension_numbers<[1], [0], [0], [1], [0, 0, 1, 1], [], []>} : vector<4x32xbf16>, vector<32x32xbf16>, vector<4x32xf32> -> vector<4x32xf32>
    %110 = vector.extract_strided_slice %1 {offsets = [0, 64], sizes = [1, 32], strides = [1, 1]} : vector<1x96xf32> to vector<1x32xf32>
    %111 = vector.broadcast %110 : vector<1x32xf32> to vector<4x32xf32>
    %112 = arith.addf %109, %111 : vector<4x32xf32>
    %113 = vector.extract_strided_slice %99 {offsets = [0, 0], sizes = [4, 32], strides = [1, 1]} : vector<4x96xf32> to vector<4x32xf32>
    %114 = arith.addf %113, %104 : vector<4x32xf32>
    %115 = arith.negf %114 : vector<4x32xf32>
    %116 = math.exp %115 : vector<4x32xf32>
    %cst_33 = arith.constant 1.000000e+00 : f32
    %117 = vector.broadcast %cst_33 : f32 to vector<4x32xf32>
    %118 = arith.addf %117, %116 : vector<4x32xf32>
    %119 = arith.divf %117, %118 : vector<4x32xf32>
    %120 = vector.extract_strided_slice %99 {offsets = [0, 32], sizes = [4, 32], strides = [1, 1]} : vector<4x96xf32> to vector<4x32xf32>
    %121 = arith.addf %120, %108 : vector<4x32xf32>
    %122 = arith.negf %121 : vector<4x32xf32>
    %123 = math.exp %122 : vector<4x32xf32>
    %cst_34 = arith.constant 1.000000e+00 : f32
    %124 = vector.broadcast %cst_34 : f32 to vector<4x32xf32>
    %125 = arith.addf %124, %123 : vector<4x32xf32>
    %126 = arith.divf %124, %125 : vector<4x32xf32>
    %127 = vector.extract_strided_slice %99 {offsets = [0, 64], sizes = [4, 32], strides = [1, 1]} : vector<4x96xf32> to vector<4x32xf32>
    %128 = arith.mulf %119, %112 : vector<4x32xf32>
    %129 = arith.addf %127, %128 : vector<4x32xf32>
    %130 = math.tanh %129 : vector<4x32xf32>
    %cst_35 = arith.constant 1.000000e+00 : f32
    %131 = vector.broadcast %cst_35 : f32 to vector<4x32xf32>
    %132 = arith.subf %131, %126 : vector<4x32xf32>
    %133 = arith.mulf %132, %130 : vector<4x32xf32>
    %134 = arith.mulf %126, %90 : vector<4x32xf32>
    %135 = arith.addf %133, %134 : vector<4x32xf32>
    %136 = arith.truncf %135 : vector<4x32xf32> to vector<4x32xbf16>
    %137 = arith.index_cast %c2_i32 : i32 to index
    %c0_36 = arith.constant 0 : index
    %c0_37 = arith.constant 0 : index
    %c0_38 = arith.constant 0 : index
    %138 = vector.load %arg5[%137, %c0_36, %c0_37, %c0_38] : memref<8x1x4x32xbf16, #tpu.memory_space<vmem>>, vector<1x1x4x32xbf16>
    %139 = vector.shape_cast %138 : vector<1x1x4x32xbf16> to vector<4x32xbf16>
    %140 = vector.shape_cast %136 : vector<4x32xbf16> to vector<1x1x4x32xbf16>
    tpu.vector_store %arg5[%137, %c0_36, %c0_37, %c0_38], %140 {strides = array<i32>} : memref<8x1x4x32xbf16, #tpu.memory_space<vmem>>, vector<1x1x4x32xbf16>,
    %c3_i32 = arith.constant 3 : i32
    %c0_39 = arith.constant 0 : index
    %141 = arith.index_cast %c3_i32 : i32 to index
    %c0_40 = arith.constant 0 : index
    %c0_41 = arith.constant 0 : index
    %142 = vector.load %arg2[%c0_39, %141, %c0_40, %c0_41] : memref<1x8x4x96xbf16, #tpu.memory_space<vmem>>, vector<1x1x4x96xbf16>
    %143 = vector.shape_cast %142 : vector<1x1x4x96xbf16> to vector<4x96xbf16>
    %144 = arith.extf %143 : vector<4x96xbf16> to vector<4x96xf32>
    %145 = arith.truncf %135 : vector<4x32xf32> to vector<4x32xbf16>
    %cst_42 = arith.constant dense<0.000000e+00> : vector<4x32xf32>
    %146 = tpu.matmul %145, %2, %cst_42 {dimension_numbers = #tpu.dot_dimension_numbers<[1], [0], [0], [1], [0, 0, 1, 1], [], []>} : vector<4x32xbf16>, vector<32x32xbf16>, vector<4x32xf32> -> vector<4x32xf32>
    %147 = vector.extract_strided_slice %1 {offsets = [0, 0], sizes = [1, 32], strides = [1, 1]} : vector<1x96xf32> to vector<1x32xf32>
    %148 = vector.broadcast %147 : vector<1x32xf32> to vector<4x32xf32>
    %149 = arith.addf %146, %148 : vector<4x32xf32>
    %cst_43 = arith.constant dense<0.000000e+00> : vector<4x32xf32>
    %150 = tpu.matmul %145, %3, %cst_43 {dimension_numbers = #tpu.dot_dimension_numbers<[1], [0], [0], [1], [0, 0, 1, 1], [], []>} : vector<4x32xbf16>, vector<32x32xbf16>, vector<4x32xf32> -> vector<4x32xf32>
    %151 = vector.extract_strided_slice %1 {offsets = [0, 32], sizes = [1, 32], strides = [1, 1]} : vector<1x96xf32> to vector<1x32xf32>
    %152 = vector.broadcast %151 : vector<1x32xf32> to vector<4x32xf32>
    %153 = arith.addf %150, %152 : vector<4x32xf32>
    %cst_44 = arith.constant dense<0.000000e+00> : vector<4x32xf32>
    %154 = tpu.matmul %145, %4, %cst_44 {dimension_numbers = #tpu.dot_dimension_numbers<[1], [0], [0], [1], [0, 0, 1, 1], [], []>} : vector<4x32xbf16>, vector<32x32xbf16>, vector<4x32xf32> -> vector<4x32xf32>
    %155 = vector.extract_strided_slice %1 {offsets = [0, 64], sizes = [1, 32], strides = [1, 1]} : vector<1x96xf32> to vector<1x32xf32>
    %156 = vector.broadcast %155 : vector<1x32xf32> to vector<4x32xf32>
    %157 = arith.addf %154, %156 : vector<4x32xf32>
    %158 = vector.extract_strided_slice %144 {offsets = [0, 0], sizes = [4, 32], strides = [1, 1]} : vector<4x96xf32> to vector<4x32xf32>
    %159 = arith.addf %158, %149 : vector<4x32xf32>
    %160 = arith.negf %159 : vector<4x32xf32>
    %161 = math.exp %160 : vector<4x32xf32>
    %cst_45 = arith.constant 1.000000e+00 : f32
    %162 = vector.broadcast %cst_45 : f32 to vector<4x32xf32>
    %163 = arith.addf %162, %161 : vector<4x32xf32>
    %164 = arith.divf %162, %163 : vector<4x32xf32>
    %165 = vector.extract_strided_slice %144 {offsets = [0, 32], sizes = [4, 32], strides = [1, 1]} : vector<4x96xf32> to vector<4x32xf32>
    %166 = arith.addf %165, %153 : vector<4x32xf32>
    %167 = arith.negf %166 : vector<4x32xf32>
    %168 = math.exp %167 : vector<4x32xf32>
    %cst_46 = arith.constant 1.000000e+00 : f32
    %169 = vector.broadcast %cst_46 : f32 to vector<4x32xf32>
    %170 = arith.addf %169, %168 : vector<4x32xf32>
    %171 = arith.divf %169, %170 : vector<4x32xf32>
    %172 = vector.extract_strided_slice %144 {offsets = [0, 64], sizes = [4, 32], strides = [1, 1]} : vector<4x96xf32> to vector<4x32xf32>
    %173 = arith.mulf %164, %157 : vector<4x32xf32>
    %174 = arith.addf %172, %173 : vector<4x32xf32>
    %175 = math.tanh %174 : vector<4x32xf32>
    %cst_47 = arith.constant 1.000000e+00 : f32
    %176 = vector.broadcast %cst_47 : f32 to vector<4x32xf32>
    %177 = arith.subf %176, %171 : vector<4x32xf32>
    %178 = arith.mulf %177, %175 : vector<4x32xf32>
    %179 = arith.mulf %171, %135 : vector<4x32xf32>
    %180 = arith.addf %178, %179 : vector<4x32xf32>
    %181 = arith.truncf %180 : vector<4x32xf32> to vector<4x32xbf16>
    %182 = arith.index_cast %c3_i32 : i32 to index
    %c0_48 = arith.constant 0 : index
    %c0_49 = arith.constant 0 : index
    %c0_50 = arith.constant 0 : index
    %183 = vector.load %arg5[%182, %c0_48, %c0_49, %c0_50] : memref<8x1x4x32xbf16, #tpu.memory_space<vmem>>, vector<1x1x4x32xbf16>
    %184 = vector.shape_cast %183 : vector<1x1x4x32xbf16> to vector<4x32xbf16>
    %185 = vector.shape_cast %181 : vector<4x32xbf16> to vector<1x1x4x32xbf16>
    tpu.vector_store %arg5[%182, %c0_48, %c0_49, %c0_50], %185 {strides = array<i32>} : memref<8x1x4x32xbf16, #tpu.memory_space<vmem>>, vector<1x1x4x32xbf16>,
    %c4_i32 = arith.constant 4 : i32
    %c0_51 = arith.constant 0 : index
    %186 = arith.index_cast %c4_i32 : i32 to index
    %c0_52 = arith.constant 0 : index
    %c0_53 = arith.constant 0 : index
    %187 = vector.load %arg2[%c0_51, %186, %c0_52, %c0_53] : memref<1x8x4x96xbf16, #tpu.memory_space<vmem>>, vector<1x1x4x96xbf16>
    %188 = vector.shape_cast %187 : vector<1x1x4x96xbf16> to vector<4x96xbf16>
    %189 = arith.extf %188 : vector<4x96xbf16> to vector<4x96xf32>
    %190 = arith.truncf %180 : vector<4x32xf32> to vector<4x32xbf16>
    %cst_54 = arith.constant dense<0.000000e+00> : vector<4x32xf32>
    %191 = tpu.matmul %190, %2, %cst_54 {dimension_numbers = #tpu.dot_dimension_numbers<[1], [0], [0], [1], [0, 0, 1, 1], [], []>} : vector<4x32xbf16>, vector<32x32xbf16>, vector<4x32xf32> -> vector<4x32xf32>
    %192 = vector.extract_strided_slice %1 {offsets = [0, 0], sizes = [1, 32], strides = [1, 1]} : vector<1x96xf32> to vector<1x32xf32>
    %193 = vector.broadcast %192 : vector<1x32xf32> to vector<4x32xf32>
    %194 = arith.addf %191, %193 : vector<4x32xf32>
    %cst_55 = arith.constant dense<0.000000e+00> : vector<4x32xf32>
    %195 = tpu.matmul %190, %3, %cst_55 {dimension_numbers = #tpu.dot_dimension_numbers<[1], [0], [0], [1], [0, 0, 1, 1], [], []>} : vector<4x32xbf16>, vector<32x32xbf16>, vector<4x32xf32> -> vector<4x32xf32>
    %196 = vector.extract_strided_slice %1 {offsets = [0, 32], sizes = [1, 32], strides = [1, 1]} : vector<1x96xf32> to vector<1x32xf32>
    %197 = vector.broadcast %196 : vector<1x32xf32> to vector<4x32xf32>
    %198 = arith.addf %195, %197 : vector<4x32xf32>
    %cst_56 = arith.constant dense<0.000000e+00> : vector<4x32xf32>
    %199 = tpu.matmul %190, %4, %cst_56 {dimension_numbers = #tpu.dot_dimension_numbers<[1], [0], [0], [1], [0, 0, 1, 1], [], []>} : vector<4x32xbf16>, vector<32x32xbf16>, vector<4x32xf32> -> vector<4x32xf32>
    %200 = vector.extract_strided_slice %1 {offsets = [0, 64], sizes = [1, 32], strides = [1, 1]} : vector<1x96xf32> to vector<1x32xf32>
    %201 = vector.broadcast %200 : vector<1x32xf32> to vector<4x32xf32>
    %202 = arith.addf %199, %201 : vector<4x32xf32>
    %203 = vector.extract_strided_slice %189 {offsets = [0, 0], sizes = [4, 32], strides = [1, 1]} : vector<4x96xf32> to vector<4x32xf32>
    %204 = arith.addf %203, %194 : vector<4x32xf32>
    %205 = arith.negf %204 : vector<4x32xf32>
    %206 = math.exp %205 : vector<4x32xf32>
    %cst_57 = arith.constant 1.000000e+00 : f32
    %207 = vector.broadcast %cst_57 : f32 to vector<4x32xf32>
    %208 = arith.addf %207, %206 : vector<4x32xf32>
    %209 = arith.divf %207, %208 : vector<4x32xf32>
    %210 = vector.extract_strided_slice %189 {offsets = [0, 32], sizes = [4, 32], strides = [1, 1]} : vector<4x96xf32> to vector<4x32xf32>
    %211 = arith.addf %210, %198 : vector<4x32xf32>
    %212 = arith.negf %211 : vector<4x32xf32>
    %213 = math.exp %212 : vector<4x32xf32>
    %cst_58 = arith.constant 1.000000e+00 : f32
    %214 = vector.broadcast %cst_58 : f32 to vector<4x32xf32>
    %215 = arith.addf %214, %213 : vector<4x32xf32>
    %216 = arith.divf %214, %215 : vector<4x32xf32>
    %217 = vector.extract_strided_slice %189 {offsets = [0, 64], sizes = [4, 32], strides = [1, 1]} : vector<4x96xf32> to vector<4x32xf32>
    %218 = arith.mulf %209, %202 : vector<4x32xf32>
    %219 = arith.addf %217, %218 : vector<4x32xf32>
    %220 = math.tanh %219 : vector<4x32xf32>
    %cst_59 = arith.constant 1.000000e+00 : f32
    %221 = vector.broadcast %cst_59 : f32 to vector<4x32xf32>
    %222 = arith.subf %221, %216 : vector<4x32xf32>
    %223 = arith.mulf %222, %220 : vector<4x32xf32>
    %224 = arith.mulf %216, %180 : vector<4x32xf32>
    %225 = arith.addf %223, %224 : vector<4x32xf32>
    %226 = arith.truncf %225 : vector<4x32xf32> to vector<4x32xbf16>
    %227 = arith.index_cast %c4_i32 : i32 to index
    %c0_60 = arith.constant 0 : index
    %c0_61 = arith.constant 0 : index
    %c0_62 = arith.constant 0 : index
    %228 = vector.load %arg5[%227, %c0_60, %c0_61, %c0_62] : memref<8x1x4x32xbf16, #tpu.memory_space<vmem>>, vector<1x1x4x32xbf16>
    %229 = vector.shape_cast %228 : vector<1x1x4x32xbf16> to vector<4x32xbf16>
    %230 = vector.shape_cast %226 : vector<4x32xbf16> to vector<1x1x4x32xbf16>
    tpu.vector_store %arg5[%227, %c0_60, %c0_61, %c0_62], %230 {strides = array<i32>} : memref<8x1x4x32xbf16, #tpu.memory_space<vmem>>, vector<1x1x4x32xbf16>,
    %c5_i32 = arith.constant 5 : i32
    %c0_63 = arith.constant 0 : index
    %231 = arith.index_cast %c5_i32 : i32 to index
    %c0_64 = arith.constant 0 : index
    %c0_65 = arith.constant 0 : index
    %232 = vector.load %arg2[%c0_63, %231, %c0_64, %c0_65] : memref<1x8x4x96xbf16, #tpu.memory_space<vmem>>, vector<1x1x4x96xbf16>
    %233 = vector.shape_cast %232 : vector<1x1x4x96xbf16> to vector<4x96xbf16>
    %234 = arith.extf %233 : vector<4x96xbf16> to vector<4x96xf32>
    %235 = arith.truncf %225 : vector<4x32xf32> to vector<4x32xbf16>
    %cst_66 = arith.constant dense<0.000000e+00> : vector<4x32xf32>
    %236 = tpu.matmul %235, %2, %cst_66 {dimension_numbers = #tpu.dot_dimension_numbers<[1], [0], [0], [1], [0, 0, 1, 1], [], []>} : vector<4x32xbf16>, vector<32x32xbf16>, vector<4x32xf32> -> vector<4x32xf32>
    %237 = vector.extract_strided_slice %1 {offsets = [0, 0], sizes = [1, 32], strides = [1, 1]} : vector<1x96xf32> to vector<1x32xf32>
    %238 = vector.broadcast %237 : vector<1x32xf32> to vector<4x32xf32>
    %239 = arith.addf %236, %238 : vector<4x32xf32>
    %cst_67 = arith.constant dense<0.000000e+00> : vector<4x32xf32>
    %240 = tpu.matmul %235, %3, %cst_67 {dimension_numbers = #tpu.dot_dimension_numbers<[1], [0], [0], [1], [0, 0, 1, 1], [], []>} : vector<4x32xbf16>, vector<32x32xbf16>, vector<4x32xf32> -> vector<4x32xf32>
    %241 = vector.extract_strided_slice %1 {offsets = [0, 32], sizes = [1, 32], strides = [1, 1]} : vector<1x96xf32> to vector<1x32xf32>
    %242 = vector.broadcast %241 : vector<1x32xf32> to vector<4x32xf32>
    %243 = arith.addf %240, %242 : vector<4x32xf32>
    %cst_68 = arith.constant dense<0.000000e+00> : vector<4x32xf32>
    %244 = tpu.matmul %235, %4, %cst_68 {dimension_numbers = #tpu.dot_dimension_numbers<[1], [0], [0], [1], [0, 0, 1, 1], [], []>} : vector<4x32xbf16>, vector<32x32xbf16>, vector<4x32xf32> -> vector<4x32xf32>
    %245 = vector.extract_strided_slice %1 {offsets = [0, 64], sizes = [1, 32], strides = [1, 1]} : vector<1x96xf32> to vector<1x32xf32>
    %246 = vector.broadcast %245 : vector<1x32xf32> to vector<4x32xf32>
    %247 = arith.addf %244, %246 : vector<4x32xf32>
    %248 = vector.extract_strided_slice %234 {offsets = [0, 0], sizes = [4, 32], strides = [1, 1]} : vector<4x96xf32> to vector<4x32xf32>
    %249 = arith.addf %248, %239 : vector<4x32xf32>
    %250 = arith.negf %249 : vector<4x32xf32>
    %251 = math.exp %250 : vector<4x32xf32>
    %cst_69 = arith.constant 1.000000e+00 : f32
    %252 = vector.broadcast %cst_69 : f32 to vector<4x32xf32>
    %253 = arith.addf %252, %251 : vector<4x32xf32>
    %254 = arith.divf %252, %253 : vector<4x32xf32>
    %255 = vector.extract_strided_slice %234 {offsets = [0, 32], sizes = [4, 32], strides = [1, 1]} : vector<4x96xf32> to vector<4x32xf32>
    %256 = arith.addf %255, %243 : vector<4x32xf32>
    %257 = arith.negf %256 : vector<4x32xf32>
    %258 = math.exp %257 : vector<4x32xf32>
    %cst_70 = arith.constant 1.000000e+00 : f32
    %259 = vector.broadcast %cst_70 : f32 to vector<4x32xf32>
    %260 = arith.addf %259, %258 : vector<4x32xf32>
    %261 = arith.divf %259, %260 : vector<4x32xf32>
    %262 = vector.extract_strided_slice %234 {offsets = [0, 64], sizes = [4, 32], strides = [1, 1]} : vector<4x96xf32> to vector<4x32xf32>
    %263 = arith.mulf %254, %247 : vector<4x32xf32>
    %264 = arith.addf %262, %263 : vector<4x32xf32>
    %265 = math.tanh %264 : vector<4x32xf32>
    %cst_71 = arith.constant 1.000000e+00 : f32
    %266 = vector.broadcast %cst_71 : f32 to vector<4x32xf32>
    %267 = arith.subf %266, %261 : vector<4x32xf32>
    %268 = arith.mulf %267, %265 : vector<4x32xf32>
    %269 = arith.mulf %261, %225 : vector<4x32xf32>
    %270 = arith.addf %268, %269 : vector<4x32xf32>
    %271 = arith.truncf %270 : vector<4x32xf32> to vector<4x32xbf16>
    %272 = arith.index_cast %c5_i32 : i32 to index
    %c0_72 = arith.constant 0 : index
    %c0_73 = arith.constant 0 : index
    %c0_74 = arith.constant 0 : index
    %273 = vector.load %arg5[%272, %c0_72, %c0_73, %c0_74] : memref<8x1x4x32xbf16, #tpu.memory_space<vmem>>, vector<1x1x4x32xbf16>
    %274 = vector.shape_cast %273 : vector<1x1x4x32xbf16> to vector<4x32xbf16>
    %275 = vector.shape_cast %271 : vector<4x32xbf16> to vector<1x1x4x32xbf16>
    tpu.vector_store %arg5[%272, %c0_72, %c0_73, %c0_74], %275 {strides = array<i32>} : memref<8x1x4x32xbf16, #tpu.memory_space<vmem>>, vector<1x1x4x32xbf16>,
    %c6_i32 = arith.constant 6 : i32
    %c0_75 = arith.constant 0 : index
    %276 = arith.index_cast %c6_i32 : i32 to index
    %c0_76 = arith.constant 0 : index
    %c0_77 = arith.constant 0 : index
    %277 = vector.load %arg2[%c0_75, %276, %c0_76, %c0_77] : memref<1x8x4x96xbf16, #tpu.memory_space<vmem>>, vector<1x1x4x96xbf16>
    %278 = vector.shape_cast %277 : vector<1x1x4x96xbf16> to vector<4x96xbf16>
    %279 = arith.extf %278 : vector<4x96xbf16> to vector<4x96xf32>
    %280 = arith.truncf %270 : vector<4x32xf32> to vector<4x32xbf16>
    %cst_78 = arith.constant dense<0.000000e+00> : vector<4x32xf32>
    %281 = tpu.matmul %280, %2, %cst_78 {dimension_numbers = #tpu.dot_dimension_numbers<[1], [0], [0], [1], [0, 0, 1, 1], [], []>} : vector<4x32xbf16>, vector<32x32xbf16>, vector<4x32xf32> -> vector<4x32xf32>
    %282 = vector.extract_strided_slice %1 {offsets = [0, 0], sizes = [1, 32], strides = [1, 1]} : vector<1x96xf32> to vector<1x32xf32>
    %283 = vector.broadcast %282 : vector<1x32xf32> to vector<4x32xf32>
    %284 = arith.addf %281, %283 : vector<4x32xf32>
    %cst_79 = arith.constant dense<0.000000e+00> : vector<4x32xf32>
    %285 = tpu.matmul %280, %3, %cst_79 {dimension_numbers = #tpu.dot_dimension_numbers<[1], [0], [0], [1], [0, 0, 1, 1], [], []>} : vector<4x32xbf16>, vector<32x32xbf16>, vector<4x32xf32> -> vector<4x32xf32>
    %286 = vector.extract_strided_slice %1 {offsets = [0, 32], sizes = [1, 32], strides = [1, 1]} : vector<1x96xf32> to vector<1x32xf32>
    %287 = vector.broadcast %286 : vector<1x32xf32> to vector<4x32xf32>
    %288 = arith.addf %285, %287 : vector<4x32xf32>
    %cst_80 = arith.constant dense<0.000000e+00> : vector<4x32xf32>
    %289 = tpu.matmul %280, %4, %cst_80 {dimension_numbers = #tpu.dot_dimension_numbers<[1], [0], [0], [1], [0, 0, 1, 1], [], []>} : vector<4x32xbf16>, vector<32x32xbf16>, vector<4x32xf32> -> vector<4x32xf32>
    %290 = vector.extract_strided_slice %1 {offsets = [0, 64], sizes = [1, 32], strides = [1, 1]} : vector<1x96xf32> to vector<1x32xf32>
    %291 = vector.broadcast %290 : vector<1x32xf32> to vector<4x32xf32>
    %292 = arith.addf %289, %291 : vector<4x32xf32>
    %293 = vector.extract_strided_slice %279 {offsets = [0, 0], sizes = [4, 32], strides = [1, 1]} : vector<4x96xf32> to vector<4x32xf32>
    %294 = arith.addf %293, %284 : vector<4x32xf32>
    %295 = arith.negf %294 : vector<4x32xf32>
    %296 = math.exp %295 : vector<4x32xf32>
    %cst_81 = arith.constant 1.000000e+00 : f32
    %297 = vector.broadcast %cst_81 : f32 to vector<4x32xf32>
    %298 = arith.addf %297, %296 : vector<4x32xf32>
    %299 = arith.divf %297, %298 : vector<4x32xf32>
    %300 = vector.extract_strided_slice %279 {offsets = [0, 32], sizes = [4, 32], strides = [1, 1]} : vector<4x96xf32> to vector<4x32xf32>
    %301 = arith.addf %300, %288 : vector<4x32xf32>
    %302 = arith.negf %301 : vector<4x32xf32>
    %303 = math.exp %302 : vector<4x32xf32>
    %cst_82 = arith.constant 1.000000e+00 : f32
    %304 = vector.broadcast %cst_82 : f32 to vector<4x32xf32>
    %305 = arith.addf %304, %303 : vector<4x32xf32>
    %306 = arith.divf %304, %305 : vector<4x32xf32>
    %307 = vector.extract_strided_slice %279 {offsets = [0, 64], sizes = [4, 32], strides = [1, 1]} : vector<4x96xf32> to vector<4x32xf32>
    %308 = arith.mulf %299, %292 : vector<4x32xf32>
    %309 = arith.addf %307, %308 : vector<4x32xf32>
    %310 = math.tanh %309 : vector<4x32xf32>
    %cst_83 = arith.constant 1.000000e+00 : f32
    %311 = vector.broadcast %cst_83 : f32 to vector<4x32xf32>
    %312 = arith.subf %311, %306 : vector<4x32xf32>
    %313 = arith.mulf %312, %310 : vector<4x32xf32>
    %314 = arith.mulf %306, %270 : vector<4x32xf32>
    %315 = arith.addf %313, %314 : vector<4x32xf32>
    %316 = arith.truncf %315 : vector<4x32xf32> to vector<4x32xbf16>
    %317 = arith.index_cast %c6_i32 : i32 to index
    %c0_84 = arith.constant 0 : index
    %c0_85 = arith.constant 0 : index
    %c0_86 = arith.constant 0 : index
    %318 = vector.load %arg5[%317, %c0_84, %c0_85, %c0_86] : memref<8x1x4x32xbf16, #tpu.memory_space<vmem>>, vector<1x1x4x32xbf16>
    %319 = vector.shape_cast %318 : vector<1x1x4x32xbf16> to vector<4x32xbf16>
    %320 = vector.shape_cast %316 : vector<4x32xbf16> to vector<1x1x4x32xbf16>
    tpu.vector_store %arg5[%317, %c0_84, %c0_85, %c0_86], %320 {strides = array<i32>} : memref<8x1x4x32xbf16, #tpu.memory_space<vmem>>, vector<1x1x4x32xbf16>,
    %c7_i32 = arith.constant 7 : i32
    %c0_87 = arith.constant 0 : index
    %321 = arith.index_cast %c7_i32 : i32 to index
    %c0_88 = arith.constant 0 : index
    %c0_89 = arith.constant 0 : index
    %322 = vector.load %arg2[%c0_87, %321, %c0_88, %c0_89] : memref<1x8x4x96xbf16, #tpu.memory_space<vmem>>, vector<1x1x4x96xbf16>
    %323 = vector.shape_cast %322 : vector<1x1x4x96xbf16> to vector<4x96xbf16>
    %324 = arith.extf %323 : vector<4x96xbf16> to vector<4x96xf32>
    %325 = arith.truncf %315 : vector<4x32xf32> to vector<4x32xbf16>
    %cst_90 = arith.constant dense<0.000000e+00> : vector<4x32xf32>
    %326 = tpu.matmul %325, %2, %cst_90 {dimension_numbers = #tpu.dot_dimension_numbers<[1], [0], [0], [1], [0, 0, 1, 1], [], []>} : vector<4x32xbf16>, vector<32x32xbf16>, vector<4x32xf32> -> vector<4x32xf32>
    %327 = vector.extract_strided_slice %1 {offsets = [0, 0], sizes = [1, 32], strides = [1, 1]} : vector<1x96xf32> to vector<1x32xf32>
    %328 = vector.broadcast %327 : vector<1x32xf32> to vector<4x32xf32>
    %329 = arith.addf %326, %328 : vector<4x32xf32>
    %cst_91 = arith.constant dense<0.000000e+00> : vector<4x32xf32>
    %330 = tpu.matmul %325, %3, %cst_91 {dimension_numbers = #tpu.dot_dimension_numbers<[1], [0], [0], [1], [0, 0, 1, 1], [], []>} : vector<4x32xbf16>, vector<32x32xbf16>, vector<4x32xf32> -> vector<4x32xf32>
    %331 = vector.extract_strided_slice %1 {offsets = [0, 32], sizes = [1, 32], strides = [1, 1]} : vector<1x96xf32> to vector<1x32xf32>
    %332 = vector.broadcast %331 : vector<1x32xf32> to vector<4x32xf32>
    %333 = arith.addf %330, %332 : vector<4x32xf32>
    %cst_92 = arith.constant dense<0.000000e+00> : vector<4x32xf32>
    %334 = tpu.matmul %325, %4, %cst_92 {dimension_numbers = #tpu.dot_dimension_numbers<[1], [0], [0], [1], [0, 0, 1, 1], [], []>} : vector<4x32xbf16>, vector<32x32xbf16>, vector<4x32xf32> -> vector<4x32xf32>
    %335 = vector.extract_strided_slice %1 {offsets = [0, 64], sizes = [1, 32], strides = [1, 1]} : vector<1x96xf32> to vector<1x32xf32>
    %336 = vector.broadcast %335 : vector<1x32xf32> to vector<4x32xf32>
    %337 = arith.addf %334, %336 : vector<4x32xf32>
    %338 = vector.extract_strided_slice %324 {offsets = [0, 0], sizes = [4, 32], strides = [1, 1]} : vector<4x96xf32> to vector<4x32xf32>
    %339 = arith.addf %338, %329 : vector<4x32xf32>
    %340 = arith.negf %339 : vector<4x32xf32>
    %341 = math.exp %340 : vector<4x32xf32>
    %cst_93 = arith.constant 1.000000e+00 : f32
    %342 = vector.broadcast %cst_93 : f32 to vector<4x32xf32>
    %343 = arith.addf %342, %341 : vector<4x32xf32>
    %344 = arith.divf %342, %343 : vector<4x32xf32>
    %345 = vector.extract_strided_slice %324 {offsets = [0, 32], sizes = [4, 32], strides = [1, 1]} : vector<4x96xf32> to vector<4x32xf32>
    %346 = arith.addf %345, %333 : vector<4x32xf32>
    %347 = arith.negf %346 : vector<4x32xf32>
    %348 = math.exp %347 : vector<4x32xf32>
    %cst_94 = arith.constant 1.000000e+00 : f32
    %349 = vector.broadcast %cst_94 : f32 to vector<4x32xf32>
    %350 = arith.addf %349, %348 : vector<4x32xf32>
    %351 = arith.divf %349, %350 : vector<4x32xf32>
    %352 = vector.extract_strided_slice %324 {offsets = [0, 64], sizes = [4, 32], strides = [1, 1]} : vector<4x96xf32> to vector<4x32xf32>
    %353 = arith.mulf %344, %337 : vector<4x32xf32>
    %354 = arith.addf %352, %353 : vector<4x32xf32>
    %355 = math.tanh %354 : vector<4x32xf32>
    %cst_95 = arith.constant 1.000000e+00 : f32
    %356 = vector.broadcast %cst_95 : f32 to vector<4x32xf32>
    %357 = arith.subf %356, %351 : vector<4x32xf32>
    %358 = arith.mulf %357, %355 : vector<4x32xf32>
    %359 = arith.mulf %351, %315 : vector<4x32xf32>
    %360 = arith.addf %358, %359 : vector<4x32xf32>
    %361 = arith.truncf %360 : vector<4x32xf32> to vector<4x32xbf16>
    %362 = arith.index_cast %c7_i32 : i32 to index
    %c0_96 = arith.constant 0 : index
    %c0_97 = arith.constant 0 : index
    %c0_98 = arith.constant 0 : index
    %363 = vector.load %arg5[%362, %c0_96, %c0_97, %c0_98] : memref<8x1x4x32xbf16, #tpu.memory_space<vmem>>, vector<1x1x4x32xbf16>
    %364 = vector.shape_cast %363 : vector<1x1x4x32xbf16> to vector<4x32xbf16>
    %365 = vector.shape_cast %361 : vector<4x32xbf16> to vector<1x1x4x32xbf16>
    tpu.vector_store %arg5[%362, %c0_96, %c0_97, %c0_98], %365 {strides = array<i32>} : memref<8x1x4x32xbf16, #tpu.memory_space<vmem>>, vector<1x1x4x32xbf16>,
    %c8_i32 = arith.constant 8 : i32
    return
  }
  func.func @transform_0(%arg0: i32, %arg1: i32) -> (i32, i32, i32, i32) {
    %c0_i32 = arith.constant 0 : i32
    %c0_i32_0 = arith.constant 0 : i32
    %c0_i32_1 = arith.constant 0 : i32
    return %arg0, %c0_i32, %arg1, %c0_i32_0 : i32, i32, i32, i32
  }
  func.func @transform_1(%arg0: i32, %arg1: i32) -> (i32, i32) {
    %c0_i32 = arith.constant 0 : i32
    %c0_i32_0 = arith.constant 0 : i32
    %c0_i32_1 = arith.constant 0 : i32
    return %c0_i32, %c0_i32_0 : i32, i32
  }
  func.func @transform_2(%arg0: i32, %arg1: i32) -> (i32, i32) {
    %c0_i32 = arith.constant 0 : i32
    %c0_i32_0 = arith.constant 0 : i32
    %c0_i32_1 = arith.constant 0 : i32
    return %c0_i32, %c0_i32_0 : i32, i32
  }
  func.func @transform_3(%arg0: i32, %arg1: i32) -> (i32, i32, i32, i32) {
    %c0_i32 = arith.constant 0 : i32
    %c0_i32_0 = arith.constant 0 : i32
    %c0_i32_1 = arith.constant 0 : i32
    return %c0_i32, %arg0, %arg1, %c0_i32_0 : i32, i32, i32, i32
  }
}

module attributes {stable_mosaic.version = 11 : i64} {
  func.func @pred_kernel(%arg0: i32, %arg1: i32, %arg2: i32, %arg3: memref<1x4x8x32xbf16, #tpu.memory_space<vmem>>, %arg4: memref<1x8x4x32xbf16, #tpu.memory_space<vmem>>, %arg5: memref<32x32xbf16, #tpu.memory_space<vmem>>, %arg6: memref<32x32xbf16, #tpu.memory_space<vmem>>, %arg7: memref<1x32xf32, #tpu.memory_space<vmem>>, %arg8: memref<1x8x4x32xf32, #tpu.memory_space<vmem>>) attributes {dimension_semantics = [#tpu.dimension_semantics<parallel>, #tpu.dimension_semantics<parallel>, #tpu.dimension_semantics<parallel>], iteration_bounds = array<i64: 2, 1, 1>, scalar_prefetch = 0 : i64, scratch_operands = 0 : i64, tpu.core_type = #tpu.core_type<tc>, window_params = [{transform_indices = @transform_0, window_bounds = array<i64: 1, 4, 8, 32>}, {transform_indices = @transform_1, window_bounds = array<i64: 1, 8, 4, 32>}, {pipeline_mode = #tpu.pipeline_mode<synchronous>, transform_indices = @transform_2, window_bounds = array<i64: 32, 32>}, {pipeline_mode = #tpu.pipeline_mode<synchronous>, transform_indices = @transform_3, window_bounds = array<i64: 32, 32>}, {pipeline_mode = #tpu.pipeline_mode<synchronous>, transform_indices = @transform_4, window_bounds = array<i64: 1, 32>}, {transform_indices = @transform_5, window_bounds = array<i64: 1, 8, 4, 32>}]} {
    %c0 = arith.constant 0 : index
    %c0_0 = arith.constant 0 : index
    %c0_1 = arith.constant 0 : index
    %c0_2 = arith.constant 0 : index
    %0 = vector.load %arg3[%c0, %c0_0, %c0_1, %c0_2] : memref<1x4x8x32xbf16, #tpu.memory_space<vmem>>, vector<1x4x8x32xbf16>
    %1 = vector.shape_cast %0 : vector<1x4x8x32xbf16> to vector<4x8x32xbf16>
    %2 = tpu.transpose %1, [1, 0, 2] : vector<4x8x32xbf16> -> vector<8x4x32xbf16>
    %3 = vector.shape_cast %2 : vector<8x4x32xbf16> to vector<32x32xbf16>
    %c0_3 = arith.constant 0 : index
    %c0_4 = arith.constant 0 : index
    %c0_5 = arith.constant 0 : index
    %c0_6 = arith.constant 0 : index
    %4 = vector.load %arg4[%c0_3, %c0_4, %c0_5, %c0_6] : memref<1x8x4x32xbf16, #tpu.memory_space<vmem>>, vector<1x8x4x32xbf16>
    %5 = vector.shape_cast %4 : vector<1x8x4x32xbf16> to vector<8x4x32xbf16>
    %6 = vector.shape_cast %5 : vector<8x4x32xbf16> to vector<32x32xbf16>
    %c0_7 = arith.constant 0 : index
    %c0_8 = arith.constant 0 : index
    %7 = vector.load %arg5[%c0_7, %c0_8] : memref<32x32xbf16, #tpu.memory_space<vmem>>, vector<32x32xbf16>
    %cst = arith.constant dense<0.000000e+00> : vector<32x32xf32>
    %8 = tpu.matmul %3, %7, %cst {dimension_numbers = #tpu.dot_dimension_numbers<[1], [0], [0], [1], [0, 0, 1, 1], [], []>} : vector<32x32xbf16>, vector<32x32xbf16>, vector<32x32xf32> -> vector<32x32xf32>
    %c0_9 = arith.constant 0 : index
    %c0_10 = arith.constant 0 : index
    %9 = vector.load %arg6[%c0_9, %c0_10] : memref<32x32xbf16, #tpu.memory_space<vmem>>, vector<32x32xbf16>
    %cst_11 = arith.constant dense<0.000000e+00> : vector<32x32xf32>
    %10 = tpu.matmul %6, %9, %cst_11 {dimension_numbers = #tpu.dot_dimension_numbers<[1], [0], [0], [1], [0, 0, 1, 1], [], []>} : vector<32x32xbf16>, vector<32x32xbf16>, vector<32x32xf32> -> vector<32x32xf32>
    %11 = arith.addf %8, %10 : vector<32x32xf32>
    %c0_12 = arith.constant 0 : index
    %c0_13 = arith.constant 0 : index
    %12 = vector.load %arg7[%c0_12, %c0_13] : memref<1x32xf32, #tpu.memory_space<vmem>>, vector<1x32xf32>
    %13 = vector.broadcast %12 : vector<1x32xf32> to vector<32x32xf32>
    %14 = arith.addf %11, %13 : vector<32x32xf32>
    %15 = vector.shape_cast %14 : vector<32x32xf32> to vector<8x4x32xf32>
    %c0_14 = arith.constant 0 : index
    %c0_15 = arith.constant 0 : index
    %c0_16 = arith.constant 0 : index
    %c0_17 = arith.constant 0 : index
    %16 = vector.load %arg8[%c0_14, %c0_15, %c0_16, %c0_17] : memref<1x8x4x32xf32, #tpu.memory_space<vmem>>, vector<1x8x4x32xf32>
    %17 = vector.shape_cast %16 : vector<1x8x4x32xf32> to vector<8x4x32xf32>
    %18 = vector.shape_cast %15 : vector<8x4x32xf32> to vector<1x8x4x32xf32>
    tpu.vector_store %arg8[%c0_14, %c0_15, %c0_16, %c0_17], %18 {strides = array<i32>} : memref<1x8x4x32xf32, #tpu.memory_space<vmem>>, vector<1x8x4x32xf32>,
    return
  }
  func.func @transform_0(%arg0: i32, %arg1: i32, %arg2: i32) -> (i32, i32, i32, i32) {
    %c0_i32 = arith.constant 0 : i32
    %c0_i32_0 = arith.constant 0 : i32
    return %arg0, %arg1, %arg2, %c0_i32 : i32, i32, i32, i32
  }
  func.func @transform_1(%arg0: i32, %arg1: i32, %arg2: i32) -> (i32, i32, i32, i32) {
    %c0_i32 = arith.constant 0 : i32
    %c0_i32_0 = arith.constant 0 : i32
    return %arg0, %arg2, %arg1, %c0_i32 : i32, i32, i32, i32
  }
  func.func @transform_2(%arg0: i32, %arg1: i32, %arg2: i32) -> (i32, i32) {
    %c0_i32 = arith.constant 0 : i32
    %c0_i32_0 = arith.constant 0 : i32
    %c0_i32_1 = arith.constant 0 : i32
    return %c0_i32, %c0_i32_0 : i32, i32
  }
  func.func @transform_3(%arg0: i32, %arg1: i32, %arg2: i32) -> (i32, i32) {
    %c0_i32 = arith.constant 0 : i32
    %c0_i32_0 = arith.constant 0 : i32
    %c0_i32_1 = arith.constant 0 : i32
    return %c0_i32, %c0_i32_0 : i32, i32
  }
  func.func @transform_4(%arg0: i32, %arg1: i32, %arg2: i32) -> (i32, i32) {
    %c0_i32 = arith.constant 0 : i32
    %c0_i32_0 = arith.constant 0 : i32
    %c0_i32_1 = arith.constant 0 : i32
    return %c0_i32, %c0_i32_0 : i32, i32
  }
  func.func @transform_5(%arg0: i32, %arg1: i32, %arg2: i32) -> (i32, i32, i32, i32) {
    %c0_i32 = arith.constant 0 : i32
    %c0_i32_0 = arith.constant 0 : i32
    return %arg0, %arg2, %arg1, %c0_i32 : i32, i32, i32, i32
  }
}

</mosaic_0001>

<bundles_post_ra>
// kernel: temporal_block_forward.4
= control target key start
LH: loop header
LB: loop body
LE: loop exit
PB: predicated region body
PF: predicated region fallthrough
CT: control target
= control target key end

     0   :  { %s411_s12 = smov 0   ;;  %s437_s0 = inlined_call_operand.vmem [shape: f32[64,32], index: 0, kind: input, shape index: {}]   ;;  %s438_s1 = inlined_call_operand.vmem [shape: bf16[32,96], index: 1, kind: input, shape index: {}]   ;;  %s439_s2 = inlined_call_operand.vmem [shape: f32[1,96], index: 2, kind: input, shape index: {}]   ;;  %s440_s3 = inlined_call_operand.vmem [shape: bf16[64,96], index: 3, kind: output, shape index: {}]  }
   0x1 LB: > { %s337_s13 = sadd.s32 4294967295, %s389_s12   ;;  %p341_p0 = scmp.ge.s32.totalorder %s389_s12, 1  ;;  %s389_s12 = sphi %s411_s12, %s13_s12  }
   0x2   : > { %p138_p1 = scmp.lt.s32.totalorder %s389_s12, 3 }
   0x4   : > { %p139_p2 = pnand %p341_p0, %p138_p1 }
   0x5   : > { %v381_v0 = vld [vmem:[%s438_s1] sm:$0xff] (!%p139_p2)   ;;  %s342_s16 = sshll.u32 (!%p139_p2), %s337_s13, 2  ;;  %v382_v1 = vld [vmem:[%s438_s1 + $0x8] sm:$0xff] (!%p139_p2)   ;;  %vm204_vm0 = vcmask (!%p139_p2), 261120   ;;  %vm276_vm1 = vcmask (!%p139_p2), 781312  }
   0x6   : > { %142 = sbr.rel (%p139_p2) target bundleno = 240 (0xf0), region = 32  ;;  %p163_p3 = scmp.lt.s32.totalorder (!%p139_p2), %s342_s16, 7  ;;  %365 = vmatprep.subr.bf16.mxu0 (!%p139_p2), %v381_v0  ;;  %v346_v8 = vld [vmem:[%s439_s2] ss:$0 sm:$0xff] (!%p139_p2) }
   0x7   : > { %366 = vmatpush3.bf16.msra.mxu0 (!%p139_p2), %v381_v0 }
   0x8   : > { %367 = vmatprep.subr.bf16.mxu0 (!%p139_p2), %v382_v1 }
   0xb   : > { %368 = vmatpush3.bf16.msra.mxu0 (!%p139_p2), %v382_v1 }
   0xd   : > { %s442_s16 = smov (!%p163_p3, %s342_s16), 7 }
   0xe   : > { %s343_s19 = sshll.u32 %s442_s16, 3  ;;  %s345_s25 = sshll.u32 %s442_s16, 2 }
   0xf   : > { %s166_s22 = scalar_lea.vmem %s437_s0, %s343_s19  ;;  %s172_s28 = scalar_lea.vmem %s440_s3, %s345_s25 }
  0x10   : > { %v175_v2 = vld [vmem:[%s166_s22] sm:$0xff]  ;;  %v176_v3 = vld [vmem:[%s166_s22 + $0x8] sm:$0xff]  ;;  %v177_v4 = vld [vmem:[%s166_s22 + $0x10] sm:$0xff] }
  0x11   : > { %v179_v5 = vpack.c.bf16 %v176_v3, %v175_v2  ;;  %v178_v6 = vld [vmem:[%s166_s22 + $0x18] sm:$0xff] }
  0x12   : > { %v180_v7 = vpack.c.bf16 %v178_v6, %v177_v4 }
  0x13   : > { %369 = vmatprep.mubr.msk.bf16.mxu0 %vm204_vm0, %v179_v5 }
  0x14   : > { %370 = vmatmul.mubr.msk.bf16.vlgmr.msra.gmra.mrb[0].mxu0 %vm204_vm0, %v180_v7 }
  0xe7   : > { %v371_v9 = vpop.f32.mrb[0].mxu0 }
  0xe8   : > { %v245_v10 = vpop.f32.mrb[1].mxu0  ;;  %v254_v13 = vadd.f32 %v371_v9, %v346_v8 }
  0xe9   : > { %v246_v11 = vadd.f32 %v346_v8, %v245_v10  ;;  %v372_v12 = vpop.f32.mrb[2].mxu0 }
  0xea   : > { %v248_v14 = vpop.f32.mrb[3].mxu0  ;;  %v257_v16 = vadd.f32 %v372_v12, %v346_v8  ;;  %v359_v19 = vpack.c.bf16 %v254_v13, %v254_v13 }
  0xeb   : > { %v357_v15 = vpack.c.bf16 %v246_v11, %v246_v11  ;;  %v249_v17 = vadd.f32 %v346_v8, %v248_v14 }
  0xec   : > { %v360_v20 = vpack.c.bf16 %v257_v16, %v257_v16  ;;  %279 = vst.msk [vmem:[%s172_s28 + $0x8] sm:$0xf] %vm276_vm1, %v359_v19 }
  0xed   : > { %277 = vst.msk [vmem:[%s172_s28] sm:$0xf] %vm276_vm1, %v357_v15  ;;  %v358_v18 = vpack.c.bf16 %v249_v17, %v249_v17 }
  0xee   : > { %280 = vst.msk [vmem:[%s172_s28 + $0xc] sm:$0xf] %vm276_vm1, %v360_v20 }
  0xef   : > { %278 = vst.msk [vmem:[%s172_s28 + $0x4] sm:$0xf] %vm276_vm1, %v358_v18 }
  0xf0 PF: > { %s13_s12 = sadd.s32 1, %s389_s12  }
  0xf1   : > { %p10_p4 = scmp.ge.s32.totalorder %s13_s12, 4  }
  0xf3   :  { %12 = sbr.rel (!%p10_p4) target bundleno = 1 (0x1), region = 62 }

// kernel: temporal_block_forward.7
= control target key start
LH: loop header
LB: loop body
LE: loop exit
PB: predicated region body
PF: predicated region fallthrough
CT: control target
= control target key end

     0   :  { %10 = vsyncpa [#allocation3], 0  ;;  %s1181_s0 = inlined_call_operand.vmem [shape: bf16[2,4,8,32], index: 0, kind: input, shape index: {}]   ;;  %s1182_s1 = inlined_call_operand.vmem [shape: bf16[2,8,4,32], index: 1, kind: input, shape index: {}]   ;;  %s1183_s2 = inlined_call_operand.vmem [shape: bf16[32,32], index: 2, kind: input, shape index: {}]   ;;  %s1184_s3 = inlined_call_operand.vmem [shape: bf16[32,32], index: 3, kind: input, shape index: {}]   ;;  %s1185_s4 = inlined_call_operand.vmem [shape: f32[1,32], index: 4, kind: input, shape index: {}]   ;;  %s1186_s5 = inlined_call_operand.hbm [shape: f32[2,8,4,32], index: 5, kind: output, shape index: {}]  }
   0x1   :  { %12 = vsyncpa [#allocation3 + $0x1], 0  ;;  %s1032_s18 = smov 0   ;;  %s1034_s19 = smov 0  }
   0x2   :  { %s1036_s20 = smov 0   ;;  %s1038_s21 = smov 0  }
   0x3   :  { %s1040_s22 = smov 0   ;;  %s1042_s23 = smov 0  }
   0x4 LB: > { %s797_s24 = sadd.s32 4294967295, %s995_s23   ;;  %s798_s25 = sadd.s32 4294967294, %s995_s23   ;;  %s995_s23 = sphi %s1042_s23, %s18_s23   ;;  %s991_s22 = sphi %s1040_s22, %s1193_s22   ;;  %s987_s21 = sphi %s1038_s21, %s1192_s21   ;;  %s983_s20 = sphi %s1036_s20, %s1191_s20   ;;  %s979_s19 = sphi %s1034_s19, %s1190_s19   ;;  %s975_s18 = sphi %s1032_s18, %s1189_s18  }
   0x5   : > { %s37_s26 = sadd.s32 1, %s991_s22  ;;  %s171_s27 = sadd.s32 1, %s983_s20 }
   0x6   : > { %p39_p0 = scmp.ge.s32.totalorder %s37_s26, 2  ;;  %p181_p1 = scmp.ne.s32.totalorder %s983_s20, %s979_s19 }
   0x7   : > { %p182_p2 = scmp.eq.s32.totalorder %s797_s24, 1  ;;  %p187_p3 = scmp.ne.s32.totalorder %s979_s19, %s975_s18 }
   0x8   : > { %s1195_s26 = smov (%p39_p0, %s37_s26), 0  ;;  %p188_p5 = scmp.eq.s32.totalorder %s798_s25, 1 }
   0x9   : > { %p1072_p4 = por %p182_p2, %p181_p1  ;;  %s164_s29 = ssub.s32 %s991_s22, %s1195_s26 }
   0xa   : > { %p801_p6 = scmp.ge.s32.totalorder %s995_s23, 1  ;;  %p169_p7 = scmp.eq.s32.totalorder %s164_s29, 0 }
   0xb   : > { %p1079_p8 = por %p188_p5, %p187_p3  ;;  %p247_p9 = scmp.lt.s32.totalorder %s995_s23, 3 }
   0xc   : > { %s1085_s6 = scalar_select %p169_p7, %s983_s20, %s171_s27  }
   0xd   : > { %p248_p10 = pnand %p801_p6, %p247_p9 }
   0xe   : > { %v913_v0 = vld [vmem:[%s1184_s3] sm:$0xff] (!%p248_p10)   ;;  %p295_p11 = scmp.lt.s32.totalorder (!%p248_p10), %s987_s21, 1  ;;  %v342_v1 = vlaneseq (!%p248_p10)  ;;  %v915_v3 = vld [vmem:[%s1184_s3 + $0x8] sm:$0xff] (!%p248_p10)   ;;  %v997_v5 = vmov (!%p248_p10), 1983009808   ;;  %vm476_vm0 = vcmask (!%p248_p10), 261120  }
   0xf   : > { %251 = sbr.rel (%p248_p10) target bundleno = 285 (0x11d), region = 40  ;;  %v914_v2 = vld [vmem:[%s1183_s2] sm:$0xff] (!%p248_p10)   ;;  %834 = vmatprep.subr.bf16.mxu1 (!%p248_p10), %v913_v0  ;;  %v916_v4 = vld [vmem:[%s1183_s2 + $0x8] sm:$0xff] (!%p248_p10)   ;;  %v340_v6 = vunpack.c.l.s4 (!%p248_p10), %v997_v5  ;;  %v998_v8 = vmov (!%p248_p10), 1934713408   ;;  %s291_s8 = sand.u32 (!%p248_p10), 1, %s979_s19  }
  0x10   : > { %835 = vmatpush3.bf16.msra.mxu1 (!%p248_p10), %v913_v0  ;;  %842 = vmatprep.subr.bf16.mxu0 (!%p248_p10), %v914_v2  ;;  %v343_v7 = vshrl.u32 (!%p248_p10), %v342_v1, 7  ;;  %v357_v9 = vunpack.c.l.s4 (!%p248_p10), %v998_v8  ;;  %s802_s9 = sshll.u32 (!%p248_p10), %s291_s8, 5  ;;  %vm664_vm1 = vcmask (!%p248_p10), 257024   ;;  %s825_s12 = sshll.u32 (!%p248_p10), %s987_s21, 9 }
  0x11   : > { %836 = vmatprep.subr.bf16.mxu1 (!%p248_p10), %v915_v3  ;;  %843 = vmatpush3.bf16.msra.mxu0 (!%p248_p10), %v914_v2  ;;  %v341_v10 = vunpack.c.0.s8 (!%p248_p10), %v340_v6  ;;  %s1135_s17 = scalar_lea.sflag (!%p248_p10), [#allocation3], %s291_s8 }
  0x12   : > { %844 = vmatprep.subr.bf16.mxu0 (!%p248_p10), %v916_v4  ;;  %v358_v28 = vunpack.c.0.s8 (!%p248_p10), %v357_v9 }
  0x13   : > { %v344_v18 = vsub.s32 (!%p248_p10), %v341_v10, %v343_v7 }
  0x14   : > { %837 = vmatpush3.bf16.msra.mxu1 (!%p248_p10), %v915_v3  ;;  %v361_v45 = vsub.s32 (!%p248_p10), %v358_v28, %v343_v7  ;;  %v817_v7 = vld [vmem:[%s1185_s4] ss:$0 sm:$0xff] (!%p248_p10) }
  0x15   : > { %845 = vmatpush3.bf16.msra.mxu0 (!%p248_p10), %v916_v4 }
  0x16   : > { %s296_s13 = scalar_select %p295_p11, %s987_s21, 1 }
  0x17   : > { %s1125_s21 = scalar_lea.hbm %s1186_s5, %s825_s12 }
  0x18   : > { %s823_s16 = sshll.u32 %s296_s13, 4  ;;  %s293_s13 = scalar_lea.vmem [#allocation2], %s802_s9 }
  0x19   : > { %s318_s25 = scalar_lea.vmem %s1182_s1, %s823_s16  ;;  %s305_s7 = scalar_lea.vmem %s1181_s0, %s823_s16 }
  0x1a   : > { %v406_v11 = vld [vmem:[%s318_s25] sm:$0x3]  ;;  %v407_v12 = vld [vmem:[%s318_s25 + $0x2] sm:$0x3]  ;;  %v408_v13 = vld [vmem:[%s318_s25 + $0x4] sm:$0x3] }
  0x1b   : > { %v409_v14 = vld [vmem:[%s318_s25 + $0x6] sm:$0x3]  ;;  %v430_v15 = vcombine.low %v406_v11, %v407_v12  ;;  %v410_v16 = vld [vmem:[%s318_s25 + $0x8] sm:$0x3]  ;;  %v411_v17 = vld [vmem:[%s318_s25 + $0xa] sm:$0x3] }
  0x1c   : > { %v431_v19 = vcombine.low %v408_v13, %v409_v14  ;;  %v412_v20 = vld [vmem:[%s318_s25 + $0xc] sm:$0x3]  ;;  %v413_v21 = vld [vmem:[%s318_s25 + $0xe] sm:$0x3]  ;;  %v447_v22 = vcombine.low %v410_v16, %v411_v17  ;;  %v322_v23 = vld [vmem:[%s305_s7] sm:$0xf] }
  0x1d   : > { %v448_v24 = vcombine.low %v412_v20, %v413_v21  ;;  %v323_v25 = vld [vmem:[%s305_s7 + $0x4] sm:$0xf]  ;;  %v324_v26 = vld [vmem:[%s305_s7 + $0x8] sm:$0xf]  ;;  %v325_v27 = vld [vmem:[%s305_s7 + $0xc] sm:$0xf]  ;;  %v438_v29 = vrot.slane %v430_v15, %v344_v18 }
  0x1e   : > { %v445_v30 = vrot.slane %v431_v19, %v344_v18  ;;  %v455_v31 = vrot.slane %v447_v22, %v344_v18  ;;  %v328_v32 = vpack.i.b16 %v323_v25, %v322_v23  ;;  %v329_v34 = vshrl.u32 %v322_v23, 16  ;;  %s690_s14 = sshll.u32 %s293_s13, 4  ;;  %s999_s25 = smov [#allocation2]   ;;  %s1127_s14 = int_to_ptr.vmem [resolvable:$true] %s690_s14 }
  0x1f   : > { %v462_v33 = vrot.slane %v448_v24, %v344_v18  ;;  %v330_v35 = vshrl.u32 %v323_v25, 16  ;;  %v334_v36 = vpack.i.b16 %v325_v27, %v324_v26  ;;  %v335_v38 = vshrl.u32 %v324_v26, 16  ;;  %s917_s24 = scalar_lea.vmem %s1127_s14, 512  ;;  %s921_s27 = sshll.u32 %s999_s25, 4  ;;  %s922_s27 = int_to_ptr.vmem [resolvable:$false] %s921_s27 }
  0x20   : > { %v446_v37 = vcombine.low %v438_v29, %v445_v30  ;;  %v336_v39 = vshrl.u32 %v325_v27, 16  ;;  %v345_v40 = vrot.slane %v328_v32, %v344_v18  ;;  %p918_p12 = scmp.ne.s32.totalorder %s1127_s14, %s917_s24  ;;  %s923_s29 = scalar_lea.vmem %s922_s27, 1024 }
  0x21   : > { %v463_v41 = vcombine.low %v455_v31, %v462_v33  ;;  %v331_v42 = vpack.i.b16 %v330_v35, %v329_v34  ;;  %v353_v43 = vrot.slane %v334_v36, %v344_v18  ;;  %p924_p1 = scmp.lt.s32.totalorder %s1127_s14, %s922_s27  ;;  %p925_p2 = scmp.lt.s32.totalorder %s923_s29, %s917_s24 }
  0x22   : > { %838 = vmatprep.mubr.msk.bf16.mxu1 %vm476_vm0, %v446_v37  ;;  %v337_v44 = vpack.i.b16 %v336_v39, %v335_v38  ;;  %p919_p13 = pnand %p918_p12, %p1072_p4 }
  0x23   : > { %839 = vmatmul.mubr.msk.bf16.vlgmr.msra.gmra.mrb[0].mxu1 %vm476_vm0, %v463_v41  ;;  %v354_v46 = vcombine.low %v345_v40, %v353_v43  ;;  %v355_v47 = vcombine.high %v345_v40, %v353_v43  ;;  %v379_v48 = vrot.slane %v331_v42, %v344_v18  ;;  %p926_p3 = por %p925_p2, %p924_p1 }
  0x24   : > { %v387_v49 = vrot.slane %v337_v44, %v344_v18  ;;  %p920_p0 = pneg %p919_p13 }
  0x25   : > { %v362_v50 = vrot.slane %v354_v46, %v361_v45  ;;  %v369_v53 = vrot.slane %v355_v47, %v361_v45 }
  0x26   : > { %v388_v51 = vcombine.low %v379_v48, %v387_v49  ;;  %v389_v52 = vcombine.high %v379_v48, %v387_v49  ;;  %p927_p5 = pnand %p926_p3, %p920_p0 }
  0x28   : > { %v396_v54 = vrot.slane %v388_v51, %v361_v45  ;;  %v403_v55 = vrot.slane %v389_v52, %v361_v45 }
  0x2a   : > { %v540_v56 = vcombine.low %v362_v50, %v396_v54  ;;  %v811_v57 = vcombine.high %v362_v50, %v396_v54  ;;  %v557_v58 = vcombine.low %v369_v53, %v403_v55  ;;  %v812_v59 = vcombine.high %v369_v53, %v403_v55 }
  0x2c   : > { %v548_v60 = vrot.slane %v540_v56, %v344_v18  ;;  %v555_v61 = vrot.slane %v811_v57, %v344_v18  ;;  %v565_v62 = vrot.slane %v557_v58, %v344_v18  ;;  %v572_v63 = vrot.slane %v812_v59, %v344_v18 }
  0x2e   : > { %v556_v0 = vcombine.low %v548_v60, %v555_v61  ;;  %v573_v1 = vcombine.low %v565_v62, %v572_v63 }
  0x30   : > { %846 = vmatprep.mubr.msk.bf16.mxu0 %vm476_vm0, %v556_v0 }
  0x31   : > { %847 = vmatmul.mubr.msk.bf16.vlgmr.msra.gmra.mrb[0].mxu0 %vm476_vm0, %v573_v1 }
  0xf6   : > { %v840_v2 = vpop.f32.mrb[0].mxu1 }
  0xf7   : > { %v517_v3 = vpop.f32.mrb[1].mxu1 }
  0xf8   : > { %v841_v4 = vpop.f32.mrb[2].mxu1 }
  0xf9   : > { %v520_v5 = vpop.f32.mrb[3].mxu1 }
 0x104   : > { %v848_v6 = vpop.f32.mrb[0].mxu0 }
 0x105   : > { %v635_v8 = vadd.f32 %v848_v6, %v840_v2  ;;  %v626_v9 = vpop.f32.mrb[1].mxu0 }
 0x106   : > { %v627_v10 = vadd.f32 %v626_v9, %v517_v3  ;;  %v849_v11 = vpop.f32.mrb[2].mxu0 }
 0x107   : > { %v650_v12 = vadd.f32 %v817_v7, %v635_v8  ;;  %v638_v13 = vadd.f32 %v849_v11, %v841_v4  ;;  %v629_v14 = vpop.f32.mrb[3].mxu0 }
 0x108   : > { %v648_v15 = vadd.f32 %v817_v7, %v627_v10  ;;  %v630_v16 = vadd.f32 %v629_v14, %v520_v5 }
 0x109   : > { %v658_v17 = vcombine.high %v650_v12, %v650_v12  ;;  %669 = vst.msk [vmem:[%s293_s13 + $0x10] sm:$0xf] %vm664_vm1, %v650_v12  ;;  %v651_v18 = vadd.f32 %v817_v7, %v638_v13 }
 0x10a   : > { %v656_v19 = vcombine.high %v648_v15, %v648_v15  ;;  %665 = vst.msk [vmem:[%s293_s13] sm:$0xf] %vm664_vm1, %v648_v15  ;;  %v649_v20 = vadd.f32 %v817_v7, %v630_v16 }
 0x10b   : > { %670 = vst.msk [vmem:[%s293_s13 + $0x14] sm:$0xf] %vm664_vm1, %v658_v17  ;;  %v659_v21 = vcombine.high %v651_v18, %v651_v18  ;;  %671 = vst.msk [vmem:[%s293_s13 + $0x18] sm:$0xf] %vm664_vm1, %v651_v18 }
 0x10c   : > { %666 = vst.msk [vmem:[%s293_s13 + $0x4] sm:$0xf] %vm664_vm1, %v656_v19  ;;  %v657_v22 = vcombine.high %v649_v20, %v649_v20  ;;  %667 = vst.msk [vmem:[%s293_s13 + $0x8] sm:$0xf] %vm664_vm1, %v649_v20 }
 0x10d   : > { %672 = vst.msk [vmem:[%s293_s13 + $0x1c] sm:$0xf] %vm664_vm1, %v659_v21 }
 0x10e   : > { %668 = vst.msk [vmem:[%s293_s13 + $0xc] sm:$0xf] %vm664_vm1, %v657_v22 }
 0x10f   : > { %930 = shalt.err (!%p927_p5)
}
 0x110   : > { %s931_s7 = scalar_lea.hbm %s1125_s21, 512  ;;  %s935_s10 = scalar_lea.hbm %s1186_s5, 1024 }
 0x111   : > { %p932_p6 = scmp.ne.s32.totalorder %s1125_s21, %s931_s7  ;;  %p936_p10 = scmp.lt.u32.totalorder %s1125_s21, %s1186_s5 }
 0x112   : > { %p937_p11 = scmp.lt.u32.totalorder %s935_s10, %s931_s7  ;;  %p939_p13 = scmp.lt.u32.totalorder %s931_s7, %s1125_s21 }
 0x113   : > { %p933_p7 = pnand %p932_p6, %p1072_p4 }
 0x114   : > { %p938_p12 = por %p937_p11, %p936_p10 }
 0x115   : > { %p934_p9 = pneg %p933_p7 }
 0x116   : > { %p940_p0 = por %p939_p13, %p938_p12 }
 0x118   : > { %p941_p1 = pnand %p940_p0, %p934_p9 }
 0x11a   : > { %944 = shalt.err (!%p941_p1)
}
 0x11b   : > { %s1000_s13 = smov 64   ;;  %s1001_s15 = smov 4  }
 0x11c   : > { %854 = dma.vmem_to_hbm [thread:$0]  (%p1072_p4), %s1127_s14, 512, %s1125_s21, %s1135_s17, %s1000_s13, %s1000_s13, %s1001_s15  }
 0x11d PF: > { %p860_p2 = scmp.ge.s32.totalorder %s995_s23, 2  ;;  %s705_s16 = sand.u32 1, %s975_s18  }
 0x11e   : > { %s706_s24 = scalar_lea.sflag [#allocation3], %s705_s16 }
 0x11f   : > { %p857_p3 = pnand %p860_p2, %p1079_p8 }
 0x121   : > { %970 = dma.done.wait (!%p857_p3), %s706_s24, 512  }
 0x122   : > { %972 = vsyncadd (!%p857_p3), %s706_s24, 4294966784  ;;  %s18_s23 = sadd.s32 1, %s995_s23   ;;  %s1189_s18 = smov %s979_s19 }
 0x123   : > { %p15_p5 = scmp.ge.s32.totalorder %s18_s23, 4   ;;  %s1190_s19 = smov %s983_s20 }
 0x124   : > { %s1191_s20 = smov %s1085_s6  ;;  %s1192_s21 = smov %s991_s22 }
 0x125   : > { %s1193_s22 = smov %s1195_s26  ;;  %17 = sbr.rel (!%p15_p5) target bundleno = 4 (0x4), region = 78 }
 0x12c   :  { %711 = vsyncpa [#allocation3], 1 }
 0x12d   :  { %713 = vsyncpa [#allocation3 + $0x1], 1 }

// kernel: temporal_block_forward.5
= control target key start
LH: loop header
LB: loop body
LE: loop exit
PB: predicated region body
PF: predicated region fallthrough
CT: control target
= control target key end

     0   :  { %s2300_s12 = smov 0   ;;  %s2302_s13 = smov 0   ;;  %s2742_s0 = inlined_call_operand.vmem [shape: bf16[2,8,4,96], index: 0, kind: input, shape index: {}]   ;;  %s2743_s1 = inlined_call_operand.vmem [shape: bf16[32,96], index: 1, kind: input, shape index: {}]   ;;  %s2744_s2 = inlined_call_operand.vmem [shape: f32[1,96], index: 2, kind: input, shape index: {}]   ;;  %s2745_s3 = inlined_call_operand.vmem [shape: bf16[8,2,4,32], index: 3, kind: output, shape index: {}]  }
   0x1   :  { %s2304_s14 = smov 0   ;;  %s2306_s15 = smov 0  }
   0x2   :  { %s2308_s16 = smov 0  }
   0x3 LB: > { %s1773_s17 = sadd.s32 4294967295, %s2271_s16   ;;  %s25_s18 = sadd.s32 1, %s2267_s15  ;;  %s2271_s16 = sphi %s2308_s16, %s13_s16   ;;  %s2267_s15 = sphi %s2306_s15, %s2750_s15   ;;  %s2263_s14 = sphi %s2304_s14, %s2749_s14   ;;  %s2259_s13 = sphi %s2302_s13, %s2748_s13   ;;  %s2255_s12 = sphi %s2300_s12, %s2747_s12  }
   0x4   : > { %p27_p0 = scmp.ge.s32.totalorder %s25_s18, 2  ;;  %s104_s19 = sadd.s32 1, %s2259_s13 }
   0x5   : > { %p114_p1 = scmp.ne.s32.totalorder %s2259_s13, %s2255_s12  ;;  %p115_p2 = scmp.eq.s32.totalorder %s1773_s17, 1 }
   0x6   : > { %s2752_s18 = smov (%p27_p0, %s25_s18), 0  ;;  %p1777_p4 = scmp.ge.s32.totalorder %s2271_s16, 1 }
   0x7   : > { %p2332_p3 = por %p115_p2, %p114_p1  ;;  %s99_s21 = ssub.s32 %s2267_s15, %s2752_s18 }
   0x8   : > { %p156_p5 = scmp.lt.s32.totalorder %s2271_s16, 3  ;;  %p102_p6 = scmp.eq.s32.totalorder %s99_s21, 0 }
   0xa   : > { %p157_p7 = pnand %p1777_p4, %p156_p5 }
   0xb   : > { %s2341_s22 = scalar_select %p102_p6, %s2259_s13, %s104_s19  }
   0xc   : > { %160 = sbr.rel (%p157_p7) target bundleno = 4982 (0x1376), region = 32  ;;  %v2346_v0 = vld [vmem:[%s2743_s1] sm:$0xff] (!%p157_p7)   ;;  %s2273_s25 = smov (!%p157_p7), 64   ;;  %v2353_v1 = vld [vmem:[%s2743_s1 + $0x8] sm:$0xff] (!%p157_p7)   ;;  %v2274_v2 = vmov (!%p157_p7), 0.0   ;;  %vm2275_vm0 = vmmov (!%p157_p7), 0  }
   0xd   : > { %309 = vrot.lane.b32.xlu0 (!%p157_p7), %v2346_v0, %s2273_s25  ;;  %1912 = vmatprep.subr.bf16.mxu0 (!%p157_p7), %v2274_v2  ;;  %s2276_s28 = smov (!%p157_p7), 96   ;;  %v2371_v3 = vld [vmem:[%s2744_s2] ss:$0 sm:$0xff] (!%p157_p7)  ;;  %v2277_v4 = vmov (!%p157_p7), 0   ;;  %p182_p8 = scmp.lt.s32.totalorder (!%p157_p7), %s2263_s14, 1  ;;  %vm216_vm1 = vcmask (!%p157_p7), 261120  }
   0xe   : > { %1913 = vmatpush3.bf16.msra.mxu0 (!%p157_p7), %v2346_v0  ;;  %1916 = vmatprep.mubr.msk.bf16.mxu0 (!%p157_p7), %vm2275_vm0, %v2274_v2  ;;  %s2278_s9 = smov (!%p157_p7), 32   ;;  %s179_s10 = sand.u32 (!%p157_p7), 1, %s2255_s12   ;;  %vm403_vm2 = vcmask (!%p157_p7), 254976  }
   0xf   : > { %1914 = vmatprep.subr.bf16.mxu0 (!%p157_p7), %v2274_v2  ;;  %260 = vrot.lane.b32.xlu1 (!%p157_p7), %v2346_v0, %s2276_s28  ;;  %s1778_s11 = sshll.u32 (!%p157_p7), %s179_s10, 4 }
  0x10   : > { %1920 = vmatprep.subr.bf16.mxu1 (!%p157_p7), %v2274_v2  ;;  %1924 = vmatprep.mubr.msk.bf16.mxu1 (!%p157_p7), %vm2275_vm0, %v2274_v2  ;;  %s2682_s17 = scalar_lea.vmem (!%p157_p7), [#allocation2], %s1778_s11 }
  0x11   : > { %311 = vrot.lane.b32.xlu0 (!%p157_p7), %v2353_v1, %s2273_s25 }
  0x12   : > { %1915 = vmatpush3.bf16.msra.mxu0 (!%p157_p7), %v2353_v1 }
  0x13   : > { %262 = vrot.lane.b32.xlu1 %v2353_v1, %s2276_s28  ;;  %1928 = vmatprep.subr.bf16.mxu0 %v2274_v2  ;;  %s183_s4 = scalar_select %p182_p8, %s2263_s14, 1 }
  0x14   : > { %s1836_s12 = sshll.u32 (%p2332_p3), %s2263_s14, 1 }
  0x15   : > { %1917 = vmatmul.mubr.bf16.vlgmr.msra.gmra.mrb[0].mxu0 %v2277_v4  ;;  %315 = vrot.lane.b32.xlu0 %v2371_v3, %s2273_s25  ;;  %s1839_s5 = sshll.u32 %s183_s4, 4  ;;  %s1639_s23 = scalar_lea.vmem (%p2332_p3), %s2745_s3, %s1836_s12 }
  0x16   : > { %1932 = vmatprep.mubr.msk.bf16.mxu0 %vm2275_vm0, %v2274_v2  ;;  %s2415_s8 = scalar_lea.vmem %s2742_s0, %s1839_s5 }
  0x17   : > { %266 = vrot.lane.b32.xlu1 %v2371_v3, %s2276_s28  ;;  %v196_v13 = vld [vmem:[%s2415_s8] sm:$0x3]  ;;  %v1786_v50 = vld [vmem:[%s2415_s8 + $0x2] sm:$0x3] }
  0x18   : > { %v197_v14 = vunpack.c.l.bf16 %v196_v13  ;;  %v407_v51 = vunpack.c.l.bf16 %v1786_v50 }
  0x7f   : > { %v2382_v5 = vpop.permute.xlu0 %309 }
  0x80   : > { %1929 = vmatpush3.bf16.msra.mxu0 %v2382_v5 }
  0x81   : > { %1930 = vmatprep.subr.bf16.mxu0 %v2274_v2  ;;  %v2386_v6 = vpop.permute.xlu1 %260 }
  0x82   : > { %1921 = vmatpush3.bf16.msra.mxu1 %v2386_v6 }
  0x83   : > { %v2389_v7 = vpop.permute.xlu0 %311  ;;  %1922 = vmatprep.subr.bf16.mxu1 %v2274_v2 }
  0x84   : > { %1931 = vmatpush3.bf16.msra.mxu0 %v2389_v7 }
  0x85   : > { %1944 = vmatprep.subr.bf16.mxu0 %v2274_v2  ;;  %v2394_v8 = vpop.permute.xlu1 %262 }
  0x86   : > { %1923 = vmatpush3.bf16.msra.mxu1 %v2394_v8 }
  0x87   : > { %1933 = vmatmul.mubr.bf16.vlgmr.msra.gmra.mrb[4].mxu0 %v2277_v4  ;;  %1936 = vmatprep.subr.bf16.mxu1 %v2274_v2  ;;  %v2419_v20 = vpop.permute.xlu0 %315 }
  0x88   : > { %1945 = vmatpush3.bf16.msra.mxu0 %v2386_v6  ;;  %1948 = vmatprep.mubr.msk.bf16.mxu0 %vm2275_vm0, %v2274_v2 }
  0x89   : > { %1946 = vmatprep.subr.bf16.mxu0 %v2274_v2  ;;  %1925 = vmatmul.mubr.bf16.vlgmr.msra.gmra.mrb[0].mxu1 %v2277_v4  ;;  %v2421_v23 = vpop.permute.xlu1 %266 }
  0x8a   : > { %1937 = vmatpush3.bf16.msra.mxu1 %v2346_v0  ;;  %1940 = vmatprep.mubr.msk.bf16.mxu1 %vm2275_vm0, %v2274_v2 }
  0x8b   : > { %1938 = vmatprep.subr.bf16.mxu1 %v2274_v2 }
  0x8c   : > { %1947 = vmatpush3.bf16.msra.mxu0 %v2394_v8 }
  0x8d   : > { %1960 = vmatprep.subr.bf16.mxu0 %v2274_v2 }
  0x8e   : > { %1939 = vmatpush3.bf16.msra.mxu1 %v2353_v1 }
  0x8f   : > { %1952 = vmatprep.subr.bf16.mxu1 %v2274_v2 }
  0xe8   : > { %v254_v9 = vpop.f32.mrb[0].mxu0 }
  0xe9   : > { %v1918_v10 = vpop.f32.mrb[1].mxu0  ;;  %v255_v15 = vadd.f32 %v2371_v3, %v254_v9 }
  0xea   : > { %v257_v11 = vpop.f32.mrb[2].mxu0 }
  0xeb   : > { %v1919_v12 = vpop.f32.mrb[3].mxu0  ;;  %v358_v16 = vadd.f32 %v255_v15, %v197_v14 }
  0xed   : > { %v1784_v17 = vmul.f32 -1.442695, %v358_v16 }
  0xef   : > { %2153 = vpow2.f32 %v1784_v17 }
  0xf9   : > { %v2154_v18 = vpop.eup %2153 }
  0xfa   : > { %v362_v19 = vadd.f32 1.0, %v2154_v18 }
  0xfc   : > { %2155 = vrcp.f32 %v362_v19 }
 0x106   : > { %v2156_v21 = vpop.eup %2155 }
 0x15a   : > { %v352_v22 = vpop.f32.mrb[4].mxu0 }
 0x15b   : > { %v353_v24 = vadd.f32 %v352_v22, %v2419_v20  ;;  %v1934_v25 = vpop.f32.mrb[5].mxu0 }
 0x15c   : > { %v355_v26 = vpop.f32.mrb[6].mxu0  ;;  %v303_v27 = vpop.f32.mrb[0].mxu1 }
 0x15d   : > { %v376_v28 = vmul.f32 %v2156_v21, %v353_v24  ;;  %v1935_v29 = vpop.f32.mrb[7].mxu0  ;;  %v1926_v30 = vpop.f32.mrb[1].mxu1  ;;  %v304_v31 = vadd.f32 %v303_v27, %v2421_v23 }
 0x15e   : > { %v306_v32 = vpop.f32.mrb[2].mxu1 }
 0x15f   : > { %378 = vrot.lane.b32.xlu0 %v376_v28, %s2273_s25  ;;  %v1927_v33 = vpop.f32.mrb[3].mxu1  ;;  %366 = vrot.lane.b32.xlu1 %v304_v31, %s2278_s9 }
 0x1d1   : > { %v379_v34 = vpop.permute.xlu0 %378  ;;  %v367_v37 = vpop.permute.xlu1 %366 }
 0x1d2   : > { %v381_v35 = vadd.f32 %v379_v34, %v197_v14  ;;  %v369_v38 = vadd.f32 %v367_v37, %v197_v14 }
 0x1d4   : > { %2157 = vtanh.f32 %v381_v35  ;;  %v1785_v39 = vmul.f32 -1.442695, %v369_v38  ;;  %v1793_v35 = vld [vmem:[%s2415_s8 + $0x4] sm:$0x3] }
 0x1d6   : > { %2159 = vpow2.f32 %v1785_v39 }
 0x1de   : > { %v2158_v36 = vpop.eup %2157 }
 0x1df   : > { %385 = vrot.lane.b32.xlu0 %v2158_v36, %s2276_s28  ;;  %v582_v36 = vunpack.c.l.bf16 %v1793_v35 }
 0x1e0   : > { %v2160_v40 = vpop.eup %2159 }
 0x1e1   : > { %v373_v41 = vadd.f32 1.0, %v2160_v40 }
 0x1e3   : > { %2161 = vrcp.f32 %v373_v41 }
 0x1ed   : > { %v2162_v42 = vpop.eup %2161 }
 0x1ee   : > { %v383_v43 = vsub.f32 1.0, %v2162_v42  ;;  %v389_v45 = vmul.f32 0.0, %v2162_v42 }
 0x251   : > { %v386_v44 = vpop.permute.xlu0 %385 }
 0x252   : > { %v388_v46 = vmul.f32 %v386_v44, %v383_v43 }
 0x254   : > { %v2428_v47 = vadd.f32 %v389_v45, %v388_v46 }
 0x256   : > { %v2432_v48 = vpack.c.bf16 %v2428_v47, %v2428_v47 }
 0x258   : > { %408 = vrot.lane.b32.xlu1 %v2432_v48, %s2276_s28 }
 0x2ca   : > { %v409_v49 = vpop.permute.xlu1 %408 }
 0x2cb   : > { %1941 = vmatmul.mubr.msk.bf16.vlgmr.msra.gmra.mrb[4].mxu1 %vm216_vm1, %v409_v49  ;;  %1949 = vmatmul.mubr.msk.bf16.vlgmr.msra.gmra.mrb[8].mxu0 %vm216_vm1, %v409_v49 }
 0x2cc   : > { %1953 = vmatpush3.bf16.msra.mxu1 %v2382_v5  ;;  %1956 = vmatprep.mubr.msk.bf16.mxu1 %vm2275_vm0, %v2274_v2 }
 0x2cd   : > { %1954 = vmatprep.subr.bf16.mxu1 %v2274_v2  ;;  %1961 = vmatpush3.bf16.msra.mxu0 %v2346_v0 }
 0x2ce   : > { %1962 = vmatprep.subr.bf16.mxu0 %v2274_v2  ;;  %1964 = vmatprep.mubr.msk.bf16.mxu0 %vm2275_vm0, %v2274_v2 }
 0x2d0   : > { %1955 = vmatpush3.bf16.msra.mxu1 %v2389_v7 }
 0x2d1   : > { %1968 = vmatprep.subr.bf16.mxu1 %v2274_v2  ;;  %1963 = vmatpush3.bf16.msra.mxu0 %v2353_v1 }
 0x2d2   : > { %1976 = vmatprep.subr.bf16.mxu0 %v2274_v2 }
 0x2d3   : > { %1957 = vmatmul.mubr.msk.bf16.vlgmr.msra.gmra.mrb[8].mxu1 %vm216_vm1, %v409_v49 }
 0x2d4   : > { %1969 = vmatpush3.bf16.msra.mxu1 %v2386_v6  ;;  %1972 = vmatprep.mubr.msk.bf16.mxu1 %vm2275_vm0, %v2274_v2 }
 0x2d5   : > { %1970 = vmatprep.subr.bf16.mxu1 %v2274_v2 }
 0x2d8   : > { %1971 = vmatpush3.bf16.msra.mxu1 %v2394_v8 }
 0x2d9   : > { %1984 = vmatprep.subr.bf16.mxu1 %v2274_v2 }
 0x39e   : > { %v447_v52 = vpop.f32.mrb[4].mxu1  ;;  %v487_v53 = vpop.f32.mrb[8].mxu0 }
 0x39f   : > { %v448_v54 = vadd.f32 %v2371_v3, %v447_v52  ;;  %v488_v55 = vadd.f32 %v487_v53, %v2421_v23  ;;  %v1942_v56 = vpop.f32.mrb[5].mxu1  ;;  %v1950_v57 = vpop.f32.mrb[9].mxu0 }
 0x3a0   : > { %v450_v58 = vpop.f32.mrb[6].mxu1  ;;  %v490_v59 = vpop.f32.mrb[10].mxu0 }
 0x3a1   : > { %v533_v60 = vadd.f32 %v448_v54, %v407_v51  ;;  %541 = vrot.lane.b32.xlu1 %v488_v55, %s2278_s9  ;;  %v1943_v61 = vpop.f32.mrb[7].mxu1  ;;  %v1951_v62 = vpop.f32.mrb[11].mxu0 }
 0x3a3   : > { %v1790_v63 = vmul.f32 -1.442695, %v533_v60 }
 0x3a5   : > { %2163 = vpow2.f32 %v1790_v63 }
 0x3a6   : > { %v527_v4 = vpop.f32.mrb[8].mxu1 }
 0x3a7   : > { %v1958_v9 = vpop.f32.mrb[9].mxu1  ;;  %v528_v14 = vadd.f32 %v527_v4, %v2419_v20 }
 0x3a8   : > { %v530_v10 = vpop.f32.mrb[10].mxu1 }
 0x3a9   : > { %v1959_v11 = vpop.f32.mrb[11].mxu1 }
 0x3af   : > { %v2164_v12 = vpop.eup %2163 }
 0x3b0   : > { %v537_v13 = vadd.f32 1.0, %v2164_v12 }
 0x3b2   : > { %2165 = vrcp.f32 %v537_v13 }
 0x3bc   : > { %v2166_v15 = vpop.eup %2165 }
 0x3bd   : > { %v551_v16 = vmul.f32 %v2166_v15, %v528_v14 }
 0x3bf   : > { %553 = vrot.lane.b32.xlu0 %v551_v16, %s2273_s25 }
 0x413   : > { %v542_v21 = vpop.permute.xlu1 %541 }
 0x414   : > { %v544_v22 = vadd.f32 %v542_v21, %v407_v51 }
 0x416   : > { %v1791_v24 = vmul.f32 -1.442695, %v544_v22 }
 0x431   : > { %v554_v17 = vpop.permute.xlu0 %553 }
 0x432   : > { %v556_v18 = vadd.f32 %v554_v17, %v407_v51 }
 0x434   : > { %2167 = vtanh.f32 %v556_v18 }
 0x435   : > { %2169 = vpow2.f32 %v1791_v24 }
 0x43e   : > { %v2168_v19 = vpop.eup %2167 }
 0x43f   : > { %560 = vrot.lane.b32.xlu0 %v2168_v19, %s2276_s28  ;;  %v2170_v25 = vpop.eup %2169  ;;  %v1800_v19 = vld [vmem:[%s2415_s8 + $0x6] sm:$0x3] }
 0x440   : > { %v548_v26 = vadd.f32 1.0, %v2170_v25  ;;  %v757_v21 = vunpack.c.l.bf16 %v1800_v19 }
 0x442   : > { %2171 = vrcp.f32 %v548_v26 }
 0x44c   : > { %v2172_v27 = vpop.eup %2171 }
 0x44d   : > { %v558_v28 = vsub.f32 1.0, %v2172_v27  ;;  %v564_v30 = vmul.f32 %v2172_v27, %v2428_v47 }
 0x4b1   : > { %v561_v29 = vpop.permute.xlu0 %560 }
 0x4b2   : > { %v563_v31 = vmul.f32 %v561_v29, %v558_v28 }
 0x4b4   : > { %v2465_v32 = vadd.f32 %v564_v30, %v563_v31 }
 0x4b6   : > { %v2469_v33 = vpack.c.bf16 %v2465_v32, %v2465_v32 }
 0x4b8   : > { %583 = vrot.lane.b32.xlu1 %v2469_v33, %s2276_s28 }
 0x52a   : > { %v584_v34 = vpop.permute.xlu1 %583 }
 0x52b   : > { %1965 = vmatmul.mubr.msk.bf16.vlgmr.msra.gmra.mrb[12].mxu0 %vm216_vm1, %v584_v34  ;;  %1973 = vmatmul.mubr.msk.bf16.vlgmr.msra.gmra.mrb[12].mxu1 %vm216_vm1, %v584_v34 }
 0x52c   : > { %1977 = vmatpush3.bf16.msra.mxu0 %v2382_v5  ;;  %1980 = vmatprep.mubr.msk.bf16.mxu0 %vm2275_vm0, %v2274_v2 }
 0x52d   : > { %1978 = vmatprep.subr.bf16.mxu0 %v2274_v2  ;;  %1985 = vmatpush3.bf16.msra.mxu1 %v2346_v0 }
 0x52e   : > { %1986 = vmatprep.subr.bf16.mxu1 %v2274_v2  ;;  %1988 = vmatprep.mubr.msk.bf16.mxu1 %vm2275_vm0, %v2274_v2 }
 0x530   : > { %1979 = vmatpush3.bf16.msra.mxu0 %v2389_v7 }
 0x531   : > { %1992 = vmatprep.subr.bf16.mxu0 %v2274_v2  ;;  %1987 = vmatpush3.bf16.msra.mxu1 %v2353_v1 }
 0x532   : > { %2000 = vmatprep.subr.bf16.mxu1 %v2274_v2 }
 0x533   : > { %1981 = vmatmul.mubr.msk.bf16.vlgmr.msra.gmra.mrb[16].mxu0 %vm216_vm1, %v584_v34 }
 0x534   : > { %1993 = vmatpush3.bf16.msra.mxu0 %v2386_v6  ;;  %1996 = vmatprep.mubr.msk.bf16.mxu0 %vm2275_vm0, %v2274_v2 }
 0x535   : > { %1994 = vmatprep.subr.bf16.mxu0 %v2274_v2 }
 0x538   : > { %1995 = vmatpush3.bf16.msra.mxu0 %v2394_v8 }
 0x539   : > { %2008 = vmatprep.subr.bf16.mxu0 %v2274_v2 }
 0x5fe   : > { %v622_v37 = vpop.f32.mrb[12].mxu0  ;;  %v662_v38 = vpop.f32.mrb[12].mxu1 }
 0x5ff   : > { %v623_v39 = vadd.f32 %v2371_v3, %v622_v37  ;;  %v663_v40 = vadd.f32 %v662_v38, %v2421_v23  ;;  %v1966_v41 = vpop.f32.mrb[13].mxu0  ;;  %v1974_v42 = vpop.f32.mrb[13].mxu1 }
 0x600   : > { %v625_v43 = vpop.f32.mrb[14].mxu0  ;;  %v665_v44 = vpop.f32.mrb[14].mxu1 }
 0x601   : > { %v708_v45 = vadd.f32 %v623_v39, %v582_v36  ;;  %v1967_v46 = vpop.f32.mrb[15].mxu0  ;;  %716 = vrot.lane.b32.xlu1 %v663_v40, %s2278_s9  ;;  %v1975_v47 = vpop.f32.mrb[15].mxu1 }
 0x603   : > { %v1797_v49 = vmul.f32 -1.442695, %v708_v45 }
 0x605   : > { %2173 = vpow2.f32 %v1797_v49 }
 0x606   : > { %v702_v50 = vpop.f32.mrb[16].mxu0 }
 0x607   : > { %v1982_v51 = vpop.f32.mrb[17].mxu0  ;;  %v703_v56 = vadd.f32 %v702_v50, %v2419_v20 }
 0x608   : > { %v705_v52 = vpop.f32.mrb[18].mxu0 }
 0x609   : > { %v1983_v53 = vpop.f32.mrb[19].mxu0 }
 0x60f   : > { %v2174_v54 = vpop.eup %2173 }
 0x610   : > { %v712_v55 = vadd.f32 1.0, %v2174_v54 }
 0x612   : > { %2175 = vrcp.f32 %v712_v55 }
 0x61c   : > { %v2176_v57 = vpop.eup %2175 }
 0x61d   : > { %v726_v58 = vmul.f32 %v2176_v57, %v703_v56 }
 0x61f   : > { %728 = vrot.lane.b32.xlu0 %v726_v58, %s2273_s25 }
 0x673   : > { %v717_v62 = vpop.permute.xlu1 %716 }
 0x674   : > { %v719_v63 = vadd.f32 %v717_v62, %v582_v36  ;;  %v1807_v62 = vld [vmem:[%s2415_s8 + $0x8] sm:$0x3] }
 0x676   : > { %v1798_v4 = vmul.f32 -1.442695, %v719_v63  ;;  %v932_v63 = vunpack.c.l.bf16 %v1807_v62 }
 0x691   : > { %v729_v59 = vpop.permute.xlu0 %728 }
 0x692   : > { %v731_v60 = vadd.f32 %v729_v59, %v582_v36 }
 0x694   : > { %2177 = vtanh.f32 %v731_v60 }
 0x695   : > { %2179 = vpow2.f32 %v1798_v4 }
 0x69e   : > { %v2178_v61 = vpop.eup %2177 }
 0x69f   : > { %735 = vrot.lane.b32.xlu0 %v2178_v61, %s2276_s28  ;;  %v2180_v9 = vpop.eup %2179 }
 0x6a0   : > { %v723_v10 = vadd.f32 1.0, %v2180_v9 }
 0x6a2   : > { %2181 = vrcp.f32 %v723_v10 }
 0x6ac   : > { %v2182_v11 = vpop.eup %2181 }
 0x6ad   : > { %v733_v12 = vsub.f32 1.0, %v2182_v11  ;;  %v739_v15 = vmul.f32 %v2182_v11, %v2465_v32 }
 0x711   : > { %v736_v13 = vpop.permute.xlu0 %735 }
 0x712   : > { %v738_v14 = vmul.f32 %v736_v13, %v733_v12 }
 0x714   : > { %v2502_v16 = vadd.f32 %v739_v15, %v738_v14 }
 0x716   : > { %v2506_v17 = vpack.c.bf16 %v2502_v16, %v2502_v16 }
 0x718   : > { %758 = vrot.lane.b32.xlu1 %v2506_v17, %s2276_s28 }
 0x78a   : > { %v759_v18 = vpop.permute.xlu1 %758 }
 0x78b   : > { %1989 = vmatmul.mubr.msk.bf16.vlgmr.msra.gmra.mrb[16].mxu1 %vm216_vm1, %v759_v18  ;;  %1997 = vmatmul.mubr.msk.bf16.vlgmr.msra.gmra.mrb[20].mxu0 %vm216_vm1, %v759_v18 }
 0x78c   : > { %2001 = vmatpush3.bf16.msra.mxu1 %v2382_v5  ;;  %2004 = vmatprep.mubr.msk.bf16.mxu1 %vm2275_vm0, %v2274_v2 }
 0x78d   : > { %2002 = vmatprep.subr.bf16.mxu1 %v2274_v2  ;;  %2009 = vmatpush3.bf16.msra.mxu0 %v2346_v0 }
 0x78e   : > { %2010 = vmatprep.subr.bf16.mxu0 %v2274_v2  ;;  %2012 = vmatprep.mubr.msk.bf16.mxu0 %vm2275_vm0, %v2274_v2 }
 0x790   : > { %2003 = vmatpush3.bf16.msra.mxu1 %v2389_v7 }
 0x791   : > { %2016 = vmatprep.subr.bf16.mxu1 %v2274_v2  ;;  %2011 = vmatpush3.bf16.msra.mxu0 %v2353_v1 }
 0x792   : > { %2024 = vmatprep.subr.bf16.mxu0 %v2274_v2 }
 0x793   : > { %2005 = vmatmul.mubr.msk.bf16.vlgmr.msra.gmra.mrb[20].mxu1 %vm216_vm1, %v759_v18 }
 0x794   : > { %2017 = vmatpush3.bf16.msra.mxu1 %v2386_v6  ;;  %2020 = vmatprep.mubr.msk.bf16.mxu1 %vm2275_vm0, %v2274_v2 }
 0x795   : > { %2018 = vmatprep.subr.bf16.mxu1 %v2274_v2 }
 0x798   : > { %2019 = vmatpush3.bf16.msra.mxu1 %v2394_v8 }
 0x799   : > { %2032 = vmatprep.subr.bf16.mxu1 %v2274_v2 }
 0x85e   : > { %v797_v22 = vpop.f32.mrb[16].mxu1  ;;  %v837_v24 = vpop.f32.mrb[20].mxu0 }
 0x85f   : > { %v798_v25 = vadd.f32 %v2371_v3, %v797_v22  ;;  %v838_v26 = vadd.f32 %v837_v24, %v2421_v23  ;;  %v1990_v27 = vpop.f32.mrb[17].mxu1  ;;  %v1998_v28 = vpop.f32.mrb[21].mxu0 }
 0x860   : > { %v800_v29 = vpop.f32.mrb[18].mxu1  ;;  %v840_v30 = vpop.f32.mrb[22].mxu0 }
 0x861   : > { %v883_v31 = vadd.f32 %v798_v25, %v757_v21  ;;  %891 = vrot.lane.b32.xlu1 %v838_v26, %s2278_s9  ;;  %v1991_v32 = vpop.f32.mrb[19].mxu1  ;;  %v1999_v34 = vpop.f32.mrb[23].mxu0 }
 0x863   : > { %v1804_v35 = vmul.f32 -1.442695, %v883_v31 }
 0x865   : > { %2183 = vpow2.f32 %v1804_v35 }
 0x866   : > { %v877_v36 = vpop.f32.mrb[20].mxu1 }
 0x867   : > { %v2006_v37 = vpop.f32.mrb[21].mxu1  ;;  %v878_v42 = vadd.f32 %v877_v36, %v2419_v20 }
 0x868   : > { %v880_v38 = vpop.f32.mrb[22].mxu1 }
 0x869   : > { %v2007_v39 = vpop.f32.mrb[23].mxu1 }
 0x86f   : > { %v2184_v40 = vpop.eup %2183 }
 0x870   : > { %v887_v41 = vadd.f32 1.0, %v2184_v40 }
 0x872   : > { %2185 = vrcp.f32 %v887_v41 }
 0x87c   : > { %v2186_v43 = vpop.eup %2185 }
 0x87d   : > { %v901_v44 = vmul.f32 %v2186_v43, %v878_v42 }
 0x87f   : > { %903 = vrot.lane.b32.xlu0 %v901_v44, %s2273_s25 }
 0x8d3   : > { %v892_v49 = vpop.permute.xlu1 %891 }
 0x8d4   : > { %v894_v50 = vadd.f32 %v892_v49, %v757_v21 }
 0x8d6   : > { %v1805_v51 = vmul.f32 -1.442695, %v894_v50  ;;  %v1814_v50 = vld [vmem:[%s2415_s8 + $0xa] sm:$0x3] }
 0x8f1   : > { %v904_v45 = vpop.permute.xlu0 %903 }
 0x8f2   : > { %v906_v46 = vadd.f32 %v904_v45, %v757_v21 }
 0x8f4   : > { %2187 = vtanh.f32 %v906_v46 }
 0x8f5   : > { %2189 = vpow2.f32 %v1805_v51  ;;  %v1107_v51 = vunpack.c.l.bf16 %v1814_v50 }
 0x8fe   : > { %v2188_v47 = vpop.eup %2187 }
 0x8ff   : > { %910 = vrot.lane.b32.xlu0 %v2188_v47, %s2276_s28  ;;  %v2190_v52 = vpop.eup %2189 }
 0x900   : > { %v898_v53 = vadd.f32 1.0, %v2190_v52 }
 0x902   : > { %2191 = vrcp.f32 %v898_v53 }
 0x90c   : > { %v2192_v54 = vpop.eup %2191 }
 0x90d   : > { %v908_v55 = vsub.f32 1.0, %v2192_v54  ;;  %v914_v57 = vmul.f32 %v2192_v54, %v2502_v16 }
 0x971   : > { %v911_v56 = vpop.permute.xlu0 %910 }
 0x972   : > { %v913_v58 = vmul.f32 %v911_v56, %v908_v55 }
 0x974   : > { %v2539_v59 = vadd.f32 %v914_v57, %v913_v58 }
 0x976   : > { %v2543_v60 = vpack.c.bf16 %v2539_v59, %v2539_v59 }
 0x978   : > { %933 = vrot.lane.b32.xlu1 %v2543_v60, %s2276_s28 }
 0x9ea   : > { %v934_v61 = vpop.permute.xlu1 %933 }
 0x9eb   : > { %2013 = vmatmul.mubr.msk.bf16.vlgmr.msra.gmra.mrb[24].mxu0 %vm216_vm1, %v934_v61  ;;  %2021 = vmatmul.mubr.msk.bf16.vlgmr.msra.gmra.mrb[24].mxu1 %vm216_vm1, %v934_v61 }
 0x9ec   : > { %2025 = vmatpush3.bf16.msra.mxu0 %v2382_v5  ;;  %2028 = vmatprep.mubr.msk.bf16.mxu0 %vm2275_vm0, %v2274_v2 }
 0x9ed   : > { %2026 = vmatprep.subr.bf16.mxu0 %v2274_v2  ;;  %2033 = vmatpush3.bf16.msra.mxu1 %v2346_v0 }
 0x9ee   : > { %2034 = vmatprep.subr.bf16.mxu1 %v2274_v2  ;;  %2036 = vmatprep.mubr.msk.bf16.mxu1 %vm2275_vm0, %v2274_v2 }
 0x9f0   : > { %2027 = vmatpush3.bf16.msra.mxu0 %v2389_v7 }
 0x9f1   : > { %2040 = vmatprep.subr.bf16.mxu0 %v2274_v2  ;;  %2035 = vmatpush3.bf16.msra.mxu1 %v2353_v1 }
 0x9f2   : > { %2048 = vmatprep.subr.bf16.mxu1 %v2274_v2 }
 0x9f3   : > { %2029 = vmatmul.mubr.msk.bf16.vlgmr.msra.gmra.mrb[28].mxu0 %vm216_vm1, %v934_v61 }
 0x9f4   : > { %2041 = vmatpush3.bf16.msra.mxu0 %v2386_v6  ;;  %2044 = vmatprep.mubr.msk.bf16.mxu0 %vm2275_vm0, %v2274_v2 }
 0x9f5   : > { %2042 = vmatprep.subr.bf16.mxu0 %v2274_v2 }
 0x9f8   : > { %2043 = vmatpush3.bf16.msra.mxu0 %v2394_v8 }
 0x9f9   : > { %2056 = vmatprep.subr.bf16.mxu0 %v2274_v2 }
 0xabe   : > { %v972_v4 = vpop.f32.mrb[24].mxu0  ;;  %v1012_v9 = vpop.f32.mrb[24].mxu1 }
 0xabf   : > { %v973_v10 = vadd.f32 %v2371_v3, %v972_v4  ;;  %v1013_v11 = vadd.f32 %v1012_v9, %v2421_v23  ;;  %v2014_v12 = vpop.f32.mrb[25].mxu0  ;;  %v2022_v13 = vpop.f32.mrb[25].mxu1 }
 0xac0   : > { %v975_v14 = vpop.f32.mrb[26].mxu0  ;;  %v1015_v15 = vpop.f32.mrb[26].mxu1 }
 0xac1   : > { %v1058_v16 = vadd.f32 %v973_v10, %v932_v63  ;;  %v2015_v18 = vpop.f32.mrb[27].mxu0  ;;  %1066 = vrot.lane.b32.xlu1 %v1013_v11, %s2278_s9  ;;  %v2023_v19 = vpop.f32.mrb[27].mxu1 }
 0xac3   : > { %v1811_v21 = vmul.f32 -1.442695, %v1058_v16 }
 0xac5   : > { %2193 = vpow2.f32 %v1811_v21 }
 0xac6   : > { %v1052_v22 = vpop.f32.mrb[28].mxu0 }
 0xac7   : > { %v2030_v24 = vpop.f32.mrb[29].mxu0  ;;  %v1053_v29 = vadd.f32 %v1052_v22, %v2419_v20 }
 0xac8   : > { %v1055_v25 = vpop.f32.mrb[30].mxu0 }
 0xac9   : > { %v2031_v26 = vpop.f32.mrb[31].mxu0 }
 0xacf   : > { %v2194_v27 = vpop.eup %2193 }
 0xad0   : > { %v1062_v28 = vadd.f32 1.0, %v2194_v27 }
 0xad2   : > { %2195 = vrcp.f32 %v1062_v28 }
 0xadc   : > { %v2196_v30 = vpop.eup %2195 }
 0xadd   : > { %v1076_v31 = vmul.f32 %v2196_v30, %v1053_v29 }
 0xadf   : > { %1078 = vrot.lane.b32.xlu0 %v1076_v31, %s2273_s25 }
 0xb33   : > { %v1067_v36 = vpop.permute.xlu1 %1066 }
 0xb34   : > { %v1069_v37 = vadd.f32 %v1067_v36, %v932_v63 }
 0xb36   : > { %v1812_v38 = vmul.f32 -1.442695, %v1069_v37 }
 0xb51   : > { %v1079_v32 = vpop.permute.xlu0 %1078 }
 0xb52   : > { %v1081_v34 = vadd.f32 %v1079_v32, %v932_v63 }
 0xb54   : > { %2197 = vtanh.f32 %v1081_v34 }
 0xb55   : > { %2199 = vpow2.f32 %v1812_v38 }
 0xb5e   : > { %v2198_v35 = vpop.eup %2197 }
 0xb5f   : > { %1085 = vrot.lane.b32.xlu0 %v2198_v35, %s2276_s28  ;;  %v2200_v39 = vpop.eup %2199 }
 0xb60   : > { %v1073_v40 = vadd.f32 1.0, %v2200_v39 }
 0xb62   : > { %2201 = vrcp.f32 %v1073_v40 }
 0xb6c   : > { %v2202_v41 = vpop.eup %2201 }
 0xb6d   : > { %v1083_v42 = vsub.f32 1.0, %v2202_v41  ;;  %v1089_v45 = vmul.f32 %v2202_v41, %v2539_v59 }
 0xbd1   : > { %v1086_v43 = vpop.permute.xlu0 %1085 }
 0xbd2   : > { %v1088_v44 = vmul.f32 %v1086_v43, %v1083_v42 }
 0xbd4   : > { %v2576_v46 = vadd.f32 %v1089_v45, %v1088_v44 }
 0xbd6   : > { %v2580_v47 = vpack.c.bf16 %v2576_v46, %v2576_v46 }
 0xbd8   : > { %1108 = vrot.lane.b32.xlu1 %v2580_v47, %s2276_s28 }
 0xc4a   : > { %v1109_v49 = vpop.permute.xlu1 %1108 }
 0xc4b   : > { %2037 = vmatmul.mubr.msk.bf16.vlgmr.msra.gmra.mrb[28].mxu1 %vm216_vm1, %v1109_v49  ;;  %2045 = vmatmul.mubr.msk.bf16.vlgmr.msra.gmra.mrb[32].mxu0 %vm216_vm1, %v1109_v49 }
 0xc4c   : > { %2049 = vmatpush3.bf16.msra.mxu1 %v2382_v5  ;;  %2052 = vmatprep.mubr.msk.bf16.mxu1 %vm2275_vm0, %v2274_v2 }
 0xc4d   : > { %2050 = vmatprep.subr.bf16.mxu1 %v2274_v2  ;;  %2057 = vmatpush3.bf16.msra.mxu0 %v2346_v0 }
 0xc4e   : > { %2058 = vmatprep.subr.bf16.mxu0 %v2274_v2  ;;  %2060 = vmatprep.mubr.msk.bf16.mxu0 %vm2275_vm0, %v2274_v2 }
 0xc50   : > { %2051 = vmatpush3.bf16.msra.mxu1 %v2389_v7 }
 0xc51   : > { %2064 = vmatprep.subr.bf16.mxu1 %v2274_v2  ;;  %2059 = vmatpush3.bf16.msra.mxu0 %v2353_v1 }
 0xc52   : > { %2072 = vmatprep.subr.bf16.mxu0 %v2274_v2 }
 0xc53   : > { %2053 = vmatmul.mubr.msk.bf16.vlgmr.msra.gmra.mrb[32].mxu1 %vm216_vm1, %v1109_v49 }
 0xc54   : > { %2065 = vmatpush3.bf16.msra.mxu1 %v2386_v6  ;;  %2068 = vmatprep.mubr.msk.bf16.mxu1 %vm2275_vm0, %v2274_v2 }
 0xc55   : > { %2066 = vmatprep.subr.bf16.mxu1 %v2274_v2 }
 0xc58   : > { %2067 = vmatpush3.bf16.msra.mxu1 %v2394_v8 }
 0xc59   : > { %2080 = vmatprep.subr.bf16.mxu1 %v2274_v2 }
 0xd1e   : > { %v1147_v52 = vpop.f32.mrb[28].mxu1  ;;  %v1187_v53 = vpop.f32.mrb[32].mxu0 }
 0xd1f   : > { %v1148_v54 = vadd.f32 %v2371_v3, %v1147_v52  ;;  %v1188_v55 = vadd.f32 %v1187_v53, %v2421_v23  ;;  %v2038_v56 = vpop.f32.mrb[29].mxu1  ;;  %v2046_v57 = vpop.f32.mrb[33].mxu0 }
 0xd20   : > { %v1150_v58 = vpop.f32.mrb[30].mxu1  ;;  %v1190_v59 = vpop.f32.mrb[34].mxu0 }
 0xd21   : > { %v1233_v61 = vadd.f32 %v1148_v54, %v1107_v51  ;;  %1241 = vrot.lane.b32.xlu1 %v1188_v55, %s2278_s9  ;;  %v2039_v62 = vpop.f32.mrb[31].mxu1  ;;  %v2047_v63 = vpop.f32.mrb[35].mxu0 }
 0xd23   : > { %v1818_v4 = vmul.f32 -1.442695, %v1233_v61 }
 0xd25   : > { %2203 = vpow2.f32 %v1818_v4 }
 0xd26   : > { %v1227_v9 = vpop.f32.mrb[32].mxu1 }
 0xd27   : > { %v2054_v10 = vpop.f32.mrb[33].mxu1  ;;  %v1228_v15 = vadd.f32 %v1227_v9, %v2419_v20 }
 0xd28   : > { %v1230_v11 = vpop.f32.mrb[34].mxu1 }
 0xd29   : > { %v2055_v12 = vpop.f32.mrb[35].mxu1 }
 0xd2f   : > { %v2204_v13 = vpop.eup %2203 }
 0xd30   : > { %v1237_v14 = vadd.f32 1.0, %v2204_v13 }
 0xd32   : > { %2205 = vrcp.f32 %v1237_v14 }
 0xd3c   : > { %v2206_v16 = vpop.eup %2205 }
 0xd3d   : > { %v1251_v18 = vmul.f32 %v2206_v16, %v1228_v15 }
 0xd3f   : > { %1253 = vrot.lane.b32.xlu0 %v1251_v18, %s2273_s25 }
 0xd93   : > { %v1242_v24 = vpop.permute.xlu1 %1241 }
 0xd94   : > { %v1244_v25 = vadd.f32 %v1242_v24, %v1107_v51 }
 0xd96   : > { %v1819_v26 = vmul.f32 -1.442695, %v1244_v25  ;;  %v396_v25 = vlaneseq }
 0xdb1   : > { %v1254_v19 = vpop.permute.xlu0 %1253 }
 0xdb2   : > { %v1256_v21 = vadd.f32 %v1254_v19, %v1107_v51 }
 0xdb4   : > { %2207 = vtanh.f32 %v1256_v21 }
 0xdb5   : > { %2209 = vpow2.f32 %v1819_v26  ;;  %v1828_v26 = vld [vmem:[%s2415_s8 + $0xe] sm:$0x3] }
 0xdbe   : > { %v2208_v22 = vpop.eup %2207 }
 0xdbf   : > { %1260 = vrot.lane.b32.xlu0 %v2208_v22, %s2276_s28  ;;  %v2210_v27 = vpop.eup %2209  ;;  %v2279_v22 = vmov 1983009808  }
 0xdc0   : > { %v1248_v28 = vadd.f32 1.0, %v2210_v27  ;;  %v394_v24 = vunpack.c.l.s4 %v2279_v22 }
 0xdc2   : > { %2211 = vrcp.f32 %v1248_v28  ;;  %v395_v27 = vunpack.c.0.s8 %v394_v24  ;;  %v397_v28 = vshrl.u32 %v396_v25, 7 }
 0xdcc   : > { %v2212_v29 = vpop.eup %2211 }
 0xdcd   : > { %v1258_v30 = vsub.f32 1.0, %v2212_v29  ;;  %v1264_v32 = vmul.f32 %v2212_v29, %v2576_v46  ;;  %v1457_v29 = vunpack.c.l.bf16 %v1828_v26 }
 0xe31   : > { %v1261_v31 = vpop.permute.xlu0 %1260 }
 0xe32   : > { %v1263_v34 = vmul.f32 %v1261_v31, %v1258_v30 }
 0xe34   : > { %v2613_v35 = vadd.f32 %v1264_v32, %v1263_v34 }
 0xe36   : > { %v2617_v36 = vpack.c.bf16 %v2613_v35, %v2613_v35 }
 0xe38   : > { %1283 = vrot.lane.b32.xlu1 %v2617_v36, %s2276_s28 }
 0xeaa   : > { %v1284_v37 = vpop.permute.xlu1 %1283 }
 0xeab   : > { %2061 = vmatmul.mubr.msk.bf16.vlgmr.msra.gmra.mrb[36].mxu0 %vm216_vm1, %v1284_v37  ;;  %2069 = vmatmul.mubr.msk.bf16.vlgmr.msra.gmra.mrb[36].mxu1 %vm216_vm1, %v1284_v37 }
 0xeac   : > { %2073 = vmatpush3.bf16.msra.mxu0 %v2382_v5  ;;  %2076 = vmatprep.mubr.msk.bf16.mxu0 %vm2275_vm0, %v2274_v2 }
 0xead   : > { %2074 = vmatprep.subr.bf16.mxu0 %v2274_v2  ;;  %2081 = vmatpush3.bf16.msra.mxu1 %v2346_v0  ;;  %v1821_v0 = vld [vmem:[%s2415_s8 + $0xc] sm:$0x3] }
 0xeae   : > { %2082 = vmatprep.subr.bf16.mxu1 %v2274_v2  ;;  %2084 = vmatprep.mubr.msk.bf16.mxu1 %vm2275_vm0, %v2274_v2  ;;  %v1282_v38 = vunpack.c.l.bf16 %v1821_v0 }
 0xeb0   : > { %2075 = vmatpush3.bf16.msra.mxu0 %v2389_v7 }
 0xeb1   : > { %2088 = vmatprep.subr.bf16.mxu0 %v2274_v2  ;;  %2083 = vmatpush3.bf16.msra.mxu1 %v2353_v1 }
 0xeb2   : > { %2096 = vmatprep.subr.bf16.mxu1 %v2274_v2 }
 0xeb3   : > { %2077 = vmatmul.mubr.msk.bf16.vlgmr.msra.gmra.mrb[40].mxu0 %vm216_vm1, %v1284_v37 }
 0xeb4   : > { %2089 = vmatpush3.bf16.msra.mxu0 %v2386_v6  ;;  %2092 = vmatprep.mubr.msk.bf16.mxu0 %vm2275_vm0, %v2274_v2 }
 0xeb5   : > { %2090 = vmatprep.subr.bf16.mxu0 %v2274_v2 }
 0xeb8   : > { %2091 = vmatpush3.bf16.msra.mxu0 %v2394_v8 }
 0xf7e   : > { %v1322_v39 = vpop.f32.mrb[36].mxu0  ;;  %v1362_v40 = vpop.f32.mrb[36].mxu1 }
 0xf7f   : > { %v1323_v41 = vadd.f32 %v2371_v3, %v1322_v39  ;;  %v1363_v1 = vadd.f32 %v1362_v40, %v2421_v23  ;;  %v2062_v42 = vpop.f32.mrb[37].mxu0  ;;  %v2070_v43 = vpop.f32.mrb[37].mxu1 }
 0xf80   : > { %v1325_v44 = vpop.f32.mrb[38].mxu0  ;;  %v1365_v45 = vpop.f32.mrb[38].mxu1 }
 0xf81   : > { %v1408_v6 = vadd.f32 %v1323_v41, %v1282_v38  ;;  %v2063_v46 = vpop.f32.mrb[39].mxu0  ;;  %1416 = vrot.lane.b32.xlu1 %v1363_v1, %s2278_s9  ;;  %v2071_v49 = vpop.f32.mrb[39].mxu1 }
 0xf83   : > { %v1825_v50 = vmul.f32 -1.442695, %v1408_v6 }
 0xf85   : > { %2213 = vpow2.f32 %v1825_v50 }
 0xf86   : > { %v1402_v8 = vpop.f32.mrb[40].mxu0 }
 0xf87   : > { %v2078_v51 = vpop.f32.mrb[41].mxu0  ;;  %v1403_v56 = vadd.f32 %v1402_v8, %v2419_v20 }
 0xf88   : > { %v1405_v52 = vpop.f32.mrb[42].mxu0 }
 0xf89   : > { %v2079_v53 = vpop.f32.mrb[43].mxu0 }
 0xf8f   : > { %v2214_v54 = vpop.eup %2213 }
 0xf90   : > { %v1412_v55 = vadd.f32 1.0, %v2214_v54 }
 0xf92   : > { %2215 = vrcp.f32 %v1412_v55 }
 0xf9c   : > { %v2216_v57 = vpop.eup %2215 }
 0xf9d   : > { %v1426_v58 = vmul.f32 %v2216_v57, %v1403_v56 }
 0xf9f   : > { %1428 = vrot.lane.b32.xlu0 %v1426_v58, %s2273_s25 }
 0xff3   : > { %v1417_v63 = vpop.permute.xlu1 %1416 }
 0xff4   : > { %v1419_v4 = vadd.f32 %v1417_v63, %v1282_v38 }
 0xff6   : > { %v1826_v9 = vmul.f32 -1.442695, %v1419_v4 }
0x1011   : > { %v1429_v59 = vpop.permute.xlu0 %1428 }
0x1012   : > { %v1431_v61 = vadd.f32 %v1429_v59, %v1282_v38 }
0x1014   : > { %2217 = vtanh.f32 %v1431_v61 }
0x1015   : > { %2219 = vpow2.f32 %v1826_v9 }
0x101e   : > { %v2218_v62 = vpop.eup %2217 }
0x101f   : > { %1435 = vrot.lane.b32.xlu0 %v2218_v62, %s2276_s28  ;;  %v2220_v10 = vpop.eup %2219 }
0x1020   : > { %v1423_v11 = vadd.f32 1.0, %v2220_v10 }
0x1022   : > { %2221 = vrcp.f32 %v1423_v11 }
0x102c   : > { %v2222_v12 = vpop.eup %2221 }
0x102d   : > { %v1433_v13 = vsub.f32 1.0, %v2222_v12  ;;  %v1439_v16 = vmul.f32 %v2222_v12, %v2613_v35 }
0x1091   : > { %v1436_v14 = vpop.permute.xlu0 %1435 }
0x1092   : > { %v1438_v15 = vmul.f32 %v1436_v14, %v1433_v13 }
0x1094   : > { %v2649_v18 = vadd.f32 %v1439_v16, %v1438_v15 }
0x1096   : > { %v1441_v19 = vpack.c.bf16 %v2649_v18, %v2649_v18 }
0x1098   : > { %1458 = vrot.lane.b32.xlu1 %v1441_v19, %s2276_s28 }
0x110a   : > { %v1459_v21 = vpop.permute.xlu1 %1458 }
0x110b   : > { %2085 = vmatmul.mubr.msk.bf16.vlgmr.msra.gmra.mrb[40].mxu1 %vm216_vm1, %v1459_v21  ;;  %2093 = vmatmul.mubr.msk.bf16.vlgmr.msra.gmra.mrb[44].mxu0 %vm216_vm1, %v1459_v21 }
0x110c   : > { %2097 = vmatpush3.bf16.msra.mxu1 %v2382_v5  ;;  %2100 = vmatprep.mubr.msk.bf16.mxu1 %vm2275_vm0, %v2274_v2 }
0x110d   : > { %2098 = vmatprep.subr.bf16.mxu1 %v2274_v2  ;;  %v2665_v2 = vsub.s32 %v395_v27, %v397_v28 }
0x110f   : > { %v399_v41 = vrot.slane %v2432_v48, %v2665_v2  ;;  %v749_v1 = vrot.slane %v2506_v17, %v2665_v2  ;;  %v1099_v44 = vrot.slane %v2580_v47, %v2665_v2  ;;  %v1449_v48 = vrot.slane %v1441_v19, %v2665_v2 }
0x1110   : > { %2099 = vmatpush3.bf16.msra.mxu1 %v2389_v7  ;;  %v574_v55 = vrot.slane %v2469_v33, %v2665_v2  ;;  %v924_v56 = vrot.slane %v2543_v60, %v2665_v2  ;;  %v1274_v57 = vrot.slane %v2617_v36, %v2665_v2 }
0x1113   : > { %2101 = vmatmul.mubr.msk.bf16.vlgmr.msra.gmra.mrb[44].mxu1 %vm216_vm1, %v1459_v21 }
0x11de   : > { %v1497_v30 = vpop.f32.mrb[40].mxu1  ;;  %v1537_v31 = vpop.f32.mrb[44].mxu0 }
0x11df   : > { %v1498_v5 = vadd.f32 %v2371_v3, %v1497_v30  ;;  %v1538_v32 = vadd.f32 %v1537_v31, %v2421_v23  ;;  %v2086_v34 = vpop.f32.mrb[41].mxu1  ;;  %v2094_v35 = vpop.f32.mrb[45].mxu0 }
0x11e0   : > { %v1500_v7 = vpop.f32.mrb[42].mxu1  ;;  %v1540_v37 = vpop.f32.mrb[46].mxu0 }
0x11e1   : > { %v1583_v0 = vadd.f32 %v1498_v5, %v1457_v29  ;;  %1591 = vrot.lane.b32.xlu1 %v1538_v32, %s2278_s9  ;;  %v2087_v38 = vpop.f32.mrb[43].mxu1  ;;  %v2095_v39 = vpop.f32.mrb[47].mxu0 }
0x11e3   : > { %v1832_v40 = vmul.f32 -1.442695, %v1583_v0 }
0x11e5   : > { %2223 = vpow2.f32 %v1832_v40  ;;  %400 = vrot.lane.b32.xlu1 %v399_v41, %s2276_s28 }
0x11e6   : > { %v1577_v3 = vpop.f32.mrb[44].mxu1 }
0x11e7   : > { %v2102_v23 = vpop.f32.mrb[45].mxu1  ;;  %v1578_v46 = vadd.f32 %v1577_v3, %v2419_v20 }
0x11e8   : > { %v1580_v42 = vpop.f32.mrb[46].mxu1 }
0x11e9   : > { %v2103_v43 = vpop.f32.mrb[47].mxu1  ;;  %750 = vrot.lane.b32.xlu1 %v749_v1, %s2276_s28 }
0x11ed   : > { %1100 = vrot.lane.b32.xlu1 %v1099_v44, %s2276_s28 }
0x11ef   : > { %v2224_v45 = vpop.eup %2223 }
0x11f0   : > { %v1587_v6 = vadd.f32 1.0, %v2224_v45 }
0x11f1   : > { %1450 = vrot.lane.b32.xlu1 %v1449_v48, %s2276_s28 }
0x11f2   : > { %2225 = vrcp.f32 %v1587_v6 }
0x11fc   : > { %v2226_v49 = vpop.eup %2225 }
0x11fd   : > { %v1601_v17 = vmul.f32 %v2226_v49, %v1578_v46 }
0x11ff   : > { %1603 = vrot.lane.b32.xlu0 %v1601_v17, %s2273_s25 }
0x1253   : > { %v1592_v50 = vpop.permute.xlu1 %1591 }
0x1254   : > { %v1594_v58 = vadd.f32 %v1592_v50, %v1457_v29 }
0x1256   : > { %v1833_v59 = vmul.f32 -1.442695, %v1594_v58 }
0x1257   : > { %v401_v47 = vpop.permute.xlu1 %400 }
0x1258   : > { %404 = vst.msk [vmem:[%s2682_s17] sm:$0x3] %vm403_vm2, %v401_v47 }
0x125b   : > { %v751_v8 = vpop.permute.xlu1 %750 }
0x125c   : > { %1799 = vst.msk [vmem:[%s2682_s17 + $0x4] sm:$0x3] %vm403_vm2, %v751_v8 }
0x125f   : > { %v1101_v20 = vpop.permute.xlu1 %1100  ;;  %v1655_v16 = vld [vmem:[%s2682_s17] sm:$0x3] (%p2332_p3) }
0x1260   : > { %1813 = vst.msk [vmem:[%s2682_s17 + $0x8] sm:$0x3] %vm403_vm2, %v1101_v20  ;;  %1656 = vst [vmem:[%s1639_s23] sm:$0x3] (%p2332_p3), %v1655_v16 }
0x1263   : > { %v1451_v51 = vpop.permute.xlu1 %1450  ;;  %v1659_v19 = vld [vmem:[%s2682_s17 + $0x4] sm:$0x3] (%p2332_p3) }
0x1264   : > { %1827 = vst.msk [vmem:[%s2682_s17 + $0xc] sm:$0x3] %vm403_vm2, %v1451_v51  ;;  %1660 = vst [vmem:[%s1639_s23 + $0x8] sm:$0x3] (%p2332_p3), %v1659_v19 }
0x1267   : > { %v1663_v22 = vld [vmem:[%s2682_s17 + $0x8] sm:$0x3] (%p2332_p3) }
0x1268   : > { %1664 = vst [vmem:[%s1639_s23 + $0x10] sm:$0x3] (%p2332_p3), %v1663_v22 }
0x126b   : > { %v1667_v25 = vld [vmem:[%s2682_s17 + $0xc] sm:$0x3] (%p2332_p3) }
0x126c   : > { %1668 = vst [vmem:[%s1639_s23 + $0x18] sm:$0x3] (%p2332_p3), %v1667_v25 }
0x1271   : > { %v1604_v52 = vpop.permute.xlu0 %1603 }
0x1272   : > { %v1606_v53 = vadd.f32 %v1604_v52, %v1457_v29 }
0x1274   : > { %2227 = vtanh.f32 %v1606_v53 }
0x1275   : > { %2229 = vpow2.f32 %v1833_v59 }
0x127e   : > { %v2228_v54 = vpop.eup %2227 }
0x127f   : > { %1610 = vrot.lane.b32.xlu0 %v2228_v54, %s2276_s28  ;;  %v2230_v61 = vpop.eup %2229 }
0x1280   : > { %v1598_v62 = vadd.f32 1.0, %v2230_v61 }
0x1282   : > { %2231 = vrcp.f32 %v1598_v62 }
0x1283   : > { %575 = vrot.lane.b32.xlu0 %v574_v55, %s2276_s28 }
0x1287   : > { %925 = vrot.lane.b32.xlu0 %v924_v56, %s2276_s28 }
0x128b   : > { %1275 = vrot.lane.b32.xlu0 %v1274_v57, %s2276_s28 }
0x128c   : > { %v2232_v33 = vpop.eup %2231 }
0x128d   : > { %v1608_v63 = vsub.f32 1.0, %v2232_v33  ;;  %v1614_v4 = vmul.f32 %v2232_v33, %v2649_v18 }
0x12f1   : > { %v1611_v60 = vpop.permute.xlu0 %1610 }
0x12f2   : > { %v1613_v9 = vmul.f32 %v1611_v60, %v1608_v63 }
0x12f4   : > { %v1615_v10 = vadd.f32 %v1614_v4, %v1613_v9 }
0x12f5   : > { %v576_v36 = vpop.permute.xlu0 %575 }
0x12f6   : > { %v1616_v11 = vpack.c.bf16 %v1615_v10, %v1615_v10  ;;  %1792 = vst.msk [vmem:[%s2682_s17 + $0x2] sm:$0x3] %vm403_vm2, %v576_v36 }
0x12f8   : > { %v1624_v12 = vrot.slane %v1616_v11, %v2665_v2 }
0x12f9   : > { %v926_v13 = vpop.permute.xlu0 %925 }
0x12fa   : > { %1806 = vst.msk [vmem:[%s2682_s17 + $0x6] sm:$0x3] %vm403_vm2, %v926_v13  ;;  %1625 = vrot.lane.b32.xlu0 %v1624_v12, %s2276_s28 }
0x12fd   : > { %v1276_v14 = vpop.permute.xlu0 %1275  ;;  %v1657_v18 = vld [vmem:[%s2682_s17 + $0x2] sm:$0x3] (%p2332_p3) }
0x12fe   : > { %1820 = vst.msk [vmem:[%s2682_s17 + $0xa] sm:$0x3] %vm403_vm2, %v1276_v14  ;;  %1658 = vst [vmem:[%s1639_s23 + $0x4] sm:$0x3] (%p2332_p3), %v1657_v18 }
0x1301   : > { %v1661_v21 = vld [vmem:[%s2682_s17 + $0x6] sm:$0x3] (%p2332_p3) }
0x1302   : > { %1662 = vst [vmem:[%s1639_s23 + $0xc] sm:$0x3] (%p2332_p3), %v1661_v21 }
0x1305   : > { %v1665_v24 = vld [vmem:[%s2682_s17 + $0xa] sm:$0x3] (%p2332_p3) }
0x1306   : > { %1666 = vst [vmem:[%s1639_s23 + $0x14] sm:$0x3] (%p2332_p3), %v1665_v24 }
0x1367   : > { %1636 = sbr.rel (!%p2332_p3) target bundleno = 4982 (0x1376), region = 36 }
0x136c   : > { %v1626_v15 = vpop.permute.xlu0 %1625 }
0x136d   : > { %1834 = vst.msk [vmem:[%s2682_s17 + $0xe] sm:$0x3] %vm403_vm2, %v1626_v15 }
0x1374   : > { %v1669_v26 = vld [vmem:[%s2682_s17 + $0xe] sm:$0x3] }
0x1375   : > { %1670 = vst [vmem:[%s1639_s23 + $0x1c] sm:$0x3] %v1669_v26 }
0x1376 PF: > { %s13_s16 = sadd.s32 1, %s2271_s16   ;;  %s2747_s12 = smov %s2259_s13 }
0x1377   : > { %p10_p9 = scmp.ge.s32.totalorder %s13_s16, 4   ;;  %s2748_s13 = smov %s2341_s22 }
0x1378   : > { %s2749_s14 = smov %s2267_s15  ;;  %s2750_s15 = smov %s2752_s18 }
0x1379   :  { %12 = sbr.rel (!%p10_p9) target bundleno = 3 (0x3), region = 117 }

// kernel: temporal_block_forward.6
= control target key start
LH: loop header
LB: loop body
LE: loop exit
PB: predicated region body
PF: predicated region fallthrough
CT: control target
= control target key end

     0   :  { %s3300_s21 = smov 0   ;;  %s3302_s22 = smov 0   ;;  %s3690_s0 = inlined_call_operand.vmem [shape: f32[2,8,4,32], index: 0, kind: input, shape index: {}]   ;;  %s3691_s1 = inlined_call_operand.vmem [shape: f32[8,32], index: 1, kind: input, shape index: {}]   ;;  %s3692_s2 = inlined_call_operand.vmem [shape: bf16[32,96], index: 2, kind: input, shape index: {}]   ;;  %s3693_s3 = inlined_call_operand.vmem [shape: bf16[4,8,32], index: 3, kind: input, shape index: {}]   ;;  %s3694_s4 = inlined_call_operand.vmem [shape: f32[1,96], index: 4, kind: input, shape index: {}]   ;;  %s3695_s5 = inlined_call_operand.vmem [shape: f32[1,32], index: 5, kind: input, shape index: {}]   ;;  %s3696_s6 = inlined_call_operand.vmem [shape: bf16[2,8,4,32], index: 6, kind: output, shape index: {}]  }
   0x1   :  { %s3304_s23 = smov 0  }
   0x2 LB: > { %s28_s24 = sadd.s32 1, %s3243_s22  ;;  %p2740_p0 = scmp.ge.s32.totalorder %s3247_s23, 1  ;;  %s3247_s23 = sphi %s3304_s23, %s16_s23   ;;  %s3243_s22 = sphi %s3302_s22, %s3698_s22   ;;  %s3239_s21 = sphi %s3300_s21, %s3697_s21  }
   0x3   : > { %p30_p1 = scmp.ge.s32.totalorder %s28_s24, 2  ;;  %p231_p2 = scmp.lt.s32.totalorder %s3247_s23, 3 }
   0x5   : > { %s3700_s24 = smov (%p30_p1, %s28_s24), 0  ;;  %p232_p3 = pnand %p2740_p0, %p231_p2 }
   0x6   : > { %v3158_v0 = vld [vmem:[%s3692_s2] sm:$0xff] (!%p232_p3)   ;;  %p267_p4 = scmp.lt.s32.totalorder (!%p232_p3), %s3239_s21, 1  ;;  %v298_v1 = vlaneseq (!%p232_p3)  ;;  %v3159_v2 = vld [vmem:[%s3692_s2 + $0x8] sm:$0xff] (!%p232_p3)   ;;  %v3249_v4 = vmov (!%p232_p3), 1966171168   ;;  %vm484_vm0 = vcmask (!%p232_p3), 261120  }
   0x7   : > { %235 = sbr.rel (%p232_p3) target bundleno = 3485 (0xd9d), region = 44  ;;  %2878 = vmatprep.subr.bf16.mxu0 (!%p232_p3), %v3158_v0  ;;  %v292_v3 = vld [vmem:[%s3691_s1] sm:$0xff] (!%p232_p3)  ;;  %v296_v5 = vunpack.c.l.s4 (!%p232_p3), %v3249_v4  ;;  %v3250_v9 = vmov (!%p232_p3), 1983009808   ;;  %v3251_v31 = vmov (!%p232_p3), 1934713408  }
   0x8   : > { %2879 = vmatpush3.bf16.msra.mxu0 (!%p232_p3), %v3158_v0  ;;  %v299_v6 = vshrl.u32 (!%p232_p3), %v298_v1, 7  ;;  %v294_v7 = vcombine.high (!%p232_p3), %v292_v3, %v292_v3  ;;  %v393_v10 = vunpack.c.l.s4 (!%p232_p3), %v3250_v9  ;;  %v426_v32 = vunpack.c.l.s4 (!%p232_p3), %v3251_v31  ;;  %s3254_s13 = smov (!%p232_p3), 96   ;;  %s3255_s14 = smov (!%p232_p3), 64  }
   0x9   : > { %2880 = vmatprep.subr.bf16.mxu0 (!%p232_p3), %v3159_v2  ;;  %v297_v8 = vunpack.c.0.s8 (!%p232_p3), %v296_v5  ;;  %vm3253_vm1 = vmmov (!%p232_p3), 0   ;;  %vm547_vm2 = vcmask (!%p232_p3), 64512   ;;  %vm794_vm3 = vcmask (!%p232_p3), 1043456   ;;  %s3256_s15 = smov (!%p232_p3), 88   ;;  %s3257_s16 = smov (!%p232_p3), 120  }
   0xa   : > { %v345_v14 = vsub.s32 (!%p232_p3), 0, %v299_v6  ;;  %v394_v15 = vunpack.c.0.s8 (!%p232_p3), %v393_v10  ;;  %v427_v54 = vunpack.c.0.s8 (!%p232_p3), %v426_v32  ;;  %s3258_s17 = smov (!%p232_p3), 56   ;;  %s3259_s18 = smov (!%p232_p3), 112   ;;  %vm2644_vm4 = vcmask (!%p232_p3), 254976  }
   0xb   : > { %v300_v11 = vsub.s32 (!%p232_p3), %v297_v8, %v299_v6  ;;  %s3260_s19 = smov (!%p232_p3), 80   ;;  %s3261_s28 = smov (!%p232_p3), 48  }
   0xc   : > { %2881 = vmatpush3.bf16.msra.mxu0 (!%p232_p3), %v3159_v2  ;;  %v3333_v30 = vsub.s32 (!%p232_p3), %v394_v15, %v299_v6  ;;  %v3339_v62 = vsub.s32 (!%p232_p3), %v427_v54, %v299_v6  ;;  %s3262_s29 = smov (!%p232_p3), 72   ;;  %s3263_s30 = smov (!%p232_p3), 104  }
   0xd   : > { %v301_v12 = vrot.slane (!%p232_p3), %v292_v3, %v300_v11  ;;  %v308_v13 = vrot.slane (!%p232_p3), %v294_v7, %v300_v11  ;;  %s3264_s9 = smov (!%p232_p3), 40  }
   0xe   : > { %s3702_s21 = smov (!%p267_p4, %s3239_s21), 1 }
   0xf   : > { %s2796_s7 = sshll.u32 %s3702_s21, 5  ;;  %v309_v16 = vcombine.high %v301_v12, %v301_v12  ;;  %v310_v17 = vcombine.high %v308_v13, %v308_v13  ;;  %v317_v18 = vrot.slane %v301_v12, %v300_v11  ;;  %v324_v19 = vrot.slane %v308_v13, %v300_v11 }
  0x10   : > { %s274_s10 = scalar_lea.vmem %s3690_s0, %s2796_s7  ;;  %v3252_v13 = vmov 0.0  }
  0x11   : > { %v284_v20 = vld [vmem:[%s274_s10] sm:$0xf]  ;;  %v288_v21 = vld [vmem:[%s274_s10 + $0x10] sm:$0xf]  ;;  %v331_v22 = vrot.slane %v309_v16, %v300_v11  ;;  %v338_v23 = vrot.slane %v310_v17, %v300_v11  ;;  %v339_v24 = vcombine.high %v317_v18, %v317_v18  ;;  %v340_v25 = vcombine.high %v324_v19, %v324_v19  ;;  %v285_v26 = vld [vmem:[%s274_s10 + $0x4] sm:$0xf]  ;;  %2886 = vmatprep.subr.bf16.mxu1 %v3252_v13 }
  0x12   : > { %v286_v27 = vld [vmem:[%s274_s10 + $0x8] sm:$0xf]  ;;  %v346_v28 = vrot.slane %v317_v18, %v345_v14  ;;  %v362_v29 = vrot.slane %v324_v19, %v345_v14  ;;  %v289_v33 = vld [vmem:[%s274_s10 + $0x14] sm:$0xf]  ;;  %v290_v34 = vld [vmem:[%s274_s10 + $0x18] sm:$0xf]  ;;  %2892 = vmatprep.subr.bf16.mxu0 %v3252_v13  ;;  %2888 = vmatprep.mubr.msk.bf16.mxu1 %vm3253_vm1, %v3252_v13 }
  0x13   : > { %v341_v35 = vcombine.high %v331_v22, %v331_v22  ;;  %v342_v36 = vcombine.high %v338_v23, %v338_v23  ;;  %v350_v37 = vrot.slane %v331_v22, %v345_v14  ;;  %v354_v38 = vrot.slane %v339_v24, %v345_v14  ;;  %v287_v39 = vld [vmem:[%s274_s10 + $0xc] sm:$0xf]  ;;  %v291_v40 = vld [vmem:[%s274_s10 + $0x1c] sm:$0xf] }
  0x14   : > { %v366_v41 = vrot.slane %v338_v23, %v345_v14  ;;  %v370_v42 = vrot.slane %v340_v25, %v345_v14  ;;  %v383_v43 = vadd.f32 %v346_v28, %v284_v20  ;;  %v387_v44 = vadd.f32 %v362_v29, %v288_v21 }
  0x15   : > { %v358_v45 = vrot.slane %v341_v35, %v345_v14  ;;  %v374_v46 = vrot.slane %v342_v36, %v345_v14  ;;  %v384_v47 = vadd.f32 %v350_v37, %v285_v26  ;;  %v385_v48 = vadd.f32 %v354_v38, %v286_v27  ;;  %v2745_v14 = vld [vmem:[%s3694_s4] ss:$0 sm:$0xff] }
  0x16   : > { %v388_v49 = vadd.f32 %v366_v41, %v289_v33  ;;  %v389_v50 = vadd.f32 %v370_v42, %v290_v34 }
  0x17   : > { %v386_v51 = vadd.f32 %v358_v45, %v287_v39  ;;  %v390_v52 = vadd.f32 %v374_v46, %v291_v40  ;;  %v391_v53 = vcombine.low %v383_v43, %v385_v48 }
  0x18   : > { %v407_v55 = vcombine.low %v387_v44, %v389_v50 }
  0x19   : > { %v398_v56 = vrot.slane %v391_v53, %v3333_v30  ;;  %v399_v57 = vcombine.low %v384_v47, %v386_v51  ;;  %v415_v58 = vcombine.low %v388_v49, %v390_v52 }
  0x1a   : > { %v414_v59 = vrot.slane %v407_v55, %v3333_v30 }
  0x1b   : > { %v406_v60 = vrot.slane %v399_v57, %v3333_v30  ;;  %v422_v61 = vrot.slane %v415_v58, %v3333_v30 }
  0x1d   : > { %v423_v63 = vcombine.low %v398_v56, %v406_v60  ;;  %v424_v0 = vcombine.high %v398_v56, %v406_v60  ;;  %v439_v1 = vcombine.low %v414_v59, %v422_v61  ;;  %v440_v2 = vcombine.high %v414_v59, %v422_v61 }
  0x1f   : > { %v431_v3 = vrot.slane %v423_v63, %v3339_v62  ;;  %v447_v4 = vrot.slane %v439_v1, %v3339_v62  ;;  %v438_v5 = vrot.slane %v424_v0, %v3339_v62  ;;  %v454_v7 = vrot.slane %v440_v2, %v3339_v62 }
  0x21   : > { %v455_v8 = vcombine.low %v431_v3, %v447_v4  ;;  %v456_v9 = vcombine.high %v431_v3, %v447_v4  ;;  %v457_v10 = vcombine.low %v438_v5, %v454_v7  ;;  %v458_v11 = vcombine.high %v438_v5, %v454_v7 }
  0x23   : > { %v459_v12 = vpack.c.bf16 %v456_v9, %v455_v8  ;;  %v460_v6 = vpack.c.bf16 %v458_v11, %v457_v10 }
  0x25   : > { %2882 = vmatprep.mubr.msk.bf16.mxu0 %vm484_vm0, %v459_v12 }
  0x26   : > { %2883 = vmatmul.mubr.msk.bf16.vlgmr.msra.gmra.mrb[0].mxu0 %vm484_vm0, %v460_v6 }
  0x27   : > { %2894 = vmatprep.mubr.msk.bf16.mxu0 %vm3253_vm1, %v3252_v13 }
  0xf9   : > { %v2884_v15 = vpop.f32.mrb[0].mxu0 }
  0xfa   : > { %v534_v16 = vadd.f32 %v2884_v15, %v2745_v14  ;;  %v525_v17 = vpop.f32.mrb[1].mxu0 }
  0xfb   : > { %v526_v18 = vadd.f32 %v2745_v14, %v525_v17  ;;  %v2885_v19 = vpop.f32.mrb[2].mxu0 }
  0xfc   : > { %v3354_v20 = vpack.c.bf16 %v534_v16, %v534_v16  ;;  %v537_v21 = vadd.f32 %v2885_v19, %v2745_v14  ;;  %v528_v22 = vpop.f32.mrb[3].mxu0 }
  0xfd   : > { %v3356_v23 = vpack.c.bf16 %v526_v18, %v526_v18  ;;  %v529_v24 = vadd.f32 %v2745_v14, %v528_v22 }
  0xfe   : > { %644 = vrot.lane.b32.xlu1 %v3354_v20, %s3254_s13  ;;  %v3360_v25 = vpack.c.bf16 %v537_v21, %v537_v21 }
  0xff   : > { %545 = vrot.lane.b32.xlu0 %v3356_v23, %s3254_s13  ;;  %v3362_v26 = vpack.c.bf16 %v529_v24, %v529_v24 }
 0x102   : > { %693 = vrot.lane.b32.xlu1 %v3360_v25, %s3254_s13 }
 0x103   : > { %595 = vrot.lane.b32.xlu0 %v3362_v26, %s3254_s13 }
 0x170   : > { %v645_v29 = vpop.permute.xlu1 %644 }
 0x171   : > { %v546_v27 = vpop.permute.xlu0 %545  ;;  %v650_v33 = vsel %vm547_vm2, %v645_v29, 0 }
 0x172   : > { %v552_v28 = vsel %vm547_vm2, %v546_v27, 0 }
 0x173   : > { %2887 = vmatpush3.bf16.xpose.msra.mxu1 %v552_v28 }
 0x174   : > { %2898 = vmatprep.subr.bf16.mxu1 %v3252_v13  ;;  %v694_v34 = vpop.permute.xlu1 %693 }
 0x175   : > { %v596_v31 = vpop.permute.xlu0 %595  ;;  %v699_v35 = vsel %vm547_vm2, %v694_v34, 0 }
 0x176   : > { %v601_v32 = vsel %vm547_vm2, %v596_v31, 0 }
 0x177   : > { %2893 = vmatpush3.bf16.xpose.msra.mxu0 %v601_v32 }
 0x178   : > { %2904 = vmatprep.subr.bf16.mxu0 %v3252_v13 }
 0x17a   : > { %2889 = vmatmul.mubr.msk.bf16.vlgmr.msra.gmra.mrb[0].mxu1 %vm547_vm2, %v3356_v23 }
 0x17b   : > { %2899 = vmatpush3.bf16.xpose.msra.mxu1 %v650_v33  ;;  %2900 = vmatprep.mubr.msk.bf16.mxu1 %vm3253_vm1, %v3252_v13 }
 0x17c   : > { %2910 = vmatprep.subr.bf16.mxu1 %v3252_v13 }
 0x17e   : > { %2895 = vmatmul.mubr.msk.bf16.vlgmr.msra.gmra.mrb[4].mxu0 %vm547_vm2, %v3362_v26 }
 0x17f   : > { %2905 = vmatpush3.bf16.xpose.msra.mxu0 %v699_v35  ;;  %2906 = vmatprep.mubr.msk.bf16.mxu0 %vm3253_vm1, %v3252_v13 }
 0x180   : > { %2916 = vmatprep.subr.bf16.mxu0 %v3252_v13 }
 0x182   : > { %2901 = vmatmul.mubr.msk.bf16.vlgmr.msra.gmra.mrb[4].mxu1 %vm547_vm2, %v3354_v20 }
 0x183   : > { %2912 = vmatprep.mubr.msk.bf16.mxu1 %vm3253_vm1, %v3252_v13 }
 0x186   : > { %2907 = vmatmul.mubr.msk.bf16.vlgmr.msra.gmra.mrb[8].mxu0 %vm547_vm2, %v3360_v25 }
 0x187   : > { %2918 = vmatprep.mubr.msk.bf16.mxu0 %vm3253_vm1, %v3252_v13 }
 0x24d   : > { %v588_v36 = vpop.f32.mrb[0].mxu1 }
 0x24e   : > { %v2890_v37 = vpop.f32.mrb[1].mxu1  ;;  %v741_v38 = vsel %vm547_vm2, %v588_v36, -inf }
 0x24f   : > { %742 = vmax.xlane.f32.xlu0 %v741_v38  ;;  %v591_v39 = vpop.f32.mrb[2].mxu1 }
 0x250   : > { %v2891_v40 = vpop.f32.mrb[3].mxu1 }
 0x251   : > { %v637_v41 = vpop.f32.mrb[4].mxu0 }
 0x252   : > { %v2896_v42 = vpop.f32.mrb[5].mxu0  ;;  %v744_v43 = vsel %vm547_vm2, %v637_v41, -inf }
 0x253   : > { %745 = vmax.xlane.f32.xlu1 %v744_v43  ;;  %v640_v44 = vpop.f32.mrb[6].mxu0 }
 0x254   : > { %v2897_v45 = vpop.f32.mrb[7].mxu0 }
 0x255   : > { %v686_v46 = vpop.f32.mrb[4].mxu1 }
 0x256   : > { %v2902_v47 = vpop.f32.mrb[5].mxu1  ;;  %v747_v48 = vsel %vm547_vm2, %v686_v46, -inf }
 0x257   : > { %748 = vmax.xlane.f32.xlu0 %v747_v48  ;;  %v689_v49 = vpop.f32.mrb[6].mxu1 }
 0x258   : > { %v2903_v50 = vpop.f32.mrb[7].mxu1 }
 0x259   : > { %v735_v51 = vpop.f32.mrb[8].mxu0 }
 0x25a   : > { %v2908_v52 = vpop.f32.mrb[9].mxu0  ;;  %v750_v53 = vsel %vm547_vm2, %v735_v51, -inf }
 0x25b   : > { %751 = vmax.xlane.f32.xlu0 %v750_v53  ;;  %v738_v54 = vpop.f32.mrb[10].mxu0 }
 0x25c   : > { %v2909_v55 = vpop.f32.mrb[11].mxu0 }
 0x264   : > { %789 = vrot.lane.b32.xlu1 %v3356_v23, %s3255_s14 }
 0x2dc   : > { %v743_v56 = vpop.xlane.xlu0 %742 }
 0x2dd   : > { %v753_v57 = vsub.f32 %v588_v36, %v743_v56 }
 0x2df   : > { %v757_v58 = vmul.f32 1.442695, %v753_v57 }
 0x2e0   : > { %v746_v59 = vpop.xlane.xlu1 %745 }
 0x2e1   : > { %3161 = vpow2.f32 %v757_v58  ;;  %v754_v60 = vsub.f32 %v637_v41, %v746_v59 }
 0x2e3   : > { %v759_v61 = vmul.f32 1.442695, %v754_v60 }
 0x2e4   : > { %v790_v63 = vpop.permute.xlu1 %789  ;;  %v749_v5 = vpop.xlane.xlu0 %748 }
 0x2e5   : > { %3163 = vpow2.f32 %v759_v61  ;;  %v796_v0 = vsel %vm794_vm3, %v790_v63, 0  ;;  %v755_v8 = vsub.f32 %v686_v46, %v749_v5 }
 0x2e6   : > { %2911 = vmatpush3.bf16.msra.mxu1 %v796_v0 }
 0x2e7   : > { %2922 = vmatprep.subr.bf16.mxu1 %v3252_v13  ;;  %v761_v10 = vmul.f32 1.442695, %v755_v8 }
 0x2e8   : > { %v752_v7 = vpop.xlane.xlu0 %751 }
 0x2e9   : > { %v756_v9 = vsub.f32 %v735_v51, %v752_v7  ;;  %3165 = vpow2.f32 %v761_v10 }
 0x2eb   : > { %v3162_v1 = vpop.eup %3161  ;;  %v763_v11 = vmul.f32 1.442695, %v756_v9 }
 0x2ec   : > { %v765_v2 = vsel %vm547_vm2, %v3162_v1, 0.0 }
 0x2ed   : > { %766 = vadd.xlane.f32.xlu1 %v765_v2  ;;  %3167 = vpow2.f32 %v763_v11 }
 0x2ef   : > { %v3164_v3 = vpop.eup %3163 }
 0x2f0   : > { %v768_v4 = vsel %vm547_vm2, %v3164_v3, 0.0 }
 0x2f1   : > { %769 = vadd.xlane.f32.xlu0 %v768_v4 }
 0x2f3   : > { %v3166_v12 = vpop.eup %3165 }
 0x2f4   : > { %v771_v14 = vsel %vm547_vm2, %v3166_v12, 0.0 }
 0x2f7   : > { %v3168_v6 = vpop.eup %3167 }
 0x2f8   : > { %v774_v15 = vsel %vm547_vm2, %v3168_v6, 0.0 }
 0x2fe   : > { %886 = vrot.lane.b32.xlu1 %v3354_v20, %s3255_s14 }
 0x302   : > { %934 = vrot.lane.b32.xlu1 %v3360_v25, %s3255_s14 }
 0x307   : > { %838 = vrot.lane.b32.xlu0 %v3362_v26, %s3255_s14  ;;  %s2797_s14 = sshll.u32 %s3702_s21, 4 }
 0x326   : > { %772 = vadd.xlane.f32.xlu1 %v771_v14  ;;  %775 = vadd.xlane.f32.xlu0 %v774_v15 }
 0x337   : > { %1037 = vrot.lane.b32.xlu1 %v3362_v26, %s3256_s15 }
 0x33b   : > { %1035 = vrot.lane.b32.xlu1 %v3362_v26, %s3257_s16 }
 0x33c   : > { %987 = vrot.lane.b32.xlu0 %v3356_v23, %s3256_s15 }
 0x33f   : > { %1137 = vrot.lane.b32.xlu1 %v3360_v25, %s3256_s15 }
 0x340   : > { %985 = vrot.lane.b32.xlu0 %v3356_v23, %s3257_s16 }
 0x343   : > { %1135 = vrot.lane.b32.xlu1 %v3360_v25, %s3257_s16 }
 0x344   : > { %1087 = vrot.lane.b32.xlu0 %v3354_v20, %s3256_s15 }
 0x348   : > { %1085 = vrot.lane.b32.xlu0 %v3354_v20, %s3257_s16 }
 0x37a   : > { %v767_v16 = vpop.xlane.xlu1 %766 }
 0x37b   : > { %3169 = vrcp.f32 %v767_v16 }
 0x37e   : > { %v770_v17 = vpop.xlane.xlu0 %769  ;;  %v887_v22 = vpop.permute.xlu1 %886 }
 0x37f   : > { %3171 = vrcp.f32 %v770_v17  ;;  %v892_v29 = vsel %vm794_vm3, %v887_v22, 0 }
 0x382   : > { %v839_v18 = vpop.permute.xlu0 %838  ;;  %v935_v32 = vpop.permute.xlu1 %934 }
 0x383   : > { %v844_v19 = vsel %vm794_vm3, %v839_v18, 0  ;;  %v940_v34 = vsel %vm794_vm3, %v935_v32, 0 }
 0x384   : > { %2917 = vmatpush3.bf16.msra.mxu0 %v844_v19 }
 0x385   : > { %v3170_v21 = vpop.eup %3169  ;;  %2928 = vmatprep.subr.bf16.mxu0 %v3252_v13 }
 0x386   : > { %v781_v24 = vmul.f32 %v3170_v21, %v3162_v1 }
 0x388   : > { %v785_v27 = vpack.c.bf16 %v781_v24, %v781_v24 }
 0x389   : > { %v3172_v28 = vpop.eup %3171 }
 0x38a   : > { %v782_v31 = vmul.f32 %v3172_v28, %v3164_v3  ;;  %2913 = vmatmul.mubr.msk.bf16.vlgmr.msra.gmra.mrb[8].mxu1 %vm547_vm2, %v785_v27 }
 0x38b   : > { %2923 = vmatpush3.bf16.msra.mxu1 %v892_v29  ;;  %2924 = vmatprep.mubr.msk.bf16.mxu1 %vm3253_vm1, %v3252_v13 }
 0x38c   : > { %v786_v33 = vpack.c.bf16 %v782_v31, %v782_v31  ;;  %2934 = vmatprep.subr.bf16.mxu1 %v3252_v13 }
 0x38e   : > { %2919 = vmatmul.mubr.msk.bf16.vlgmr.msra.gmra.mrb[12].mxu0 %vm547_vm2, %v786_v33 }
 0x38f   : > { %2929 = vmatpush3.bf16.msra.mxu0 %v940_v34  ;;  %2930 = vmatprep.mubr.msk.bf16.mxu0 %vm3253_vm1, %v3252_v13 }
 0x390   : > { %2940 = vmatprep.subr.bf16.mxu0 %v3252_v13 }
 0x3b3   : > { %v773_v35 = vpop.xlane.xlu1 %772  ;;  %v776_v36 = vpop.xlane.xlu0 %775 }
 0x3b4   : > { %3173 = vrcp.f32 %v773_v35 }
 0x3b5   : > { %3175 = vrcp.f32 %v776_v36 }
 0x3b7   : > { %v988_v37 = vpop.permute.xlu0 %987  ;;  %v1038_v38 = vpop.permute.xlu1 %1037 }
 0x3b8   : > { %v993_v46 = vsel %vm547_vm2, %v988_v37, 0  ;;  %v1043_v48 = vsel %vm547_vm2, %v1038_v38, 0 }
 0x3bb   : > { %v986_v44 = vpop.permute.xlu0 %985  ;;  %v1036_v47 = vpop.permute.xlu1 %1035 }
 0x3be   : > { %v3174_v39 = vpop.eup %3173 }
 0x3bf   : > { %v3176_v40 = vpop.eup %3175  ;;  %v783_v41 = vmul.f32 %v3174_v39, %v3166_v12  ;;  %v1088_v49 = vpop.permute.xlu0 %1087 }
 0x3c0   : > { %v784_v42 = vmul.f32 %v3176_v40, %v3168_v6  ;;  %v1138_v50 = vpop.permute.xlu1 %1137  ;;  %v1093_v51 = vsel %vm547_vm2, %v1088_v49, 0 }
 0x3c1   : > { %v787_v43 = vpack.c.bf16 %v783_v41, %v783_v41  ;;  %v1143_v52 = vsel %vm547_vm2, %v1138_v50, 0 }
 0x3c2   : > { %v788_v45 = vpack.c.bf16 %v784_v42, %v784_v42 }
 0x3c3   : > { %2925 = vmatmul.mubr.msk.bf16.vlgmr.msra.gmra.mrb[12].mxu1 %vm547_vm2, %v787_v43  ;;  %v1086_v53 = vpop.permute.xlu0 %1085 }
 0x3c4   : > { %2931 = vmatmul.mubr.msk.bf16.vlgmr.msra.gmra.mrb[16].mxu0 %vm547_vm2, %v788_v45  ;;  %2935 = vmatpush3.bf16.xpose.msra.mxu1 %v993_v46  ;;  %v1136_v54 = vpop.permute.xlu1 %1135 }
 0x3c5   : > { %2941 = vmatpush3.bf16.xpose.msra.mxu0 %v1043_v48  ;;  %2936 = vmatprep.mubr.msk.bf16.mxu1 %vm3253_vm1, %v3252_v13 }
 0x3c6   : > { %2942 = vmatprep.mubr.msk.bf16.mxu0 %vm3253_vm1, %v3252_v13  ;;  %2946 = vmatprep.subr.bf16.mxu1 %v3252_v13 }
 0x3c7   : > { %2952 = vmatprep.subr.bf16.mxu0 %v3252_v13 }
 0x3cb   : > { %2937 = vmatmul.mubr.msk.bf16.vlgmr.msra.gmra.mrb[16].mxu1 %vm547_vm2, %v986_v44 }
 0x3cc   : > { %2943 = vmatmul.mubr.msk.bf16.vlgmr.msra.gmra.mrb[20].mxu0 %vm547_vm2, %v1036_v47  ;;  %2947 = vmatpush3.bf16.xpose.msra.mxu1 %v1093_v51 }
 0x3cd   : > { %2953 = vmatpush3.bf16.xpose.msra.mxu0 %v1143_v52  ;;  %2948 = vmatprep.mubr.msk.bf16.mxu1 %vm3253_vm1, %v3252_v13 }
 0x3ce   : > { %2954 = vmatprep.mubr.msk.bf16.mxu0 %vm3253_vm1, %v3252_v13  ;;  %2958 = vmatprep.subr.bf16.mxu1 %v3252_v13 }
 0x3cf   : > { %2964 = vmatprep.subr.bf16.mxu0 %v3252_v13 }
 0x3d3   : > { %2949 = vmatmul.mubr.msk.bf16.vlgmr.msra.gmra.mrb[20].mxu1 %vm547_vm2, %v1086_v53 }
 0x3d4   : > { %2955 = vmatmul.mubr.msk.bf16.vlgmr.msra.gmra.mrb[24].mxu0 %vm547_vm2, %v1136_v54  ;;  %2960 = vmatprep.mubr.msk.bf16.mxu1 %vm3253_vm1, %v3252_v13 }
 0x3d5   : > { %2966 = vmatprep.mubr.msk.bf16.mxu0 %vm3253_vm1, %v3252_v13 }
 0x45d   : > { %v3450_v55 = vpop.f32.mrb[8].mxu1 }
 0x45e   : > { %v2914_v56 = vpop.f32.mrb[9].mxu1 }
 0x45f   : > { %v835_v57 = vpop.f32.mrb[10].mxu1 }
 0x460   : > { %v2915_v58 = vpop.f32.mrb[11].mxu1 }
 0x461   : > { %v3452_v59 = vpop.f32.mrb[12].mxu0 }
 0x462   : > { %v982_v60 = vpack.c.bf16 %v3452_v59, %v3450_v55  ;;  %v2920_v61 = vpop.f32.mrb[13].mxu0 }
 0x463   : > { %v883_v63 = vpop.f32.mrb[14].mxu0 }
 0x464   : > { %v2921_v0 = vpop.f32.mrb[15].mxu0 }
 0x496   : > { %v3456_v1 = vpop.f32.mrb[12].mxu1 }
 0x497   : > { %v3458_v2 = vpop.f32.mrb[16].mxu0  ;;  %v2926_v3 = vpop.f32.mrb[13].mxu1 }
 0x498   : > { %v983_v4 = vpack.c.bf16 %v3458_v2, %v3456_v1  ;;  %v2932_v5 = vpop.f32.mrb[17].mxu0  ;;  %v931_v7 = vpop.f32.mrb[14].mxu1 }
 0x499   : > { %v979_v8 = vpop.f32.mrb[18].mxu0  ;;  %v2927_v9 = vpop.f32.mrb[15].mxu1 }
 0x49a   : > { %v2933_v10 = vpop.f32.mrb[19].mxu0 }
 0x49e   : > { %v1029_v11 = vpop.f32.mrb[16].mxu1 }
 0x49f   : > { %v1079_v12 = vpop.f32.mrb[20].mxu0  ;;  %v2938_v6 = vpop.f32.mrb[17].mxu1  ;;  %v1185_v14 = vsel %vm547_vm2, %v1029_v11, -inf }
 0x4a0   : > { %v2944_v15 = vpop.f32.mrb[21].mxu0  ;;  %v1188_v16 = vsel %vm547_vm2, %v1079_v12, -inf  ;;  %1186 = vmax.xlane.f32.xlu0 %v1185_v14  ;;  %v1032_v17 = vpop.f32.mrb[18].mxu1 }
 0x4a1   : > { %1189 = vmax.xlane.f32.xlu1 %v1188_v16  ;;  %v1082_v18 = vpop.f32.mrb[22].mxu0  ;;  %v2939_v19 = vpop.f32.mrb[19].mxu1 }
 0x4a2   : > { %v2945_v21 = vpop.f32.mrb[23].mxu0 }
 0x4a6   : > { %v1129_v22 = vpop.f32.mrb[20].mxu1 }
 0x4a7   : > { %v1179_v24 = vpop.f32.mrb[24].mxu0  ;;  %v2950_v27 = vpop.f32.mrb[21].mxu1  ;;  %v1191_v28 = vsel %vm547_vm2, %v1129_v22, -inf }
 0x4a8   : > { %v2956_v29 = vpop.f32.mrb[25].mxu0  ;;  %1192 = vmax.xlane.f32.xlu0 %v1191_v28  ;;  %v1132_v31 = vpop.f32.mrb[22].mxu1  ;;  %v1194_v35 = vsel %vm547_vm2, %v1179_v24, -inf }
 0x4a9   : > { %v1182_v32 = vpop.f32.mrb[26].mxu0  ;;  %v2951_v33 = vpop.f32.mrb[23].mxu1 }
 0x4aa   : > { %v2957_v34 = vpop.f32.mrb[27].mxu0 }
 0x4ac   : > { %1195 = vmax.xlane.f32.xlu0 %v1194_v35 }
 0x4b2   : > { %1233 = vrot.lane.b32.xlu1 %v3356_v23, %s3258_s17 }
 0x52d   : > { %v1187_v36 = vpop.xlane.xlu0 %1186 }
 0x52e   : > { %v1190_v37 = vpop.xlane.xlu1 %1189  ;;  %v1197_v38 = vsub.f32 %v1029_v11, %v1187_v36 }
 0x52f   : > { %v1198_v39 = vsub.f32 %v1079_v12, %v1190_v37 }
 0x530   : > { %v1201_v40 = vmul.f32 1.442695, %v1197_v38  ;;  %v2766_v38 = vld [vmem:[%s3693_s3 + $0x4] sm:$0xf] }
 0x531   : > { %v1203_v41 = vmul.f32 1.442695, %v1198_v39  ;;  %v1436_v39 = vsel %vm794_vm3, %v2766_v38, 0 }
 0x532   : > { %3177 = vpow2.f32 %v1201_v40  ;;  %v1234_v42 = vpop.permute.xlu1 %1233  ;;  %v984_v40 = vld [vmem:[%s3693_s3] sm:$0xf] }
 0x533   : > { %3179 = vpow2.f32 %v1203_v41  ;;  %v1239_v43 = vsel %vm794_vm3, %v1234_v42, 0 }
 0x534   : > { %2959 = vmatpush3.bf16.msra.mxu1 %v1239_v43 }
 0x535   : > { %v1193_v44 = vpop.xlane.xlu0 %1192  ;;  %2970 = vmatprep.subr.bf16.mxu1 %v3252_v13 }
 0x536   : > { %v1199_v45 = vsub.f32 %v1129_v22, %v1193_v44 }
 0x538   : > { %v1205_v46 = vmul.f32 1.442695, %v1199_v45 }
 0x539   : > { %v1196_v47 = vpop.xlane.xlu0 %1195 }
 0x53a   : > { %3181 = vpow2.f32 %v1205_v46  ;;  %v1200_v48 = vsub.f32 %v1179_v24, %v1196_v47 }
 0x53c   : > { %v3178_v49 = vpop.eup %3177  ;;  %v1207_v50 = vmul.f32 1.442695, %v1200_v48 }
 0x53d   : > { %v3180_v51 = vpop.eup %3179  ;;  %v1209_v52 = vsel %vm547_vm2, %v3178_v49, 0.0 }
 0x53e   : > { %3183 = vpow2.f32 %v1207_v50  ;;  %v1212_v53 = vsel %vm547_vm2, %v3180_v51, 0.0  ;;  %1210 = vadd.xlane.f32.xlu1 %v1209_v52 }
 0x53f   : > { %1213 = vadd.xlane.f32.xlu0 %v1212_v53 }
 0x544   : > { %v3182_v54 = vpop.eup %3181 }
 0x545   : > { %v1215_v56 = vsel %vm547_vm2, %v3182_v54, 0.0 }
 0x546   : > { %1216 = vadd.xlane.f32.xlu1 %v1215_v56 }
 0x548   : > { %v3184_v57 = vpop.eup %3183 }
 0x549   : > { %v1218_v58 = vsel %vm547_vm2, %v3184_v57, 0.0 }
 0x54a   : > { %1219 = vadd.xlane.f32.xlu0 %v1218_v58  ;;  %v1494_v58 = vsel %vm794_vm3, %v984_v40, 0 }
 0x557   : > { %1329 = vrot.lane.b32.xlu1 %v3354_v20, %s3258_s17 }
 0x55b   : > { %1377 = vrot.lane.b32.xlu1 %v3360_v25, %s3258_s17 }
 0x55f   : > { %1545 = vrot.lane.b32.xlu1 %v3356_v23, %s3259_s18 }
 0x560   : > { %1281 = vrot.lane.b32.xlu0 %v3362_v26, %s3258_s17  ;;  %s282_s17 = scalar_lea.vmem %s3696_s6, %s2797_s14 }
 0x563   : > { %1595 = vrot.lane.b32.xlu1 %v3362_v26, %s3259_s18 }
 0x564   : > { %1547 = vrot.lane.b32.xlu0 %v3356_v23, %s3260_s19 }
 0x567   : > { %1697 = vrot.lane.b32.xlu1 %v3360_v25, %s3260_s19 }
 0x568   : > { %1597 = vrot.lane.b32.xlu0 %v3362_v26, %s3260_s19 }
 0x56b   : > { %1695 = vrot.lane.b32.xlu1 %v3360_v25, %s3259_s18 }
 0x56c   : > { %1647 = vrot.lane.b32.xlu0 %v3354_v20, %s3260_s19 }
 0x570   : > { %1645 = vrot.lane.b32.xlu0 %v3354_v20, %s3259_s18 }
 0x5cb   : > { %v1211_v61 = vpop.xlane.xlu1 %1210 }
 0x5cc   : > { %3185 = vrcp.f32 %v1211_v61  ;;  %v1214_v63 = vpop.xlane.xlu0 %1213 }
 0x5cd   : > { %3187 = vrcp.f32 %v1214_v63 }
 0x5d3   : > { %v1217_v0 = vpop.xlane.xlu1 %1216 }
 0x5d4   : > { %3189 = vrcp.f32 %v1217_v0 }
 0x5d6   : > { %v3186_v3 = vpop.eup %3185 }
 0x5d7   : > { %v3188_v5 = vpop.eup %3187  ;;  %v1225_v7 = vmul.f32 %v3186_v3, %v3178_v49  ;;  %v1330_v8 = vpop.permute.xlu1 %1329 }
 0x5d8   : > { %v1220_v9 = vpop.xlane.xlu0 %1219  ;;  %v1226_v11 = vmul.f32 %v3188_v5, %v3180_v51  ;;  %v1335_v12 = vsel %vm794_vm3, %v1330_v8, 0 }
 0x5d9   : > { %3191 = vrcp.f32 %v1220_v9  ;;  %v1229_v10 = vpack.c.bf16 %v1225_v7, %v1225_v7 }
 0x5da   : > { %v1230_v17 = vpack.c.bf16 %v1226_v11, %v1226_v11 }
 0x5db   : > { %2961 = vmatmul.mubr.msk.bf16.vlgmr.msra.gmra.mrb[24].mxu1 %vm547_vm2, %v1229_v10  ;;  %v1378_v15 = vpop.permute.xlu1 %1377 }
 0x5dc   : > { %v1282_v6 = vpop.permute.xlu0 %1281  ;;  %2971 = vmatpush3.bf16.msra.mxu1 %v1335_v12  ;;  %2972 = vmatprep.mubr.msk.bf16.mxu1 %vm3253_vm1, %v3252_v13  ;;  %v1383_v19 = vsel %vm794_vm3, %v1378_v15, 0 }
 0x5dd   : > { %v1287_v14 = vsel %vm794_vm3, %v1282_v6, 0  ;;  %3114 = vmatprep.subr.msk.bf16.mxu1 %vm794_vm3, %v2766_v38 }
 0x5de   : > { %2965 = vmatpush3.bf16.msra.mxu0 %v1287_v14  ;;  %v3190_v16 = vpop.eup %3189 }
 0x5df   : > { %2976 = vmatprep.subr.bf16.mxu0 %v3252_v13  ;;  %v1227_v18 = vmul.f32 %v3190_v16, %v3182_v54  ;;  %v1546_v31 = vpop.permute.xlu1 %1545 }
 0x5e0   : > { %v1548_v28 = vpop.permute.xlu0 %1547 }
 0x5e1   : > { %2967 = vmatmul.mubr.msk.bf16.vlgmr.msra.gmra.mrb[28].mxu0 %vm547_vm2, %v1230_v17  ;;  %v1231_v21 = vpack.c.bf16 %v1227_v18, %v1227_v18  ;;  %v1553_v29 = vsel %vm547_vm2, %v1548_v28, 0 }
 0x5e2   : > { %2977 = vmatpush3.bf16.msra.mxu0 %v1383_v19  ;;  %2978 = vmatprep.mubr.msk.bf16.mxu0 %vm3253_vm1, %v3252_v13 }
 0x5e3   : > { %v3192_v22 = vpop.eup %3191  ;;  %2994 = vmatprep.subr.bf16.mxu0 %v3252_v13  ;;  %2973 = vmatmul.mubr.msk.bf16.vlgmr.msra.gmra.mrb[28].mxu1 %vm547_vm2, %v1231_v21  ;;  %v1596_v33 = vpop.permute.xlu1 %1595 }
 0x5e4   : > { %v1228_v24 = vmul.f32 %v3192_v22, %v3184_v57  ;;  %v1598_v32 = vpop.permute.xlu0 %1597  ;;  %2983 = vmatpush3.bf16.msra.mxu1 %v1436_v39 }
 0x5e5   : > { %v1603_v34 = vsel %vm547_vm2, %v1598_v32, 0  ;;  %3115 = vmatprep.subr.msk.bf16.mxu1 %vm794_vm3, %v984_v40 }
 0x5e6   : > { %v1232_v27 = vpack.c.bf16 %v1228_v24, %v1228_v24 }
 0x5e7   : > { %v1698_v35 = vpop.permute.xlu1 %1697 }
 0x5e8   : > { %v1703_v36 = vsel %vm547_vm2, %v1698_v35, 0  ;;  %v1648_v8 = vpop.permute.xlu0 %1647 }
 0x5e9   : > { %2979 = vmatmul.mubr.msk.bf16.vlgmr.msra.gmra.mrb[32].mxu0 %vm547_vm2, %v1232_v27  ;;  %v1653_v10 = vsel %vm547_vm2, %v1648_v8, 0 }
 0x5ea   : > { %2996 = vmatprep.mubr.msk.bf16.mxu0 %vm3253_vm1, %v3252_v13 }
 0x5eb   : > { %2995 = vmatpush3.bf16.xpose.msra.mxu0 %v1553_v29  ;;  %v1696_v37 = vpop.permute.xlu1 %1695 }
 0x5ec   : > { %3000 = vmatprep.subr.bf16.mxu0 %v3252_v13  ;;  %v1646_v6 = vpop.permute.xlu0 %1645 }
 0x5f2   : > { %2997 = vmatmul.mubr.msk.bf16.vlgmr.msra.gmra.mrb[36].mxu0 %vm547_vm2, %v1546_v31 }
 0x5f3   : > { %3001 = vmatpush3.bf16.xpose.msra.mxu0 %v1603_v34  ;;  %3002 = vmatprep.mubr.msk.bf16.mxu0 %vm3253_vm1, %v3252_v13 }
 0x5f4   : > { %3012 = vmatprep.subr.bf16.mxu0 %v3252_v13 }
 0x5fa   : > { %3003 = vmatmul.mubr.msk.bf16.vlgmr.msra.gmra.mrb[40].mxu0 %vm547_vm2, %v1596_v33 }
 0x5fb   : > { %3013 = vmatpush3.bf16.xpose.msra.mxu0 %v1703_v36  ;;  %3014 = vmatprep.mubr.msk.bf16.mxu0 %vm3253_vm1, %v3252_v13 }
 0x5fc   : > { %3024 = vmatprep.subr.bf16.mxu0 %v3252_v13 }
 0x602   : > { %3015 = vmatmul.mubr.msk.bf16.vlgmr.msra.gmra.mrb[44].mxu0 %vm547_vm2, %v1696_v37 }
 0x603   : > { %3026 = vmatprep.mubr.msk.bf16.mxu0 %vm3253_vm1, %v3252_v13 }
 0x6ae   : > { %v1275_v41 = vpop.f32.mrb[24].mxu1 }
 0x6af   : > { %v2962_v42 = vpop.f32.mrb[25].mxu1 }
 0x6b0   : > { %v1278_v43 = vpop.f32.mrb[26].mxu1 }
 0x6b1   : > { %v2963_v44 = vpop.f32.mrb[27].mxu1 }
 0x6b4   : > { %v1323_v45 = vpop.f32.mrb[28].mxu0 }
 0x6b5   : > { %v1425_v46 = vpack.c.bf16 %v1323_v45, %v1275_v41  ;;  %v2968_v47 = vpop.f32.mrb[29].mxu0 }
 0x6b6   : > { %v1326_v48 = vpop.f32.mrb[30].mxu0  ;;  %v1371_v50 = vpop.f32.mrb[28].mxu1 }
 0x6b7   : > { %v2969_v49 = vpop.f32.mrb[31].mxu0  ;;  %2984 = vmatprep.mubr.msk.bf16.mxu1 %vm547_vm2, %v1425_v46  ;;  %v2974_v51 = vpop.f32.mrb[29].mxu1 }
 0x6b8   : > { %v1374_v52 = vpop.f32.mrb[30].mxu1 }
 0x6b9   : > { %v2975_v53 = vpop.f32.mrb[31].mxu1 }
 0x6bc   : > { %v1419_v54 = vpop.f32.mrb[32].mxu0 }
 0x6bd   : > { %v1426_v56 = vpack.c.bf16 %v1419_v54, %v1371_v50  ;;  %v2980_v57 = vpop.f32.mrb[33].mxu0 }
 0x6be   : > { %v1422_v61 = vpop.f32.mrb[34].mxu0 }
 0x6bf   : > { %v2981_v63 = vpop.f32.mrb[35].mxu0  ;;  %2985 = vmatmul.mubr.msk.bf16.vlgmr.msra.gmra.mrb[32].mxu1 %vm547_vm2, %v1426_v56 }
 0x6c0   : > { %2990 = vmatprep.mubr.msk.bf16.mxu1 %vm547_vm2, %v982_v60  ;;  %2989 = vmatpush3.bf16.msra.mxu1 %v1494_v58 }
 0x6c1   : > { %3006 = vmatprep.subr.bf16.mxu1 %v3252_v13 }
 0x6c5   : > { %v1589_v0 = vpop.f32.mrb[36].mxu0 }
 0x6c6   : > { %v2998_v3 = vpop.f32.mrb[37].mxu0  ;;  %v1745_v5 = vsel %vm547_vm2, %v1589_v0, -inf }
 0x6c7   : > { %1746 = vmax.xlane.f32.xlu0 %v1745_v5  ;;  %v1592_v7 = vpop.f32.mrb[38].mxu0 }
 0x6c8   : > { %v2999_v9 = vpop.f32.mrb[39].mxu0 }
 0x6cb   : > { %2991 = vmatmul.mubr.msk.bf16.vlgmr.msra.gmra.mrb[32].mxu1 %vm547_vm2, %v983_v4 }
 0x6cc   : > { %3007 = vmatpush3.bf16.xpose.msra.mxu1 %v1653_v10  ;;  %3008 = vmatprep.mubr.msk.bf16.mxu1 %vm3253_vm1, %v3252_v13 }
 0x6cd   : > { %v1639_v55 = vpop.f32.mrb[40].mxu0  ;;  %3018 = vmatprep.subr.bf16.mxu1 %v3252_v13 }
 0x6ce   : > { %v3004_v59 = vpop.f32.mrb[41].mxu0  ;;  %v1748_v60 = vsel %vm547_vm2, %v1639_v55, -inf }
 0x6cf   : > { %1749 = vmax.xlane.f32.xlu1 %v1748_v60  ;;  %v1642_v11 = vpop.f32.mrb[42].mxu0 }
 0x6d0   : > { %v3005_v12 = vpop.f32.mrb[43].mxu0 }
 0x6d3   : > { %3009 = vmatmul.mubr.msk.bf16.vlgmr.msra.gmra.mrb[36].mxu1 %vm547_vm2, %v1646_v6 }
 0x6d4   : > { %3020 = vmatprep.mubr.msk.bf16.mxu1 %vm3253_vm1, %v3252_v13 }
 0x6d5   : > { %v1739_v1 = vpop.f32.mrb[44].mxu0 }
 0x6d6   : > { %v3016_v2 = vpop.f32.mrb[45].mxu0  ;;  %v1754_v33 = vsel %vm547_vm2, %v1739_v1, -inf }
 0x6d7   : > { %v1742_v4 = vpop.f32.mrb[46].mxu0 }
 0x6d8   : > { %v3017_v14 = vpop.f32.mrb[47].mxu0 }
 0x754   : > { %v1747_v15 = vpop.xlane.xlu0 %1746 }
 0x755   : > { %v1757_v16 = vsub.f32 %v1589_v0, %v1747_v15 }
 0x757   : > { %v1761_v17 = vmul.f32 1.442695, %v1757_v16 }
 0x759   : > { %3193 = vpow2.f32 %v1761_v17 }
 0x75c   : > { %v1750_v21 = vpop.xlane.xlu1 %1749 }
 0x75d   : > { %v1758_v22 = vsub.f32 %v1639_v55, %v1750_v21 }
 0x75f   : > { %v1763_v24 = vmul.f32 1.442695, %v1758_v22 }
 0x761   : > { %3195 = vpow2.f32 %v1763_v24 }
 0x763   : > { %v3194_v18 = vpop.eup %3193 }
 0x764   : > { %v1769_v19 = vsel %vm547_vm2, %v3194_v18, 0.0 }
 0x765   : > { %1770 = vadd.xlane.f32.xlu1 %v1769_v19 }
 0x76b   : > { %v3196_v34 = vpop.eup %3195 }
 0x76c   : > { %v1772_v35 = vsel %vm547_vm2, %v3196_v34, 0.0 }
 0x776   : > { %1793 = vrot.lane.b32.xlu1 %v3356_v23, %s3261_s28 }
 0x77a   : > { %1889 = vrot.lane.b32.xlu1 %v3354_v20, %s3261_s28 }
 0x7a6   : > { %v1689_v27 = vpop.f32.mrb[36].mxu1 }
 0x7a7   : > { %v3010_v28 = vpop.f32.mrb[37].mxu1  ;;  %v1751_v29 = vsel %vm547_vm2, %v1689_v27, -inf }
 0x7a8   : > { %1752 = vmax.xlane.f32.xlu0 %v1751_v29  ;;  %v1692_v31 = vpop.f32.mrb[38].mxu1 }
 0x7a9   : > { %v3011_v32 = vpop.f32.mrb[39].mxu1 }
 0x7ac   : > { %1755 = vmax.xlane.f32.xlu0 %v1754_v33 }
 0x7b0   : > { %1773 = vadd.xlane.f32.xlu0 %v1772_v35 }
 0x7f2   : > { %v1771_v36 = vpop.xlane.xlu1 %1770 }
 0x7f3   : > { %3197 = vrcp.f32 %v1771_v36 }
 0x7f6   : > { %v1794_v37 = vpop.permute.xlu1 %1793 }
 0x7f7   : > { %v1799_v38 = vsel %vm794_vm3, %v1794_v37, 0 }
 0x7f8   : > { %3019 = vmatpush3.bf16.msra.mxu1 %v1799_v38 }
 0x7f9   : > { %3030 = vmatprep.subr.bf16.mxu1 %v3252_v13 }
 0x7fa   : > { %v1890_v41 = vpop.permute.xlu1 %1889 }
 0x7fb   : > { %v1895_v43 = vsel %vm794_vm3, %v1890_v41, 0 }
 0x7fd   : > { %v3198_v39 = vpop.eup %3197 }
 0x7fe   : > { %v1785_v40 = vmul.f32 %v3198_v39, %v3194_v18  ;;  %v2779_v18 = vld [vmem:[%s3693_s3 + $0x8] sm:$0xf] }
 0x7ff   : > { %v1996_v19 = vsel %vm794_vm3, %v2779_v18, 0 }
 0x800   : > { %v1789_v42 = vpack.c.bf16 %v1785_v40, %v1785_v40 }
 0x802   : > { %3021 = vmatmul.mubr.msk.bf16.vlgmr.msra.gmra.mrb[40].mxu1 %vm547_vm2, %v1789_v42 }
 0x803   : > { %3031 = vmatpush3.bf16.msra.mxu1 %v1895_v43  ;;  %3032 = vmatprep.mubr.msk.bf16.mxu1 %vm3253_vm1, %v3252_v13 }
 0x804   : > { %3116 = vmatprep.subr.msk.bf16.mxu1 %vm794_vm3, %v2779_v18 }
 0x835   : > { %v1753_v44 = vpop.xlane.xlu0 %1752 }
 0x836   : > { %v1759_v45 = vsub.f32 %v1689_v27, %v1753_v44 }
 0x838   : > { %v1765_v46 = vmul.f32 1.442695, %v1759_v45 }
 0x839   : > { %v1756_v47 = vpop.xlane.xlu0 %1755 }
 0x83a   : > { %3199 = vpow2.f32 %v1765_v46  ;;  %v1760_v48 = vsub.f32 %v1739_v1, %v1756_v47 }
 0x83c   : > { %v1767_v49 = vmul.f32 1.442695, %v1760_v48 }
 0x83d   : > { %v1774_v54 = vpop.xlane.xlu0 %1773 }
 0x83e   : > { %3201 = vpow2.f32 %v1767_v49 }
 0x83f   : > { %3203 = vrcp.f32 %v1774_v54 }
 0x844   : > { %v3200_v50 = vpop.eup %3199 }
 0x845   : > { %v1775_v51 = vsel %vm547_vm2, %v3200_v50, 0.0 }
 0x846   : > { %1776 = vadd.xlane.f32.xlu1 %v1775_v51 }
 0x848   : > { %v3202_v52 = vpop.eup %3201 }
 0x849   : > { %v1778_v53 = vsel %vm547_vm2, %v3202_v52, 0.0  ;;  %v3204_v63 = vpop.eup %3203 }
 0x84a   : > { %1779 = vadd.xlane.f32.xlu0 %v1778_v53  ;;  %v1786_v5 = vmul.f32 %v3204_v63, %v3196_v34 }
 0x84c   : > { %v1790_v59 = vpack.c.bf16 %v1786_v5, %v1786_v5 }
 0x857   : > { %1937 = vrot.lane.b32.xlu1 %v3360_v25, %s3261_s28 }
 0x85b   : > { %2103 = vrot.lane.b32.xlu1 %v3362_v26, %s3262_s29 }
 0x85f   : > { %2101 = vrot.lane.b32.xlu1 %v3362_v26, %s3263_s30 }
 0x860   : > { %1841 = vrot.lane.b32.xlu0 %v3362_v26, %s3261_s28 }
 0x863   : > { %2203 = vrot.lane.b32.xlu1 %v3360_v25, %s3262_s29 }
 0x864   : > { %2053 = vrot.lane.b32.xlu0 %v3356_v23, %s3262_s29 }
 0x867   : > { %2201 = vrot.lane.b32.xlu1 %v3360_v25, %s3263_s30 }
 0x868   : > { %2051 = vrot.lane.b32.xlu0 %v3356_v23, %s3263_s30 }
 0x86c   : > { %2153 = vrot.lane.b32.xlu0 %v3354_v20, %s3262_s29 }
 0x870   : > { %2151 = vrot.lane.b32.xlu0 %v3354_v20, %s3263_s30 }
 0x8d3   : > { %v1777_v56 = vpop.xlane.xlu1 %1776 }
 0x8d4   : > { %3205 = vrcp.f32 %v1777_v56 }
 0x8d5   : > { %v1835_v57 = vpop.f32.mrb[40].mxu1 }
 0x8d6   : > { %v3022_v58 = vpop.f32.mrb[41].mxu1 }
 0x8d7   : > { %v1838_v61 = vpop.f32.mrb[42].mxu1  ;;  %v1780_v0 = vpop.xlane.xlu0 %1779 }
 0x8d8   : > { %v3023_v3 = vpop.f32.mrb[43].mxu1  ;;  %3207 = vrcp.f32 %v1780_v0  ;;  %v1938_v10 = vpop.permute.xlu1 %1937 }
 0x8d9   : > { %v1943_v60 = vsel %vm794_vm3, %v1938_v10, 0 }
 0x8db   : > { %v1842_v7 = vpop.permute.xlu0 %1841 }
 0x8dc   : > { %v1847_v8 = vsel %vm794_vm3, %v1842_v7, 0  ;;  %v2104_v32 = vpop.permute.xlu1 %2103 }
 0x8dd   : > { %3025 = vmatpush3.bf16.msra.mxu0 %v1847_v8  ;;  %v2109_v40 = vsel %vm547_vm2, %v2104_v32, 0 }
 0x8de   : > { %v3206_v9 = vpop.eup %3205  ;;  %3036 = vmatprep.subr.bf16.mxu0 %v3252_v13 }
 0x8df   : > { %v1787_v55 = vmul.f32 %v3206_v9, %v3200_v50  ;;  %v2054_v6 = vpop.permute.xlu0 %2053 }
 0x8e0   : > { %3027 = vmatmul.mubr.msk.bf16.vlgmr.msra.gmra.mrb[48].mxu0 %vm547_vm2, %v1790_v59  ;;  %v2059_v14 = vsel %vm547_vm2, %v2054_v6, 0  ;;  %v2102_v38 = vpop.permute.xlu1 %2101 }
 0x8e1   : > { %v1791_v11 = vpack.c.bf16 %v1787_v55, %v1787_v55  ;;  %3037 = vmatpush3.bf16.msra.mxu0 %v1943_v60  ;;  %3038 = vmatprep.mubr.msk.bf16.mxu0 %vm3253_vm1, %v3252_v13 }
 0x8e2   : > { %v3208_v12 = vpop.eup %3207  ;;  %3048 = vmatprep.subr.bf16.mxu0 %v3252_v13 }
 0x8e3   : > { %3033 = vmatmul.mubr.msk.bf16.vlgmr.msra.gmra.mrb[44].mxu1 %vm547_vm2, %v1791_v11  ;;  %v1788_v1 = vmul.f32 %v3208_v12, %v3202_v52  ;;  %v2052_v4 = vpop.permute.xlu0 %2051 }
 0x8e4   : > { %3043 = vmatpush3.bf16.msra.mxu1 %v1996_v19  ;;  %v2204_v42 = vpop.permute.xlu1 %2203 }
 0x8e5   : > { %v1792_v2 = vpack.c.bf16 %v1788_v1, %v1788_v1  ;;  %3054 = vmatprep.subr.bf16.mxu1 %v3252_v13  ;;  %v2209_v46 = vsel %vm547_vm2, %v2204_v42, 0 }
 0x8e7   : > { %v2154_v15 = vpop.permute.xlu0 %2153 }
 0x8e8   : > { %3039 = vmatmul.mubr.msk.bf16.vlgmr.msra.gmra.mrb[52].mxu0 %vm547_vm2, %v1792_v2  ;;  %v2159_v16 = vsel %vm547_vm2, %v2154_v15, 0  ;;  %v2202_v50 = vpop.permute.xlu1 %2201 }
 0x8e9   : > { %3050 = vmatprep.mubr.msk.bf16.mxu0 %vm3253_vm1, %v3252_v13 }
 0x8ea   : > { %3049 = vmatpush3.bf16.xpose.msra.mxu0 %v2059_v14 }
 0x8eb   : > { %3060 = vmatprep.subr.bf16.mxu0 %v3252_v13  ;;  %v2152_v17 = vpop.permute.xlu0 %2151 }
 0x8f1   : > { %3051 = vmatmul.mubr.msk.bf16.vlgmr.msra.gmra.mrb[56].mxu0 %vm547_vm2, %v2052_v4 }
 0x8f2   : > { %3061 = vmatpush3.bf16.xpose.msra.mxu0 %v2159_v16  ;;  %3062 = vmatprep.mubr.msk.bf16.mxu0 %vm3253_vm1, %v3252_v13 }
 0x8f3   : > { %3072 = vmatprep.subr.bf16.mxu0 %v3252_v13 }
 0x8f9   : > { %3063 = vmatmul.mubr.msk.bf16.vlgmr.msra.gmra.mrb[60].mxu0 %vm547_vm2, %v2152_v17 }
 0x8fa   : > { %3074 = vmatprep.mubr.msk.bf16.mxu0 %vm3253_vm1, %v3252_v13 }
 0x9b3   : > { %v1883_v21 = vpop.f32.mrb[48].mxu0 }
 0x9b4   : > { %v1985_v22 = vpack.c.bf16 %v1883_v21, %v1835_v57  ;;  %v3028_v24 = vpop.f32.mrb[49].mxu0 }
 0x9b5   : > { %v1886_v27 = vpop.f32.mrb[50].mxu0 }
 0x9b6   : > { %v1931_v28 = vpop.f32.mrb[44].mxu1  ;;  %v3029_v29 = vpop.f32.mrb[51].mxu0  ;;  %3044 = vmatprep.mubr.msk.bf16.mxu1 %vm547_vm2, %v1985_v22 }
 0x9b7   : > { %v3034_v31 = vpop.f32.mrb[45].mxu1 }
 0x9b8   : > { %v1934_v33 = vpop.f32.mrb[46].mxu1 }
 0x9b9   : > { %v3035_v34 = vpop.f32.mrb[47].mxu1 }
 0x9bb   : > { %v1979_v35 = vpop.f32.mrb[52].mxu0 }
 0x9bc   : > { %v1986_v36 = vpack.c.bf16 %v1979_v35, %v1931_v28  ;;  %v3040_v37 = vpop.f32.mrb[53].mxu0 }
 0x9bd   : > { %v1982_v39 = vpop.f32.mrb[54].mxu0 }
 0x9be   : > { %v3041_v41 = vpop.f32.mrb[55].mxu0  ;;  %3045 = vmatmul.mubr.msk.bf16.vlgmr.msra.gmra.mrb[32].mxu1 %vm547_vm2, %v1986_v36 }
 0x9bf   : > { %3055 = vmatpush3.bf16.xpose.msra.mxu1 %v2109_v40  ;;  %3056 = vmatprep.mubr.msk.bf16.mxu1 %vm3253_vm1, %v3252_v13 }
 0x9c0   : > { %3066 = vmatprep.subr.bf16.mxu1 %v3252_v13 }
 0x9c4   : > { %v2095_v43 = vpop.f32.mrb[56].mxu0 }
 0x9c5   : > { %v3052_v44 = vpop.f32.mrb[57].mxu0  ;;  %v2251_v45 = vsel %vm547_vm2, %v2095_v43, -inf }
 0x9c6   : > { %3057 = vmatmul.mubr.msk.bf16.vlgmr.msra.gmra.mrb[48].mxu1 %vm547_vm2, %v2102_v38  ;;  %2252 = vmax.xlane.f32.xlu0 %v2251_v45  ;;  %v2098_v47 = vpop.f32.mrb[58].mxu0 }
 0x9c7   : > { %3067 = vmatpush3.bf16.xpose.msra.mxu1 %v2209_v46  ;;  %v3053_v48 = vpop.f32.mrb[59].mxu0  ;;  %3068 = vmatprep.mubr.msk.bf16.mxu1 %vm3253_vm1, %v3252_v13 }
 0x9c8   : > { %3078 = vmatprep.subr.bf16.mxu1 %v3252_v13 }
 0x9cc   : > { %v2195_v49 = vpop.f32.mrb[60].mxu0 }
 0x9cd   : > { %v3064_v51 = vpop.f32.mrb[61].mxu0  ;;  %v2257_v52 = vsel %vm547_vm2, %v2195_v49, -inf }
 0x9ce   : > { %3069 = vmatmul.mubr.msk.bf16.vlgmr.msra.gmra.mrb[52].mxu1 %vm547_vm2, %v2202_v50  ;;  %2258 = vmax.xlane.f32.xlu0 %v2257_v52  ;;  %v2198_v53 = vpop.f32.mrb[62].mxu0 }
 0x9cf   : > { %v3065_v54 = vpop.f32.mrb[63].mxu0  ;;  %3080 = vmatprep.mubr.msk.bf16.mxu1 %vm3253_vm1, %v3252_v13 }
 0xa53   : > { %v2253_v56 = vpop.xlane.xlu0 %2252 }
 0xa54   : > { %v2263_v57 = vsub.f32 %v2095_v43, %v2253_v56 }
 0xa56   : > { %v2267_v61 = vmul.f32 1.442695, %v2263_v57  ;;  %v2790_v57 = vld [vmem:[%s3693_s3 + $0xc] sm:$0xf] }
 0xa58   : > { %3209 = vpow2.f32 %v2267_v61 }
 0xa5b   : > { %v2259_v58 = vpop.xlane.xlu0 %2258 }
 0xa5c   : > { %v2265_v63 = vsub.f32 %v2195_v49, %v2259_v58  ;;  %v2502_v58 = vsel %vm794_vm3, %v2790_v57, 0 }
 0xa5e   : > { %v2271_v0 = vmul.f32 1.442695, %v2265_v63 }
 0xa60   : > { %3211 = vpow2.f32 %v2271_v0 }
 0xa62   : > { %v3210_v8 = vpop.eup %3209 }
 0xa63   : > { %v2275_v55 = vsel %vm547_vm2, %v3210_v8, 0.0 }
 0xa6a   : > { %v3212_v59 = vpop.eup %3211 }
 0xa6b   : > { %v2281_v6 = vsel %vm547_vm2, %v3212_v59, 0.0 }
 0xa99   : > { %v2145_v3 = vpop.f32.mrb[48].mxu1 }
 0xa9a   : > { %v3058_v5 = vpop.f32.mrb[49].mxu1  ;;  %v2254_v7 = vsel %vm547_vm2, %v2145_v3, -inf }
 0xa9b   : > { %2255 = vmax.xlane.f32.xlu1 %v2254_v7  ;;  %v2148_v9 = vpop.f32.mrb[50].mxu1 }
 0xa9c   : > { %v3059_v10 = vpop.f32.mrb[51].mxu1 }
 0xa9f   : > { %2276 = vadd.xlane.f32.xlu1 %v2275_v55 }
 0xaa1   : > { %v2245_v60 = vpop.f32.mrb[52].mxu1 }
 0xaa2   : > { %v3070_v11 = vpop.f32.mrb[53].mxu1  ;;  %v2260_v12 = vsel %vm547_vm2, %v2245_v60, -inf }
 0xaa3   : > { %v2248_v1 = vpop.f32.mrb[54].mxu1  ;;  %2261 = vmax.xlane.f32.xlu0 %v2260_v12  ;;  %2282 = vadd.xlane.f32.xlu1 %v2281_v6 }
 0xaa4   : > { %v3071_v2 = vpop.f32.mrb[55].mxu1 }
 0xab4   : > { %2299 = vrot.lane.b32.xlu1 %v3356_v23, %s3264_s9 }
 0xab8   : > { %2395 = vrot.lane.b32.xlu1 %v3354_v20, %s3264_s9 }
 0xabc   : > { %2443 = vrot.lane.b32.xlu1 %v3360_v25, %s3264_s9 }
 0xb28   : > { %v2256_v4 = vpop.xlane.xlu1 %2255 }
 0xb29   : > { %v2264_v14 = vsub.f32 %v2145_v3, %v2256_v4 }
 0xb2b   : > { %v2269_v15 = vmul.f32 1.442695, %v2264_v14 }
 0xb2c   : > { %v2277_v16 = vpop.xlane.xlu1 %2276 }
 0xb2d   : > { %3213 = vpow2.f32 %v2269_v15 }
 0xb2e   : > { %3215 = vrcp.f32 %v2277_v16 }
 0xb30   : > { %v2283_v17 = vpop.xlane.xlu1 %2282  ;;  %v2262_v18 = vpop.xlane.xlu0 %2261 }
 0xb31   : > { %v2266_v19 = vsub.f32 %v2245_v60, %v2262_v18  ;;  %3217 = vrcp.f32 %v2283_v17 }
 0xb33   : > { %v2273_v21 = vmul.f32 1.442695, %v2266_v19 }
 0xb34   : > { %v2300_v22 = vpop.permute.xlu1 %2299 }
 0xb35   : > { %3219 = vpow2.f32 %v2273_v21  ;;  %v2305_v23 = vsel %vm794_vm3, %v2300_v22, 0 }
 0xb36   : > { %3073 = vmatpush3.bf16.msra.mxu0 %v2305_v23 }
 0xb37   : > { %v3214_v20 = vpop.eup %3213  ;;  %3084 = vmatprep.subr.bf16.mxu0 %v3252_v13 }
 0xb38   : > { %v3216_v25 = vpop.eup %3215  ;;  %v2278_v24 = vsel %vm547_vm2, %v3214_v20, 0.0  ;;  %v2396_v28 = vpop.permute.xlu1 %2395 }
 0xb39   : > { %v2291_v27 = vmul.f32 %v3216_v25, %v3210_v8  ;;  %2279 = vadd.xlane.f32.xlu0 %v2278_v24  ;;  %v2401_v32 = vsel %vm794_vm3, %v2396_v28, 0 }
 0xb3b   : > { %v2295_v29 = vpack.c.bf16 %v2291_v27, %v2291_v27  ;;  %v3218_v31 = vpop.eup %3217 }
 0xb3c   : > { %v2293_v34 = vmul.f32 %v3218_v31, %v3212_v59  ;;  %v2444_v43 = vpop.permute.xlu1 %2443  ;;  %v2793_v59 = vld [vmem:[%s3695_s5] ss:$0 sm:$0xff] }
 0xb3d   : > { %3075 = vmatmul.mubr.msk.bf16.vlgmr.msra.gmra.mrb[64].mxu0 %vm547_vm2, %v2295_v29  ;;  %v2449_v45 = vsel %vm794_vm3, %v2444_v43, 0 }
 0xb3e   : > { %3085 = vmatpush3.bf16.msra.mxu0 %v2401_v32  ;;  %3086 = vmatprep.mubr.msk.bf16.mxu0 %vm3253_vm1, %v3252_v13  ;;  %v2297_v36 = vpack.c.bf16 %v2293_v34, %v2293_v34 }
 0xb3f   : > { %v3220_v33 = vpop.eup %3219 }
 0xb40   : > { %v2284_v35 = vsel %vm547_vm2, %v3220_v33, 0.0 }
 0xb41   : > { %2285 = vadd.xlane.f32.xlu0 %v2284_v35 }
 0xb45   : > { %3087 = vmatmul.mubr.msk.bf16.vlgmr.msra.gmra.mrb[68].mxu0 %vm547_vm2, %v2297_v36 }
 0xb57   : > { %2347 = vrot.lane.b32.xlu0 %v3362_v26, %s3264_s9 }
 0xbc6   : > { %v2280_v37 = vpop.xlane.xlu0 %2279 }
 0xbc7   : > { %3221 = vrcp.f32 %v2280_v37 }
 0xbce   : > { %v2286_v38 = vpop.xlane.xlu0 %2285 }
 0xbcf   : > { %3223 = vrcp.f32 %v2286_v38 }
 0xbd1   : > { %v3222_v39 = vpop.eup %3221 }
 0xbd2   : > { %v2292_v40 = vmul.f32 %v3222_v39, %v3214_v20  ;;  %v2348_v41 = vpop.permute.xlu0 %2347 }
 0xbd3   : > { %v2353_v42 = vsel %vm794_vm3, %v2348_v41, 0 }
 0xbd4   : > { %3079 = vmatpush3.bf16.msra.mxu1 %v2353_v42  ;;  %v2296_v44 = vpack.c.bf16 %v2292_v40, %v2292_v40 }
 0xbd5   : > { %3090 = vmatprep.subr.bf16.mxu1 %v3252_v13 }
 0xbd7   : > { %3081 = vmatmul.mubr.msk.bf16.vlgmr.msra.gmra.mrb[56].mxu1 %vm547_vm2, %v2296_v44 }
 0xbd8   : > { %3091 = vmatpush3.bf16.msra.mxu1 %v2449_v45  ;;  %3092 = vmatprep.mubr.msk.bf16.mxu1 %vm3253_vm1, %v3252_v13 }
 0xbd9   : > { %v3224_v26 = vpop.eup %3223  ;;  %3117 = vmatprep.subr.msk.bf16.mxu1 %vm794_vm3, %v2790_v57 }
 0xbda   : > { %v2294_v46 = vmul.f32 %v3224_v26, %v3220_v33 }
 0xbdc   : > { %v2298_v47 = vpack.c.bf16 %v2294_v46, %v2294_v46 }
 0xbdf   : > { %3093 = vmatmul.mubr.msk.bf16.vlgmr.msra.gmra.mrb[60].mxu1 %vm547_vm2, %v2298_v47 }
 0xbe0   : > { %3097 = vmatpush3.bf16.msra.mxu1 %v2502_v58 }
 0xc10   : > { %v2341_v48 = vpop.f32.mrb[64].mxu0 }
 0xc11   : > { %v3076_v49 = vpop.f32.mrb[65].mxu0 }
 0xc12   : > { %v2344_v50 = vpop.f32.mrb[66].mxu0 }
 0xc13   : > { %v3077_v51 = vpop.f32.mrb[67].mxu0 }
 0xc18   : > { %v2437_v52 = vpop.f32.mrb[68].mxu0 }
 0xc19   : > { %v3088_v53 = vpop.f32.mrb[69].mxu0 }
 0xc1a   : > { %v2440_v54 = vpop.f32.mrb[70].mxu0 }
 0xc1b   : > { %v3089_v56 = vpop.f32.mrb[71].mxu0 }
 0xcaa   : > { %v2389_v61 = vpop.f32.mrb[56].mxu1 }
 0xcab   : > { %v2491_v63 = vpack.c.bf16 %v2389_v61, %v2341_v48  ;;  %v3082_v0 = vpop.f32.mrb[57].mxu1 }
 0xcac   : > { %v2392_v3 = vpop.f32.mrb[58].mxu1 }
 0xcad   : > { %v3083_v5 = vpop.f32.mrb[59].mxu1  ;;  %3098 = vmatprep.mubr.msk.bf16.mxu1 %vm547_vm2, %v2491_v63 }
 0xcb2   : > { %v2485_v7 = vpop.f32.mrb[60].mxu1 }
 0xcb3   : > { %v2492_v8 = vpack.c.bf16 %v2485_v7, %v2437_v52  ;;  %v3094_v9 = vpop.f32.mrb[61].mxu1 }
 0xcb4   : > { %v2488_v10 = vpop.f32.mrb[62].mxu1 }
 0xcb5   : > { %v3095_v55 = vpop.f32.mrb[63].mxu1  ;;  %3099 = vmatmul.mubr.msk.bf16.vlgmr.msra.gmra.mrb[32].mxu1 %vm547_vm2, %v2492_v8 }
 0xd88   : > { %v3100_v60 = vpop.f32.mrb[32].mxu1 }
 0xd89   : > { %v2566_v11 = vadd.f32 %v3100_v60, %v2793_v59  ;;  %v2538_v12 = vpop.f32.mrb[33].mxu1 }
 0xd8a   : > { %v2564_v6 = vadd.f32 %v2793_v59, %v2538_v12  ;;  %v3101_v1 = vpop.f32.mrb[34].mxu1 }
 0xd8b   : > { %v2567_v2 = vadd.f32 %v3101_v1, %v2793_v59  ;;  %v2541_v4 = vpop.f32.mrb[35].mxu1 }
 0xd8c   : > { %v2568_v14 = vcombine.low %v2564_v6, %v2566_v11  ;;  %v2569_v15 = vcombine.high %v2564_v6, %v2566_v11  ;;  %v2565_v16 = vadd.f32 %v2793_v59, %v2541_v4 }
 0xd8e   : > { %v2584_v17 = vcombine.low %v2565_v16, %v2567_v2  ;;  %v2585_v18 = vcombine.high %v2565_v16, %v2567_v2  ;;  %v2576_v19 = vrot.slane %v2568_v14, %v3333_v30  ;;  %v2583_v21 = vrot.slane %v2569_v15, %v3333_v30 }
 0xd90   : > { %v2592_v22 = vrot.slane %v2584_v17, %v3333_v30  ;;  %v2599_v23 = vrot.slane %v2585_v18, %v3333_v30 }
 0xd92   : > { %v2600_v20 = vcombine.low %v2576_v19, %v2592_v22  ;;  %v2601_v25 = vcombine.high %v2576_v19, %v2592_v22  ;;  %v2616_v24 = vcombine.low %v2583_v21, %v2599_v23  ;;  %v2617_v27 = vcombine.high %v2583_v21, %v2599_v23 }
 0xd94   : > { %v2608_v28 = vrot.slane %v2600_v20, %v3339_v62  ;;  %v2615_v29 = vrot.slane %v2601_v25, %v3339_v62  ;;  %v2624_v31 = vrot.slane %v2616_v24, %v3339_v62  ;;  %v2631_v32 = vrot.slane %v2617_v27, %v3339_v62 }
 0xd96   : > { %v2632_v30 = vcombine.high %v2608_v28, %v3252_v13  ;;  %v2633_v33 = vcombine.high %v2615_v29, %v3252_v13  ;;  %v2634_v34 = vcombine.high %v2624_v31, %v3252_v13  ;;  %v2635_v35 = vcombine.high %v2631_v32, %v3252_v13 }
 0xd97   : > { %v2636_v36 = vpack.c.bf16 %v2608_v28, %v2608_v28  ;;  %v2638_v37 = vpack.c.bf16 %v2615_v29, %v2615_v29  ;;  %v2640_v38 = vpack.c.bf16 %v2624_v31, %v2624_v31  ;;  %v2642_v39 = vpack.c.bf16 %v2631_v32, %v2631_v32 }
 0xd98   : > { %v2637_v40 = vpack.c.bf16 %v2632_v30, %v2632_v30  ;;  %v2639_v41 = vpack.c.bf16 %v2633_v33, %v2633_v33  ;;  %v2641_v62 = vpack.c.bf16 %v2634_v34, %v2634_v34  ;;  %v2643_v42 = vpack.c.bf16 %v2635_v35, %v2635_v35 }
 0xd99   : > { %2645 = vst.msk [vmem:[%s282_s17] sm:$0x3] %vm2644_vm4, %v2636_v36  ;;  %2647 = vst.msk [vmem:[%s282_s17 + $0x4] sm:$0x3] %vm2644_vm4, %v2638_v37 }
 0xd9a   : > { %2649 = vst.msk [vmem:[%s282_s17 + $0x8] sm:$0x3] %vm2644_vm4, %v2640_v38  ;;  %2651 = vst.msk [vmem:[%s282_s17 + $0xc] sm:$0x3] %vm2644_vm4, %v2642_v39 }
 0xd9b   : > { %2646 = vst.msk [vmem:[%s282_s17 + $0x2] sm:$0x3] %vm2644_vm4, %v2637_v40  ;;  %2648 = vst.msk [vmem:[%s282_s17 + $0x6] sm:$0x3] %vm2644_vm4, %v2639_v41 }
 0xd9c   : > { %2650 = vst.msk [vmem:[%s282_s17 + $0xa] sm:$0x3] %vm2644_vm4, %v2641_v62  ;;  %2652 = vst.msk [vmem:[%s282_s17 + $0xe] sm:$0x3] %vm2644_vm4, %v2643_v42 }
 0xd9d PF: > { %s16_s23 = sadd.s32 1, %s3247_s23   ;;  %s3697_s21 = smov %s3243_s22 }
 0xd9e   : > { %p13_p5 = scmp.ge.s32.totalorder %s16_s23, 4   ;;  %s3698_s22 = smov %s3700_s24 }
 0xda0   :  { %15 = sbr.rel (!%p13_p5) target bundleno = 2 (0x2), region = 77 }

</bundles_post_ra>
